<compile_context>
chip_gen: v6e
topology: v6e:2x2x1
jax: 0.10.0
libtpu: 0.0.40
codegen_flags: <defaults>
</compile_context>

<pallas_src>
import functools

import jax
import jax.numpy as jnp
from jax.experimental import pallas as pl
from jax.experimental.pallas import tpu as pltpu


def _gelu(x):
    # TODO(synk): torch nn.GELU default is the exact erf form; Mosaic has no
    # guaranteed erf lowering, so the tanh approximation is used (~1e-4 diff).
    return jax.nn.gelu(x, approximate=True)


def _moe_cross_attn_kernel(x_ref, y_ref, tt_ref,
                           wq_ref, wkv_ref,
                           w1_ref, b1_ref,
                           ws2_ref, bs2_ref,
                           wl2_ref, bl2_ref,
                           out_ref, *, num_heads, compute_dtype):
    # TODO(synk): the stateful k/v caching branch (token_types[0][0] == 1 reads
    # self.k/self.v module state) is not reproduced; this kernel always
    # implements the "compute kv from y" branch.
    Bb, Nt, C = x_ref.shape
    M = y_ref.shape[1]
    d = C // num_heads
    Hh2 = w1_ref.shape[1]            # fused hidden width = 2 * mlp hidden
    Hh = Hh2 // 2

    def mm(lhs, rhs):                # (R, K) @ (K, S) -> (R, S), f32 accum
        return jax.lax.dot_general(
            lhs.astype(compute_dtype), rhs.astype(compute_dtype),
            (((1,), (0,)), ((), ())), preferred_element_type=jnp.float32)

    def bmm(lhs, rhs, contract):     # batched over the leading (Bb) dim
        return jax.lax.dot_general(
            lhs.astype(compute_dtype), rhs.astype(compute_dtype),
            (contract, ((0,), (0,))), preferred_element_type=jnp.float32)

    x2 = x_ref[...].reshape(Bb * Nt, C)     # leading-dim merge: layout-free
    y2 = y_ref[...].reshape(Bb * M, C)

    # q / kv projections (softmax scale pre-folded into wq at packing time).
    q = mm(x2, wq_ref[...]).reshape(Bb, Nt, C)            # (Bb, Nt, C)
    kv = mm(y2, wkv_ref[...]).reshape(Bb, M, 2 * C)       # (Bb, M, 2C)
    k = kv[:, :, :C]
    v = kv[:, :, C:]

    # Per-head attention (head_dim = d), batched over Bb.  Head outputs are
    # lane-concatenated back into one (Bb*Nt, C) attention-output tile so the
    # fused dual-expert fc1 runs as a SINGLE K=C MXU contraction instead of H
    # padded K=d passes plus H-1 full-width f32 accumulations.
    # TODO(synk): a fully head-batched einsum('bnhd,bmhd->bhnm') would also
    # remove the per-head q/k/v lane slices, but it needs a lane<->sublane
    # reshape (Bb*Nt, C) -> (Bb, Nt, H, d) that Mosaic does not reliably lower
    # at d=8, so the (now-cheap) head loop is kept for the attention dots only.
    # TODO(synk): on v6e/v7x the exp below could run in bf16 on the EUP when
    # compute_dtype is bf16; kept in f32 for portability (v5e has no bf16 EUP).
    head_outs = []
    for h in range(num_heads):
        sl = slice(h * d, (h + 1) * d)
        logits = bmm(q[:, :, sl], k[:, :, sl], ((2,), (2,)))   # (Bb, Nt, M)
        logits = logits - jnp.max(logits, axis=-1, keepdims=True)
        p = jnp.exp(logits)
        inv = pl.reciprocal(jnp.sum(p, axis=-1, keepdims=True), approx=True)
        head_outs.append(bmm(p, v[:, :, sl], ((2,), (1,))) * inv)  # (Bb, Nt, d)

    a = jnp.concatenate(head_outs, axis=-1).reshape(Bb * Nt, C)

    # Fused MoE fc1 (both experts at once), GELU once, split for the two fc2.
    h1 = _gelu(mm(a, w1_ref[...]) + b1_ref[...])           # (Bb*Nt, 2*Hh)
    o_s = mm(h1[:, :Hh], ws2_ref[...]) + bs2_ref[...]      # (Bb*Nt, C)
    o_l = mm(h1[:, Hh:], wl2_ref[...]) + bl2_ref[...]      # (Bb*Nt, C)

    # token_types arrive lane-dense (broadcast over C in the wrapper).
    tt = tt_ref[...].reshape(Bb * Nt, C)
    out = jnp.where(tt == 0, o_s, jnp.where(tt == 1, o_l, jnp.zeros_like(o_s)))
    out_ref[...] = out.reshape(Bb, Nt, C).astype(out_ref.dtype)


def _largest_divisor(n, cap):
    cap = max(1, min(n, cap))
    while n % cap:
        cap -= 1
    return cap


def _pick_block_b(batch):
    # Cap Bb at batch//2 so the grid always has >= 2 steps when batch >= 2:
    # lets dimension_semantics=("parallel", ...) shard steps across v7x's
    # two TensorCores (no-op on single-core v5e/v6e).
    return _largest_divisor(batch, max(1, min(8, batch // 2)))


def _pick_block_n(n, cap=128):
    # Largest divisor of N up to `cap`, preferring multiples of 8 so the
    # in-kernel (Bb, Nt, C) -> (Bb*Nt, C) merge stays layout-free.
    if n <= cap:
        return n
    best = _largest_divisor(n, cap)
    t = best
    while t >= 8:
        if n % t == 0 and t % 8 == 0:
            return t
        t -= 1
    return best


def _derive_vmem_limit(io_block_bytes, weight_bytes, weight_buffers):
    # Derive the scoped-VMEM request from the actual footprint instead of a
    # hard-coded 32 MiB, clamped to ~75% of the chip's physical VMEM
    # (64 MiB on v7x, 128 MiB on v5e/v6e).
    try:
        cap = pltpu.get_tpu_info().vmem_capacity_bytes
    except Exception:
        cap = 64 * 1024 * 1024
    need = 2 * io_block_bytes + weight_buffers * weight_bytes  # dbl-buffered I/O
    need = int(need * 1.5) + (8 << 20)                         # live intermediates
    return int(min(max(need, 32 << 20), int(0.75 * cap)))


def moe_cross_attention(x, y, token_types, params, num_heads, *,
                        compute_dtype=jnp.float32, block_b=None, block_n=None,
                        single_buffer_weights=True):
    B, N, C = x.shape
    M = y.shape[1]
    Hh2 = params["w1_t"].shape[1]
    Hh = Hh2 // 2

    Bb = _pick_block_b(B) if block_b is None else block_b
    Nt = _pick_block_n(N) if block_n is None else block_n
    assert B % Bb == 0 and N % Nt == 0, (B, Bb, N, Nt)

    # Lane-dense token types: broadcast over C in the wrapper so the block DMA
    # moves full rows instead of 4-byte rows and the kernel select needs no
    # lane broadcast.
    tt_dense = jnp.broadcast_to(
        token_types.astype(jnp.int32)[..., None], (B, N, C))

    kernel = functools.partial(_moe_cross_attn_kernel,
                               num_heads=num_heads, compute_dtype=compute_dtype)

    weight_buffers = 1 if single_buffer_weights else 2

    def resident(shape):
        # Whole (small) weight resident in VMEM; constant index_map so it is
        # DMA'd once and revisited across grid steps.  With
        # single_buffer_weights the block is single-buffered, halving the
        # resident-weight VMEM footprint (matters most on v7x's 64 MiB VMEM).
        if single_buffer_weights:
            return pl.BlockSpec(shape, lambda b, n: (0, 0),
                                pipeline_mode=pl.Buffered(buffer_count=1))
        return pl.BlockSpec(shape, lambda b, n: (0, 0))

    grid_spec = pltpu.PrefetchScalarGridSpec(
        num_scalar_prefetch=0,
        grid=(B // Bb, N // Nt),
        in_specs=[
            pl.BlockSpec((Bb, Nt, C), lambda b, n: (b, n, 0)),   # x
            pl.BlockSpec((Bb, M, C), lambda b, n: (b, 0, 0)),    # y (full M)
            pl.BlockSpec((Bb, Nt, C), lambda b, n: (b, n, 0)),   # token types
            resident((C, C)),          # wq^T (softmax scale folded in)
            resident((C, 2 * C)),      # wkv^T
            resident((C, Hh2)),        # fused [expert_s | expert_l] fc1^T
            resident((1, Hh2)),        # fused fc1 bias
            resident((Hh, C)),         # expert_s fc2^T
            resident((1, C)),          # expert_s fc2 bias
            resident((Hh, C)),         # expert_l fc2^T
            resident((1, C)),          # expert_l fc2 bias
        ],
        out_specs=pl.BlockSpec((Bb, Nt, C), lambda b, n: (b, n, 0)),
    )

    xb = jnp.dtype(x.dtype).itemsize
    io_block_bytes = (Bb * Nt * C * xb        # x block
                      + Bb * M * C * xb        # y block
                      + Bb * Nt * C * 4        # token-type block (int32)
                      + Bb * Nt * C * xb)      # out block
    weight_bytes = sum(int(v.size) * jnp.dtype(v.dtype).itemsize
                       for v in params.values())

    return pl.pallas_call(
        kernel,
        grid_spec=grid_spec,
        out_shape=jax.ShapeDtypeStruct((B, N, C), x.dtype),
        compiler_params=pltpu.CompilerParams(
            dimension_semantics=("parallel", "parallel"),
            vmem_limit_bytes=_derive_vmem_limit(io_block_bytes, weight_bytes,
                                                weight_buffers)),
    )(x, y, tt_dense,
      params["wq_t"], params["wkv_t"],
      params["w1_t"], params["b1"],
      params["ws2_t"], params["bs2"],
      params["wl2_t"], params["bl2"])


def init_params(key, dim, mlp_ratio=4.0):
    """Raw torch-layout weights (trunc_normal std=0.02, zero biases)."""
    hidden = int(dim * mlp_ratio) // 4
    ks = jax.random.split(key, 6)

    def tn(k, shape):
        return 0.02 * jax.random.truncated_normal(k, -2.0, 2.0, shape, jnp.float32)

    return dict(
        wq=tn(ks[0], (dim, dim)),            # torch Linear weight is (out, in)
        wkv=tn(ks[1], (2 * dim, dim)),
        ws1=tn(ks[2], (hidden, dim)), bs1=jnp.zeros((hidden,), jnp.float32),
        ws2=tn(ks[3], (dim, hidden)), bs2=jnp.zeros((dim,), jnp.float32),
        wl1=tn(ks[4], (hidden, dim)), bl1=jnp.zeros((hidden,), jnp.float32),
        wl2=tn(ks[5], (dim, hidden)), bl2=jnp.zeros((dim,), jnp.float32),
    )


def pack_params(raw, num_heads, dim, *, dtype=jnp.float32):
    """One-time constant transform: transpose to (in, out), fold the softmax
    scale into wq, and fuse the two experts' fc1 along the output dim."""
    d = dim // num_heads
    scale = d ** (-0.5)
    packed = dict(
        wq_t=raw["wq"].T * scale,
        wkv_t=raw["wkv"].T,
        w1_t=jnp.concatenate([raw["ws1"].T, raw["wl1"].T], axis=1),
        b1=jnp.concatenate([raw["bs1"], raw["bl1"]])[None, :],
        ws2_t=raw["ws2"].T, bs2=raw["bs2"][None, :],
        wl2_t=raw["wl2"].T, bl2=raw["bl2"][None, :],
    )
    return {k: v.astype(dtype) for k, v in packed.items()}


def reference(x, y, token_types, raw, num_heads):
    """Pure-JAX reference mirroring the PyTorch forward (eval mode, sr_ratio=1)."""
    B, N, C = x.shape
    M = y.shape[1]
    d = C // num_heads
    scale = d ** (-0.5)
    q = (x @ raw["wq"].T).reshape(B, N, num_heads, d).transpose(0, 2, 1, 3)
    kv = y @ raw["wkv"].T
    k = kv[..., :C].reshape(B, M, num_heads, d).transpose(0, 2, 1, 3)
    v = kv[..., C:].reshape(B, M, num_heads, d).transpose(0, 2, 1, 3)
    attn = jax.nn.softmax(jnp.einsum("bhnd,bhmd->bhnm", q, k) * scale, axis=-1)
    a = jnp.einsum("bhnm,bhmd->bhnd", attn, v).transpose(0, 2, 1, 3).reshape(B, N, C)

    def expert(w1, b1, w2, b2):
        h = _gelu(a @ w1.T + b1)
        return h @ w2.T + b2

    o_s = expert(raw["ws1"], raw["bs1"], raw["ws2"], raw["bs2"])
    o_l = expert(raw["wl1"], raw["bl1"], raw["wl2"], raw["bl2"])
    tt = token_types[..., None]
    return jnp.where(tt == 0, o_s, jnp.where(tt == 1, o_l, 0.0))


if __name__ == "__main__":
    B, N, C, H = 2, 64, 32, 4          # dim=32, num_heads=4, head_dim=8, mlp hidden=32
    key = jax.random.PRNGKey(0)
    kx, ky, kp = jax.random.split(key, 3)
    x = jax.random.normal(kx, (B, N, C), jnp.float32)
    y = jax.random.normal(ky, (B, N, C), jnp.float32)
    # token_types[0][0] == 0 -> the "compute kv from y" branch of the forward.
    token_types = jnp.concatenate(
        [jnp.zeros((B, N // 2), jnp.int32), jnp.ones((B, N - N // 2), jnp.int32)],
        axis=1)

    raw = init_params(kp, C, mlp_ratio=4.0)
    params = pack_params(raw, H, C)            # f32 weights for reference parity

    run = functools.partial(moe_cross_attention, x, y, token_types, params, H)
    try:
        out = jax.block_until_ready(run(single_buffer_weights=True))
        single_buffer_ok = True
    except Exception:
        # Fallback for JAX builds that reject pl.Buffered(buffer_count=1) on a
        # resident-weight BlockSpec; the kernel itself is unchanged.
        out = jax.block_until_ready(run(single_buffer_weights=False))
        single_buffer_ok = False

    ref = reference(x, y, token_types, raw, H)
    assert out.shape == (B, N, C)
    max_err = float(jnp.max(jnp.abs(out - ref)))
    # approx reciprocal in the softmax denominator -> slightly looser tolerance.
    assert jnp.allclose(out, ref, atol=2e-4, rtol=2e-4), f"max_err={max_err}"

    # Recommended v6e/v7x configuration from the perf review: bf16 weights and
    # bf16 matmul operands with f32 accumulation (fewer MXU passes, half the
    # resident-weight / kv VMEM footprint).  Looser tolerance vs f32 reference.
    params_bf16 = pack_params(raw, H, C, dtype=jnp.bfloat16)
    out_bf16 = jax.block_until_ready(
        moe_cross_attention(x, y, token_types, params_bf16, H,
                            compute_dtype=jnp.bfloat16,
                            single_buffer_weights=single_buffer_ok))
    max_err_bf16 = float(jnp.max(jnp.abs(out_bf16 - ref)))
    assert jnp.allclose(out_bf16, ref, atol=5e-3, rtol=5e-2), \
        f"bf16 max_err={max_err_bf16}"

    print("KERNEL_OK")
</pallas_src>

<mosaic_0001>
module attributes {stable_mosaic.version = 11 : i64} {
  func.func @_moe_cross_attn_kernel(%arg0: i32, %arg1: i32, %arg2: memref<1x64x32xf32, #tpu.memory_space<vmem>>, %arg3: memref<1x64x32xf32, #tpu.memory_space<vmem>>, %arg4: memref<1x64x32xi32, #tpu.memory_space<vmem>>, %arg5: memref<32x32xf32, #tpu.memory_space<vmem>>, %arg6: memref<32x64xf32, #tpu.memory_space<vmem>>, %arg7: memref<32x64xf32, #tpu.memory_space<vmem>>, %arg8: memref<1x64xf32, #tpu.memory_space<vmem>>, %arg9: memref<32x32xf32, #tpu.memory_space<vmem>>, %arg10: memref<1x32xf32, #tpu.memory_space<vmem>>, %arg11: memref<32x32xf32, #tpu.memory_space<vmem>>, %arg12: memref<1x32xf32, #tpu.memory_space<vmem>>, %arg13: memref<1x64x32xf32, #tpu.memory_space<vmem>>) attributes {dimension_semantics = [#tpu.dimension_semantics<parallel>, #tpu.dimension_semantics<parallel>], iteration_bounds = array<i64: 2, 1>, scalar_prefetch = 0 : i64, scratch_operands = 0 : i64, tpu.core_type = #tpu.core_type<tc>, window_params = [{transform_indices = @transform_0, window_bounds = array<i64: 1, 64, 32>}, {transform_indices = @transform_1, window_bounds = array<i64: 1, 64, 32>}, {transform_indices = @transform_2, window_bounds = array<i64: 1, 64, 32>}, {pipeline_mode = #tpu.pipeline_mode<synchronous>, transform_indices = @transform_3, window_bounds = array<i64: 32, 32>}, {pipeline_mode = #tpu.pipeline_mode<synchronous>, transform_indices = @transform_4, window_bounds = array<i64: 32, 64>}, {pipeline_mode = #tpu.pipeline_mode<synchronous>, transform_indices = @transform_5, window_bounds = array<i64: 32, 64>}, {pipeline_mode = #tpu.pipeline_mode<synchronous>, transform_indices = @transform_6, window_bounds = array<i64: 1, 64>}, {pipeline_mode = #tpu.pipeline_mode<synchronous>, transform_indices = @transform_7, window_bounds = array<i64: 32, 32>}, {pipeline_mode = #tpu.pipeline_mode<synchronous>, transform_indices = @transform_8, window_bounds = array<i64: 1, 32>}, {pipeline_mode = #tpu.pipeline_mode<synchronous>, transform_indices = @transform_9, window_bounds = array<i64: 32, 32>}, {pipeline_mode = #tpu.pipeline_mode<synchronous>, transform_indices = @transform_10, window_bounds = array<i64: 1, 32>}, {transform_indices = @transform_11, window_bounds = array<i64: 1, 64, 32>}]} {
    %c0 = arith.constant 0 : index
    %c0_0 = arith.constant 0 : index
    %c0_1 = arith.constant 0 : index
    %0 = vector.load %arg2[%c0, %c0_0, %c0_1] : memref<1x64x32xf32, #tpu.memory_space<vmem>>, vector<1x64x32xf32>
    %1 = vector.shape_cast %0 : vector<1x64x32xf32> to vector<64x32xf32>
    %c0_2 = arith.constant 0 : index
    %c0_3 = arith.constant 0 : index
    %c0_4 = arith.constant 0 : index
    %2 = vector.load %arg3[%c0_2, %c0_3, %c0_4] : memref<1x64x32xf32, #tpu.memory_space<vmem>>, vector<1x64x32xf32>
    %3 = vector.shape_cast %2 : vector<1x64x32xf32> to vector<64x32xf32>
    %c0_5 = arith.constant 0 : index
    %c0_6 = arith.constant 0 : index
    %4 = vector.load %arg5[%c0_5, %c0_6] : memref<32x32xf32, #tpu.memory_space<vmem>>, vector<32x32xf32>
    %cst = arith.constant dense<0.000000e+00> : vector<64x32xf32>
    %5 = tpu.matmul %1, %4, %cst {dimension_numbers = #tpu.dot_dimension_numbers<[1], [0], [0], [1], [0, 0, 1, 1], [], []>} : vector<64x32xf32>, vector<32x32xf32>, vector<64x32xf32> -> vector<64x32xf32>
    %6 = vector.shape_cast %5 : vector<64x32xf32> to vector<1x64x32xf32>
    %c0_7 = arith.constant 0 : index
    %c0_8 = arith.constant 0 : index
    %7 = vector.load %arg6[%c0_7, %c0_8] : memref<32x64xf32, #tpu.memory_space<vmem>>, vector<32x64xf32>
    %cst_9 = arith.constant dense<0.000000e+00> : vector<64x64xf32>
    %8 = tpu.matmul %3, %7, %cst_9 {dimension_numbers = #tpu.dot_dimension_numbers<[1], [0], [0], [1], [0, 0, 1, 1], [], []>} : vector<64x32xf32>, vector<32x64xf32>, vector<64x64xf32> -> vector<64x64xf32>
    %9 = vector.shape_cast %8 : vector<64x64xf32> to vector<1x64x64xf32>
    %10 = vector.extract_strided_slice %9 {offsets = [0, 0, 0], sizes = [1, 64, 32], strides = [1, 1, 1]} : vector<1x64x64xf32> to vector<1x64x32xf32>
    %11 = vector.extract_strided_slice %9 {offsets = [0, 0, 32], sizes = [1, 64, 32], strides = [1, 1, 1]} : vector<1x64x64xf32> to vector<1x64x32xf32>
    %12 = vector.extract_strided_slice %6 {offsets = [0, 0, 0], sizes = [1, 64, 8], strides = [1, 1, 1]} : vector<1x64x32xf32> to vector<1x64x8xf32>
    %13 = vector.extract_strided_slice %10 {offsets = [0, 0, 0], sizes = [1, 64, 8], strides = [1, 1, 1]} : vector<1x64x32xf32> to vector<1x64x8xf32>
    %cst_10 = arith.constant dense<0.000000e+00> : vector<1x64x64xf32>
    %14 = tpu.matmul %12, %13, %cst_10 {dimension_numbers = #tpu.dot_dimension_numbers<[2], [2], [1], [1], [0, 0, 0, 1, 1, 1], [0], [0]>} : vector<1x64x8xf32>, vector<1x64x8xf32>, vector<1x64x64xf32> -> vector<1x64x64xf32>
    %cst_11 = arith.constant dense<0xFF800000> : vector<1x64xf32>
    %15 = vector.multi_reduction <maximumf>, %14, %cst_11 [2] : vector<1x64x64xf32> to vector<1x64xf32>
    %16 = vector.shape_cast %15 : vector<1x64xf32> to vector<1x64x1xf32>
    %17 = vector.broadcast %16 : vector<1x64x1xf32> to vector<1x64x64xf32>
    %18 = arith.subf %14, %17 : vector<1x64x64xf32>
    %19 = math.exp %18 : vector<1x64x64xf32>
    %cst_12 = arith.constant dense<0.000000e+00> : vector<1x64xf32>
    %20 = vector.multi_reduction <add>, %19, %cst_12 [2] : vector<1x64x64xf32> to vector<1x64xf32>
    %21 = vector.shape_cast %20 : vector<1x64xf32> to vector<1x64x1xf32>
    %22 = tpu.reciprocal %21 {approx = true} : vector<1x64x1xf32> -> vector<1x64x1xf32>
    %23 = vector.extract_strided_slice %11 {offsets = [0, 0, 0], sizes = [1, 64, 8], strides = [1, 1, 1]} : vector<1x64x32xf32> to vector<1x64x8xf32>
    %cst_13 = arith.constant dense<0.000000e+00> : vector<1x64x8xf32>
    %24 = tpu.matmul %19, %23, %cst_13 {dimension_numbers = #tpu.dot_dimension_numbers<[2], [1], [1], [2], [0, 0, 0, 1, 1, 2], [0], [0]>} : vector<1x64x64xf32>, vector<1x64x8xf32>, vector<1x64x8xf32> -> vector<1x64x8xf32>
    %25 = vector.broadcast %22 : vector<1x64x1xf32> to vector<1x64x8xf32>
    %26 = arith.mulf %24, %25 : vector<1x64x8xf32>
    %27 = vector.extract_strided_slice %6 {offsets = [0, 0, 8], sizes = [1, 64, 8], strides = [1, 1, 1]} : vector<1x64x32xf32> to vector<1x64x8xf32>
    %28 = vector.extract_strided_slice %10 {offsets = [0, 0, 8], sizes = [1, 64, 8], strides = [1, 1, 1]} : vector<1x64x32xf32> to vector<1x64x8xf32>
    %cst_14 = arith.constant dense<0.000000e+00> : vector<1x64x64xf32>
    %29 = tpu.matmul %27, %28, %cst_14 {dimension_numbers = #tpu.dot_dimension_numbers<[2], [2], [1], [1], [0, 0, 0, 1, 1, 1], [0], [0]>} : vector<1x64x8xf32>, vector<1x64x8xf32>, vector<1x64x64xf32> -> vector<1x64x64xf32>
    %cst_15 = arith.constant dense<0xFF800000> : vector<1x64xf32>
    %30 = vector.multi_reduction <maximumf>, %29, %cst_15 [2] : vector<1x64x64xf32> to vector<1x64xf32>
    %31 = vector.shape_cast %30 : vector<1x64xf32> to vector<1x64x1xf32>
    %32 = vector.broadcast %31 : vector<1x64x1xf32> to vector<1x64x64xf32>
    %33 = arith.subf %29, %32 : vector<1x64x64xf32>
    %34 = math.exp %33 : vector<1x64x64xf32>
    %cst_16 = arith.constant dense<0.000000e+00> : vector<1x64xf32>
    %35 = vector.multi_reduction <add>, %34, %cst_16 [2] : vector<1x64x64xf32> to vector<1x64xf32>
    %36 = vector.shape_cast %35 : vector<1x64xf32> to vector<1x64x1xf32>
    %37 = tpu.reciprocal %36 {approx = true} : vector<1x64x1xf32> -> vector<1x64x1xf32>
    %38 = vector.extract_strided_slice %11 {offsets = [0, 0, 8], sizes = [1, 64, 8], strides = [1, 1, 1]} : vector<1x64x32xf32> to vector<1x64x8xf32>
    %cst_17 = arith.constant dense<0.000000e+00> : vector<1x64x8xf32>
    %39 = tpu.matmul %34, %38, %cst_17 {dimension_numbers = #tpu.dot_dimension_numbers<[2], [1], [1], [2], [0, 0, 0, 1, 1, 2], [0], [0]>} : vector<1x64x64xf32>, vector<1x64x8xf32>, vector<1x64x8xf32> -> vector<1x64x8xf32>
    %40 = vector.broadcast %37 : vector<1x64x1xf32> to vector<1x64x8xf32>
    %41 = arith.mulf %39, %40 : vector<1x64x8xf32>
    %42 = vector.extract_strided_slice %6 {offsets = [0, 0, 16], sizes = [1, 64, 8], strides = [1, 1, 1]} : vector<1x64x32xf32> to vector<1x64x8xf32>
    %43 = vector.extract_strided_slice %10 {offsets = [0, 0, 16], sizes = [1, 64, 8], strides = [1, 1, 1]} : vector<1x64x32xf32> to vector<1x64x8xf32>
    %cst_18 = arith.constant dense<0.000000e+00> : vector<1x64x64xf32>
    %44 = tpu.matmul %42, %43, %cst_18 {dimension_numbers = #tpu.dot_dimension_numbers<[2], [2], [1], [1], [0, 0, 0, 1, 1, 1], [0], [0]>} : vector<1x64x8xf32>, vector<1x64x8xf32>, vector<1x64x64xf32> -> vector<1x64x64xf32>
    %cst_19 = arith.constant dense<0xFF800000> : vector<1x64xf32>
    %45 = vector.multi_reduction <maximumf>, %44, %cst_19 [2] : vector<1x64x64xf32> to vector<1x64xf32>
    %46 = vector.shape_cast %45 : vector<1x64xf32> to vector<1x64x1xf32>
    %47 = vector.broadcast %46 : vector<1x64x1xf32> to vector<1x64x64xf32>
    %48 = arith.subf %44, %47 : vector<1x64x64xf32>
    %49 = math.exp %48 : vector<1x64x64xf32>
    %cst_20 = arith.constant dense<0.000000e+00> : vector<1x64xf32>
    %50 = vector.multi_reduction <add>, %49, %cst_20 [2] : vector<1x64x64xf32> to vector<1x64xf32>
    %51 = vector.shape_cast %50 : vector<1x64xf32> to vector<1x64x1xf32>
    %52 = tpu.reciprocal %51 {approx = true} : vector<1x64x1xf32> -> vector<1x64x1xf32>
    %53 = vector.extract_strided_slice %11 {offsets = [0, 0, 16], sizes = [1, 64, 8], strides = [1, 1, 1]} : vector<1x64x32xf32> to vector<1x64x8xf32>
    %cst_21 = arith.constant dense<0.000000e+00> : vector<1x64x8xf32>
    %54 = tpu.matmul %49, %53, %cst_21 {dimension_numbers = #tpu.dot_dimension_numbers<[2], [1], [1], [2], [0, 0, 0, 1, 1, 2], [0], [0]>} : vector<1x64x64xf32>, vector<1x64x8xf32>, vector<1x64x8xf32> -> vector<1x64x8xf32>
    %55 = vector.broadcast %52 : vector<1x64x1xf32> to vector<1x64x8xf32>
    %56 = arith.mulf %54, %55 : vector<1x64x8xf32>
    %57 = vector.extract_strided_slice %6 {offsets = [0, 0, 24], sizes = [1, 64, 8], strides = [1, 1, 1]} : vector<1x64x32xf32> to vector<1x64x8xf32>
    %58 = vector.extract_strided_slice %10 {offsets = [0, 0, 24], sizes = [1, 64, 8], strides = [1, 1, 1]} : vector<1x64x32xf32> to vector<1x64x8xf32>
    %cst_22 = arith.constant dense<0.000000e+00> : vector<1x64x64xf32>
    %59 = tpu.matmul %57, %58, %cst_22 {dimension_numbers = #tpu.dot_dimension_numbers<[2], [2], [1], [1], [0, 0, 0, 1, 1, 1], [0], [0]>} : vector<1x64x8xf32>, vector<1x64x8xf32>, vector<1x64x64xf32> -> vector<1x64x64xf32>
    %cst_23 = arith.constant dense<0xFF800000> : vector<1x64xf32>
    %60 = vector.multi_reduction <maximumf>, %59, %cst_23 [2] : vector<1x64x64xf32> to vector<1x64xf32>
    %61 = vector.shape_cast %60 : vector<1x64xf32> to vector<1x64x1xf32>
    %62 = vector.broadcast %61 : vector<1x64x1xf32> to vector<1x64x64xf32>
    %63 = arith.subf %59, %62 : vector<1x64x64xf32>
    %64 = math.exp %63 : vector<1x64x64xf32>
    %cst_24 = arith.constant dense<0.000000e+00> : vector<1x64xf32>
    %65 = vector.multi_reduction <add>, %64, %cst_24 [2] : vector<1x64x64xf32> to vector<1x64xf32>
    %66 = vector.shape_cast %65 : vector<1x64xf32> to vector<1x64x1xf32>
    %67 = tpu.reciprocal %66 {approx = true} : vector<1x64x1xf32> -> vector<1x64x1xf32>
    %68 = vector.extract_strided_slice %11 {offsets = [0, 0, 24], sizes = [1, 64, 8], strides = [1, 1, 1]} : vector<1x64x32xf32> to vector<1x64x8xf32>
    %cst_25 = arith.constant dense<0.000000e+00> : vector<1x64x8xf32>
    %69 = tpu.matmul %64, %68, %cst_25 {dimension_numbers = #tpu.dot_dimension_numbers<[2], [1], [1], [2], [0, 0, 0, 1, 1, 2], [0], [0]>} : vector<1x64x64xf32>, vector<1x64x8xf32>, vector<1x64x8xf32> -> vector<1x64x8xf32>
    %70 = vector.broadcast %67 : vector<1x64x1xf32> to vector<1x64x8xf32>
    %71 = arith.mulf %69, %70 : vector<1x64x8xf32>
    %72 = tpu.concatenate %26, %41, %56, %71 in 2 : vector<1x64x8xf32>, vector<1x64x8xf32>, vector<1x64x8xf32>, vector<1x64x8xf32> -> vector<1x64x32xf32>
    %73 = vector.shape_cast %72 : vector<1x64x32xf32> to vector<64x32xf32>
    %c0_26 = arith.constant 0 : index
    %c0_27 = arith.constant 0 : index
    %74 = vector.load %arg7[%c0_26, %c0_27] : memref<32x64xf32, #tpu.memory_space<vmem>>, vector<32x64xf32>
    %cst_28 = arith.constant dense<0.000000e+00> : vector<64x64xf32>
    %75 = tpu.matmul %73, %74, %cst_28 {dimension_numbers = #tpu.dot_dimension_numbers<[1], [0], [0], [1], [0, 0, 1, 1], [], []>} : vector<64x32xf32>, vector<32x64xf32>, vector<64x64xf32> -> vector<64x64xf32>
    %c0_29 = arith.constant 0 : index
    %c0_30 = arith.constant 0 : index
    %76 = vector.load %arg8[%c0_29, %c0_30] : memref<1x64xf32, #tpu.memory_space<vmem>>, vector<1x64xf32>
    %77 = vector.broadcast %76 : vector<1x64xf32> to vector<64x64xf32>
    %78 = arith.addf %75, %77 : vector<64x64xf32>
    %79 = arith.mulf %78, %78 : vector<64x64xf32>
    %80 = arith.mulf %78, %79 : vector<64x64xf32>
    %cst_31 = arith.constant 4.471500e-02 : f32
    %81 = vector.broadcast %cst_31 : f32 to vector<64x64xf32>
    %82 = arith.mulf %81, %80 : vector<64x64xf32>
    %83 = arith.addf %78, %82 : vector<64x64xf32>
    %cst_32 = arith.constant 0.797884583 : f32
    %84 = vector.broadcast %cst_32 : f32 to vector<64x64xf32>
    %85 = arith.mulf %84, %83 : vector<64x64xf32>
    %86 = math.tanh %85 : vector<64x64xf32>
    %cst_33 = arith.constant 1.000000e+00 : f32
    %87 = vector.broadcast %cst_33 : f32 to vector<64x64xf32>
    %88 = arith.addf %87, %86 : vector<64x64xf32>
    %cst_34 = arith.constant 5.000000e-01 : f32
    %89 = vector.broadcast %cst_34 : f32 to vector<64x64xf32>
    %90 = arith.mulf %89, %88 : vector<64x64xf32>
    %91 = arith.mulf %78, %90 : vector<64x64xf32>
    %92 = vector.extract_strided_slice %91 {offsets = [0, 0], sizes = [64, 32], strides = [1, 1]} : vector<64x64xf32> to vector<64x32xf32>
    %c0_35 = arith.constant 0 : index
    %c0_36 = arith.constant 0 : index
    %93 = vector.load %arg9[%c0_35, %c0_36] : memref<32x32xf32, #tpu.memory_space<vmem>>, vector<32x32xf32>
    %cst_37 = arith.constant dense<0.000000e+00> : vector<64x32xf32>
    %94 = tpu.matmul %92, %93, %cst_37 {dimension_numbers = #tpu.dot_dimension_numbers<[1], [0], [0], [1], [0, 0, 1, 1], [], []>} : vector<64x32xf32>, vector<32x32xf32>, vector<64x32xf32> -> vector<64x32xf32>
    %c0_38 = arith.constant 0 : index
    %c0_39 = arith.constant 0 : index
    %95 = vector.load %arg10[%c0_38, %c0_39] : memref<1x32xf32, #tpu.memory_space<vmem>>, vector<1x32xf32>
    %96 = vector.broadcast %95 : vector<1x32xf32> to vector<64x32xf32>
    %97 = arith.addf %94, %96 : vector<64x32xf32>
    %98 = vector.extract_strided_slice %91 {offsets = [0, 32], sizes = [64, 32], strides = [1, 1]} : vector<64x64xf32> to vector<64x32xf32>
    %c0_40 = arith.constant 0 : index
    %c0_41 = arith.constant 0 : index
    %99 = vector.load %arg11[%c0_40, %c0_41] : memref<32x32xf32, #tpu.memory_space<vmem>>, vector<32x32xf32>
    %cst_42 = arith.constant dense<0.000000e+00> : vector<64x32xf32>
    %100 = tpu.matmul %98, %99, %cst_42 {dimension_numbers = #tpu.dot_dimension_numbers<[1], [0], [0], [1], [0, 0, 1, 1], [], []>} : vector<64x32xf32>, vector<32x32xf32>, vector<64x32xf32> -> vector<64x32xf32>
    %c0_43 = arith.constant 0 : index
    %c0_44 = arith.constant 0 : index
    %101 = vector.load %arg12[%c0_43, %c0_44] : memref<1x32xf32, #tpu.memory_space<vmem>>, vector<1x32xf32>
    %102 = vector.broadcast %101 : vector<1x32xf32> to vector<64x32xf32>
    %103 = arith.addf %100, %102 : vector<64x32xf32>
    %c0_45 = arith.constant 0 : index
    %c0_46 = arith.constant 0 : index
    %c0_47 = arith.constant 0 : index
    %104 = vector.load %arg4[%c0_45, %c0_46, %c0_47] : memref<1x64x32xi32, #tpu.memory_space<vmem>>, vector<1x64x32xi32>
    %105 = vector.shape_cast %104 : vector<1x64x32xi32> to vector<64x32xi32>
    %c0_i32 = arith.constant 0 : i32
    %106 = vector.broadcast %c0_i32 : i32 to vector<64x32xi32>
    %107 = arith.cmpi eq, %105, %106 : vector<64x32xi32>
    %c1_i32 = arith.constant 1 : i32
    %108 = vector.broadcast %c1_i32 : i32 to vector<64x32xi32>
    %109 = arith.cmpi eq, %105, %108 : vector<64x32xi32>
    %cst_48 = arith.constant 0.000000e+00 : f32
    %110 = vector.broadcast %cst_48 : f32 to vector<64x32xf32>
    %111 = arith.select %109, %103, %110 : vector<64x32xi1>, vector<64x32xf32>
    %112 = arith.select %107, %97, %111 : vector<64x32xi1>, vector<64x32xf32>
    %113 = vector.shape_cast %112 : vector<64x32xf32> to vector<1x64x32xf32>
    %c0_49 = arith.constant 0 : index
    %c0_50 = arith.constant 0 : index
    %c0_51 = arith.constant 0 : index
    %114 = vector.load %arg13[%c0_49, %c0_50, %c0_51] : memref<1x64x32xf32, #tpu.memory_space<vmem>>, vector<1x64x32xf32>
    tpu.vector_store %arg13[%c0_49, %c0_50, %c0_51], %113 {strides = array<i32>} : memref<1x64x32xf32, #tpu.memory_space<vmem>>, vector<1x64x32xf32>,
    return
  }
  func.func @transform_0(%arg0: i32, %arg1: i32) -> (i32, i32, i32) {
    %c0_i32 = arith.constant 0 : i32
    %c0_i32_0 = arith.constant 0 : i32
    return %arg0, %arg1, %c0_i32 : i32, i32, i32
  }
  func.func @transform_1(%arg0: i32, %arg1: i32) -> (i32, i32, i32) {
    %c0_i32 = arith.constant 0 : i32
    %c0_i32_0 = arith.constant 0 : i32
    %c0_i32_1 = arith.constant 0 : i32
    return %arg0, %c0_i32, %c0_i32_0 : i32, i32, i32
  }
  func.func @transform_2(%arg0: i32, %arg1: i32) -> (i32, i32, i32) {
    %c0_i32 = arith.constant 0 : i32
    %c0_i32_0 = arith.constant 0 : i32
    return %arg0, %arg1, %c0_i32 : i32, i32, i32
  }
  func.func @transform_3(%arg0: i32, %arg1: i32) -> (i32, i32) {
    %c0_i32 = arith.constant 0 : i32
    %c0_i32_0 = arith.constant 0 : i32
    %c0_i32_1 = arith.constant 0 : i32
    return %c0_i32, %c0_i32_0 : i32, i32
  }
  func.func @transform_4(%arg0: i32, %arg1: i32) -> (i32, i32) {
    %c0_i32 = arith.constant 0 : i32
    %c0_i32_0 = arith.constant 0 : i32
    %c0_i32_1 = arith.constant 0 : i32
    return %c0_i32, %c0_i32_0 : i32, i32
  }
  func.func @transform_5(%arg0: i32, %arg1: i32) -> (i32, i32) {
    %c0_i32 = arith.constant 0 : i32
    %c0_i32_0 = arith.constant 0 : i32
    %c0_i32_1 = arith.constant 0 : i32
    return %c0_i32, %c0_i32_0 : i32, i32
  }
  func.func @transform_6(%arg0: i32, %arg1: i32) -> (i32, i32) {
    %c0_i32 = arith.constant 0 : i32
    %c0_i32_0 = arith.constant 0 : i32
    %c0_i32_1 = arith.constant 0 : i32
    return %c0_i32, %c0_i32_0 : i32, i32
  }
  func.func @transform_7(%arg0: i32, %arg1: i32) -> (i32, i32) {
    %c0_i32 = arith.constant 0 : i32
    %c0_i32_0 = arith.constant 0 : i32
    %c0_i32_1 = arith.constant 0 : i32
    return %c0_i32, %c0_i32_0 : i32, i32
  }
  func.func @transform_8(%arg0: i32, %arg1: i32) -> (i32, i32) {
    %c0_i32 = arith.constant 0 : i32
    %c0_i32_0 = arith.constant 0 : i32
    %c0_i32_1 = arith.constant 0 : i32
    return %c0_i32, %c0_i32_0 : i32, i32
  }
  func.func @transform_9(%arg0: i32, %arg1: i32) -> (i32, i32) {
    %c0_i32 = arith.constant 0 : i32
    %c0_i32_0 = arith.constant 0 : i32
    %c0_i32_1 = arith.constant 0 : i32
    return %c0_i32, %c0_i32_0 : i32, i32
  }
  func.func @transform_10(%arg0: i32, %arg1: i32) -> (i32, i32) {
    %c0_i32 = arith.constant 0 : i32
    %c0_i32_0 = arith.constant 0 : i32
    %c0_i32_1 = arith.constant 0 : i32
    return %c0_i32, %c0_i32_0 : i32, i32
  }
  func.func @transform_11(%arg0: i32, %arg1: i32) -> (i32, i32, i32) {
    %c0_i32 = arith.constant 0 : i32
    %c0_i32_0 = arith.constant 0 : i32
    return %arg0, %arg1, %c0_i32 : i32, i32, i32
  }
}

module attributes {stable_mosaic.version = 11 : i64} {
  func.func @_moe_cross_attn_kernel(%arg0: i32, %arg1: i32, %arg2: memref<1x64x32xf32, #tpu.memory_space<vmem>>, %arg3: memref<1x64x32xf32, #tpu.memory_space<vmem>>, %arg4: memref<1x64x32xi32, #tpu.memory_space<vmem>>, %arg5: memref<32x32xf32, #tpu.memory_space<vmem>>, %arg6: memref<32x64xf32, #tpu.memory_space<vmem>>, %arg7: memref<32x64xf32, #tpu.memory_space<vmem>>, %arg8: memref<1x64xf32, #tpu.memory_space<vmem>>, %arg9: memref<32x32xf32, #tpu.memory_space<vmem>>, %arg10: memref<1x32xf32, #tpu.memory_space<vmem>>, %arg11: memref<32x32xf32, #tpu.memory_space<vmem>>, %arg12: memref<1x32xf32, #tpu.memory_space<vmem>>, %arg13: memref<1x64x32xf32, #tpu.memory_space<vmem>>) attributes {dimension_semantics = [#tpu.dimension_semantics<parallel>, #tpu.dimension_semantics<parallel>], iteration_bounds = array<i64: 2, 1>, scalar_prefetch = 0 : i64, scratch_operands = 0 : i64, tpu.core_type = #tpu.core_type<tc>, window_params = [{transform_indices = @transform_0, window_bounds = array<i64: 1, 64, 32>}, {transform_indices = @transform_1, window_bounds = array<i64: 1, 64, 32>}, {transform_indices = @transform_2, window_bounds = array<i64: 1, 64, 32>}, {pipeline_mode = #tpu.pipeline_mode<synchronous>, transform_indices = @transform_3, window_bounds = array<i64: 32, 32>}, {pipeline_mode = #tpu.pipeline_mode<synchronous>, transform_indices = @transform_4, window_bounds = array<i64: 32, 64>}, {pipeline_mode = #tpu.pipeline_mode<synchronous>, transform_indices = @transform_5, window_bounds = array<i64: 32, 64>}, {pipeline_mode = #tpu.pipeline_mode<synchronous>, transform_indices = @transform_6, window_bounds = array<i64: 1, 64>}, {pipeline_mode = #tpu.pipeline_mode<synchronous>, transform_indices = @transform_7, window_bounds = array<i64: 32, 32>}, {pipeline_mode = #tpu.pipeline_mode<synchronous>, transform_indices = @transform_8, window_bounds = array<i64: 1, 32>}, {pipeline_mode = #tpu.pipeline_mode<synchronous>, transform_indices = @transform_9, window_bounds = array<i64: 32, 32>}, {pipeline_mode = #tpu.pipeline_mode<synchronous>, transform_indices = @transform_10, window_bounds = array<i64: 1, 32>}, {transform_indices = @transform_11, window_bounds = array<i64: 1, 64, 32>}]} {
    %c0 = arith.constant 0 : index
    %c0_0 = arith.constant 0 : index
    %c0_1 = arith.constant 0 : index
    %0 = vector.load %arg2[%c0, %c0_0, %c0_1] : memref<1x64x32xf32, #tpu.memory_space<vmem>>, vector<1x64x32xf32>
    %1 = vector.shape_cast %0 : vector<1x64x32xf32> to vector<64x32xf32>
    %c0_2 = arith.constant 0 : index
    %c0_3 = arith.constant 0 : index
    %c0_4 = arith.constant 0 : index
    %2 = vector.load %arg3[%c0_2, %c0_3, %c0_4] : memref<1x64x32xf32, #tpu.memory_space<vmem>>, vector<1x64x32xf32>
    %3 = vector.shape_cast %2 : vector<1x64x32xf32> to vector<64x32xf32>
    %c0_5 = arith.constant 0 : index
    %c0_6 = arith.constant 0 : index
    %4 = vector.load %arg5[%c0_5, %c0_6] : memref<32x32xf32, #tpu.memory_space<vmem>>, vector<32x32xf32>
    %cst = arith.constant dense<0.000000e+00> : vector<64x32xf32>
    %5 = tpu.matmul %1, %4, %cst {dimension_numbers = #tpu.dot_dimension_numbers<[1], [0], [0], [1], [0, 0, 1, 1], [], []>} : vector<64x32xf32>, vector<32x32xf32>, vector<64x32xf32> -> vector<64x32xf32>
    %6 = vector.shape_cast %5 : vector<64x32xf32> to vector<1x64x32xf32>
    %c0_7 = arith.constant 0 : index
    %c0_8 = arith.constant 0 : index
    %7 = vector.load %arg6[%c0_7, %c0_8] : memref<32x64xf32, #tpu.memory_space<vmem>>, vector<32x64xf32>
    %cst_9 = arith.constant dense<0.000000e+00> : vector<64x64xf32>
    %8 = tpu.matmul %3, %7, %cst_9 {dimension_numbers = #tpu.dot_dimension_numbers<[1], [0], [0], [1], [0, 0, 1, 1], [], []>} : vector<64x32xf32>, vector<32x64xf32>, vector<64x64xf32> -> vector<64x64xf32>
    %9 = vector.shape_cast %8 : vector<64x64xf32> to vector<1x64x64xf32>
    %10 = vector.extract_strided_slice %9 {offsets = [0, 0, 0], sizes = [1, 64, 32], strides = [1, 1, 1]} : vector<1x64x64xf32> to vector<1x64x32xf32>
    %11 = vector.extract_strided_slice %9 {offsets = [0, 0, 32], sizes = [1, 64, 32], strides = [1, 1, 1]} : vector<1x64x64xf32> to vector<1x64x32xf32>
    %12 = vector.extract_strided_slice %6 {offsets = [0, 0, 0], sizes = [1, 64, 8], strides = [1, 1, 1]} : vector<1x64x32xf32> to vector<1x64x8xf32>
    %13 = vector.extract_strided_slice %10 {offsets = [0, 0, 0], sizes = [1, 64, 8], strides = [1, 1, 1]} : vector<1x64x32xf32> to vector<1x64x8xf32>
    %cst_10 = arith.constant dense<0.000000e+00> : vector<1x64x64xf32>
    %14 = tpu.matmul %12, %13, %cst_10 {dimension_numbers = #tpu.dot_dimension_numbers<[2], [2], [1], [1], [0, 0, 0, 1, 1, 1], [0], [0]>} : vector<1x64x8xf32>, vector<1x64x8xf32>, vector<1x64x64xf32> -> vector<1x64x64xf32>
    %cst_11 = arith.constant dense<0xFF800000> : vector<1x64xf32>
    %15 = vector.multi_reduction <maximumf>, %14, %cst_11 [2] : vector<1x64x64xf32> to vector<1x64xf32>
    %16 = vector.shape_cast %15 : vector<1x64xf32> to vector<1x64x1xf32>
    %17 = vector.broadcast %16 : vector<1x64x1xf32> to vector<1x64x64xf32>
    %18 = arith.subf %14, %17 : vector<1x64x64xf32>
    %19 = math.exp %18 : vector<1x64x64xf32>
    %cst_12 = arith.constant dense<0.000000e+00> : vector<1x64xf32>
    %20 = vector.multi_reduction <add>, %19, %cst_12 [2] : vector<1x64x64xf32> to vector<1x64xf32>
    %21 = vector.shape_cast %20 : vector<1x64xf32> to vector<1x64x1xf32>
    %22 = tpu.reciprocal %21 {approx = true} : vector<1x64x1xf32> -> vector<1x64x1xf32>
    %23 = vector.extract_strided_slice %11 {offsets = [0, 0, 0], sizes = [1, 64, 8], strides = [1, 1, 1]} : vector<1x64x32xf32> to vector<1x64x8xf32>
    %cst_13 = arith.constant dense<0.000000e+00> : vector<1x64x8xf32>
    %24 = tpu.matmul %19, %23, %cst_13 {dimension_numbers = #tpu.dot_dimension_numbers<[2], [1], [1], [2], [0, 0, 0, 1, 1, 2], [0], [0]>} : vector<1x64x64xf32>, vector<1x64x8xf32>, vector<1x64x8xf32> -> vector<1x64x8xf32>
    %25 = vector.broadcast %22 : vector<1x64x1xf32> to vector<1x64x8xf32>
    %26 = arith.mulf %24, %25 : vector<1x64x8xf32>
    %27 = vector.extract_strided_slice %6 {offsets = [0, 0, 8], sizes = [1, 64, 8], strides = [1, 1, 1]} : vector<1x64x32xf32> to vector<1x64x8xf32>
    %28 = vector.extract_strided_slice %10 {offsets = [0, 0, 8], sizes = [1, 64, 8], strides = [1, 1, 1]} : vector<1x64x32xf32> to vector<1x64x8xf32>
    %cst_14 = arith.constant dense<0.000000e+00> : vector<1x64x64xf32>
    %29 = tpu.matmul %27, %28, %cst_14 {dimension_numbers = #tpu.dot_dimension_numbers<[2], [2], [1], [1], [0, 0, 0, 1, 1, 1], [0], [0]>} : vector<1x64x8xf32>, vector<1x64x8xf32>, vector<1x64x64xf32> -> vector<1x64x64xf32>
    %cst_15 = arith.constant dense<0xFF800000> : vector<1x64xf32>
    %30 = vector.multi_reduction <maximumf>, %29, %cst_15 [2] : vector<1x64x64xf32> to vector<1x64xf32>
    %31 = vector.shape_cast %30 : vector<1x64xf32> to vector<1x64x1xf32>
    %32 = vector.broadcast %31 : vector<1x64x1xf32> to vector<1x64x64xf32>
    %33 = arith.subf %29, %32 : vector<1x64x64xf32>
    %34 = math.exp %33 : vector<1x64x64xf32>
    %cst_16 = arith.constant dense<0.000000e+00> : vector<1x64xf32>
    %35 = vector.multi_reduction <add>, %34, %cst_16 [2] : vector<1x64x64xf32> to vector<1x64xf32>
    %36 = vector.shape_cast %35 : vector<1x64xf32> to vector<1x64x1xf32>
    %37 = tpu.reciprocal %36 {approx = true} : vector<1x64x1xf32> -> vector<1x64x1xf32>
    %38 = vector.extract_strided_slice %11 {offsets = [0, 0, 8], sizes = [1, 64, 8], strides = [1, 1, 1]} : vector<1x64x32xf32> to vector<1x64x8xf32>
    %cst_17 = arith.constant dense<0.000000e+00> : vector<1x64x8xf32>
    %39 = tpu.matmul %34, %38, %cst_17 {dimension_numbers = #tpu.dot_dimension_numbers<[2], [1], [1], [2], [0, 0, 0, 1, 1, 2], [0], [0]>} : vector<1x64x64xf32>, vector<1x64x8xf32>, vector<1x64x8xf32> -> vector<1x64x8xf32>
    %40 = vector.broadcast %37 : vector<1x64x1xf32> to vector<1x64x8xf32>
    %41 = arith.mulf %39, %40 : vector<1x64x8xf32>
    %42 = vector.extract_strided_slice %6 {offsets = [0, 0, 16], sizes = [1, 64, 8], strides = [1, 1, 1]} : vector<1x64x32xf32> to vector<1x64x8xf32>
    %43 = vector.extract_strided_slice %10 {offsets = [0, 0, 16], sizes = [1, 64, 8], strides = [1, 1, 1]} : vector<1x64x32xf32> to vector<1x64x8xf32>
    %cst_18 = arith.constant dense<0.000000e+00> : vector<1x64x64xf32>
    %44 = tpu.matmul %42, %43, %cst_18 {dimension_numbers = #tpu.dot_dimension_numbers<[2], [2], [1], [1], [0, 0, 0, 1, 1, 1], [0], [0]>} : vector<1x64x8xf32>, vector<1x64x8xf32>, vector<1x64x64xf32> -> vector<1x64x64xf32>
    %cst_19 = arith.constant dense<0xFF800000> : vector<1x64xf32>
    %45 = vector.multi_reduction <maximumf>, %44, %cst_19 [2] : vector<1x64x64xf32> to vector<1x64xf32>
    %46 = vector.shape_cast %45 : vector<1x64xf32> to vector<1x64x1xf32>
    %47 = vector.broadcast %46 : vector<1x64x1xf32> to vector<1x64x64xf32>
    %48 = arith.subf %44, %47 : vector<1x64x64xf32>
    %49 = math.exp %48 : vector<1x64x64xf32>
    %cst_20 = arith.constant dense<0.000000e+00> : vector<1x64xf32>
    %50 = vector.multi_reduction <add>, %49, %cst_20 [2] : vector<1x64x64xf32> to vector<1x64xf32>
    %51 = vector.shape_cast %50 : vector<1x64xf32> to vector<1x64x1xf32>
    %52 = tpu.reciprocal %51 {approx = true} : vector<1x64x1xf32> -> vector<1x64x1xf32>
    %53 = vector.extract_strided_slice %11 {offsets = [0, 0, 16], sizes = [1, 64, 8], strides = [1, 1, 1]} : vector<1x64x32xf32> to vector<1x64x8xf32>
    %cst_21 = arith.constant dense<0.000000e+00> : vector<1x64x8xf32>
    %54 = tpu.matmul %49, %53, %cst_21 {dimension_numbers = #tpu.dot_dimension_numbers<[2], [1], [1], [2], [0, 0, 0, 1, 1, 2], [0], [0]>} : vector<1x64x64xf32>, vector<1x64x8xf32>, vector<1x64x8xf32> -> vector<1x64x8xf32>
    %55 = vector.broadcast %52 : vector<1x64x1xf32> to vector<1x64x8xf32>
    %56 = arith.mulf %54, %55 : vector<1x64x8xf32>
    %57 = vector.extract_strided_slice %6 {offsets = [0, 0, 24], sizes = [1, 64, 8], strides = [1, 1, 1]} : vector<1x64x32xf32> to vector<1x64x8xf32>
    %58 = vector.extract_strided_slice %10 {offsets = [0, 0, 24], sizes = [1, 64, 8], strides = [1, 1, 1]} : vector<1x64x32xf32> to vector<1x64x8xf32>
    %cst_22 = arith.constant dense<0.000000e+00> : vector<1x64x64xf32>
    %59 = tpu.matmul %57, %58, %cst_22 {dimension_numbers = #tpu.dot_dimension_numbers<[2], [2], [1], [1], [0, 0, 0, 1, 1, 1], [0], [0]>} : vector<1x64x8xf32>, vector<1x64x8xf32>, vector<1x64x64xf32> -> vector<1x64x64xf32>
    %cst_23 = arith.constant dense<0xFF800000> : vector<1x64xf32>
    %60 = vector.multi_reduction <maximumf>, %59, %cst_23 [2] : vector<1x64x64xf32> to vector<1x64xf32>
    %61 = vector.shape_cast %60 : vector<1x64xf32> to vector<1x64x1xf32>
    %62 = vector.broadcast %61 : vector<1x64x1xf32> to vector<1x64x64xf32>
    %63 = arith.subf %59, %62 : vector<1x64x64xf32>
    %64 = math.exp %63 : vector<1x64x64xf32>
    %cst_24 = arith.constant dense<0.000000e+00> : vector<1x64xf32>
    %65 = vector.multi_reduction <add>, %64, %cst_24 [2] : vector<1x64x64xf32> to vector<1x64xf32>
    %66 = vector.shape_cast %65 : vector<1x64xf32> to vector<1x64x1xf32>
    %67 = tpu.reciprocal %66 {approx = true} : vector<1x64x1xf32> -> vector<1x64x1xf32>
    %68 = vector.extract_strided_slice %11 {offsets = [0, 0, 24], sizes = [1, 64, 8], strides = [1, 1, 1]} : vector<1x64x32xf32> to vector<1x64x8xf32>
    %cst_25 = arith.constant dense<0.000000e+00> : vector<1x64x8xf32>
    %69 = tpu.matmul %64, %68, %cst_25 {dimension_numbers = #tpu.dot_dimension_numbers<[2], [1], [1], [2], [0, 0, 0, 1, 1, 2], [0], [0]>} : vector<1x64x64xf32>, vector<1x64x8xf32>, vector<1x64x8xf32> -> vector<1x64x8xf32>
    %70 = vector.broadcast %67 : vector<1x64x1xf32> to vector<1x64x8xf32>
    %71 = arith.mulf %69, %70 : vector<1x64x8xf32>
    %72 = tpu.concatenate %26, %41, %56, %71 in 2 : vector<1x64x8xf32>, vector<1x64x8xf32>, vector<1x64x8xf32>, vector<1x64x8xf32> -> vector<1x64x32xf32>
    %73 = vector.shape_cast %72 : vector<1x64x32xf32> to vector<64x32xf32>
    %c0_26 = arith.constant 0 : index
    %c0_27 = arith.constant 0 : index
    %74 = vector.load %arg7[%c0_26, %c0_27] : memref<32x64xf32, #tpu.memory_space<vmem>>, vector<32x64xf32>
    %cst_28 = arith.constant dense<0.000000e+00> : vector<64x64xf32>
    %75 = tpu.matmul %73, %74, %cst_28 {dimension_numbers = #tpu.dot_dimension_numbers<[1], [0], [0], [1], [0, 0, 1, 1], [], []>} : vector<64x32xf32>, vector<32x64xf32>, vector<64x64xf32> -> vector<64x64xf32>
    %c0_29 = arith.constant 0 : index
    %c0_30 = arith.constant 0 : index
    %76 = vector.load %arg8[%c0_29, %c0_30] : memref<1x64xf32, #tpu.memory_space<vmem>>, vector<1x64xf32>
    %77 = vector.broadcast %76 : vector<1x64xf32> to vector<64x64xf32>
    %78 = arith.addf %75, %77 : vector<64x64xf32>
    %79 = arith.mulf %78, %78 : vector<64x64xf32>
    %80 = arith.mulf %78, %79 : vector<64x64xf32>
    %cst_31 = arith.constant 4.471500e-02 : f32
    %81 = vector.broadcast %cst_31 : f32 to vector<64x64xf32>
    %82 = arith.mulf %81, %80 : vector<64x64xf32>
    %83 = arith.addf %78, %82 : vector<64x64xf32>
    %cst_32 = arith.constant 0.797884583 : f32
    %84 = vector.broadcast %cst_32 : f32 to vector<64x64xf32>
    %85 = arith.mulf %84, %83 : vector<64x64xf32>
    %86 = math.tanh %85 : vector<64x64xf32>
    %cst_33 = arith.constant 1.000000e+00 : f32
    %87 = vector.broadcast %cst_33 : f32 to vector<64x64xf32>
    %88 = arith.addf %87, %86 : vector<64x64xf32>
    %cst_34 = arith.constant 5.000000e-01 : f32
    %89 = vector.broadcast %cst_34 : f32 to vector<64x64xf32>
    %90 = arith.mulf %89, %88 : vector<64x64xf32>
    %91 = arith.mulf %78, %90 : vector<64x64xf32>
    %92 = vector.extract_strided_slice %91 {offsets = [0, 0], sizes = [64, 32], strides = [1, 1]} : vector<64x64xf32> to vector<64x32xf32>
    %c0_35 = arith.constant 0 : index
    %c0_36 = arith.constant 0 : index
    %93 = vector.load %arg9[%c0_35, %c0_36] : memref<32x32xf32, #tpu.memory_space<vmem>>, vector<32x32xf32>
    %cst_37 = arith.constant dense<0.000000e+00> : vector<64x32xf32>
    %94 = tpu.matmul %92, %93, %cst_37 {dimension_numbers = #tpu.dot_dimension_numbers<[1], [0], [0], [1], [0, 0, 1, 1], [], []>} : vector<64x32xf32>, vector<32x32xf32>, vector<64x32xf32> -> vector<64x32xf32>
    %c0_38 = arith.constant 0 : index
    %c0_39 = arith.constant 0 : index
    %95 = vector.load %arg10[%c0_38, %c0_39] : memref<1x32xf32, #tpu.memory_space<vmem>>, vector<1x32xf32>
    %96 = vector.broadcast %95 : vector<1x32xf32> to vector<64x32xf32>
    %97 = arith.addf %94, %96 : vector<64x32xf32>
    %98 = vector.extract_strided_slice %91 {offsets = [0, 32], sizes = [64, 32], strides = [1, 1]} : vector<64x64xf32> to vector<64x32xf32>
    %c0_40 = arith.constant 0 : index
    %c0_41 = arith.constant 0 : index
    %99 = vector.load %arg11[%c0_40, %c0_41] : memref<32x32xf32, #tpu.memory_space<vmem>>, vector<32x32xf32>
    %cst_42 = arith.constant dense<0.000000e+00> : vector<64x32xf32>
    %100 = tpu.matmul %98, %99, %cst_42 {dimension_numbers = #tpu.dot_dimension_numbers<[1], [0], [0], [1], [0, 0, 1, 1], [], []>} : vector<64x32xf32>, vector<32x32xf32>, vector<64x32xf32> -> vector<64x32xf32>
    %c0_43 = arith.constant 0 : index
    %c0_44 = arith.constant 0 : index
    %101 = vector.load %arg12[%c0_43, %c0_44] : memref<1x32xf32, #tpu.memory_space<vmem>>, vector<1x32xf32>
    %102 = vector.broadcast %101 : vector<1x32xf32> to vector<64x32xf32>
    %103 = arith.addf %100, %102 : vector<64x32xf32>
    %c0_45 = arith.constant 0 : index
    %c0_46 = arith.constant 0 : index
    %c0_47 = arith.constant 0 : index
    %104 = vector.load %arg4[%c0_45, %c0_46, %c0_47] : memref<1x64x32xi32, #tpu.memory_space<vmem>>, vector<1x64x32xi32>
    %105 = vector.shape_cast %104 : vector<1x64x32xi32> to vector<64x32xi32>
    %c0_i32 = arith.constant 0 : i32
    %106 = vector.broadcast %c0_i32 : i32 to vector<64x32xi32>
    %107 = arith.cmpi eq, %105, %106 : vector<64x32xi32>
    %c1_i32 = arith.constant 1 : i32
    %108 = vector.broadcast %c1_i32 : i32 to vector<64x32xi32>
    %109 = arith.cmpi eq, %105, %108 : vector<64x32xi32>
    %cst_48 = arith.constant 0.000000e+00 : f32
    %110 = vector.broadcast %cst_48 : f32 to vector<64x32xf32>
    %111 = arith.select %109, %103, %110 : vector<64x32xi1>, vector<64x32xf32>
    %112 = arith.select %107, %97, %111 : vector<64x32xi1>, vector<64x32xf32>
    %113 = vector.shape_cast %112 : vector<64x32xf32> to vector<1x64x32xf32>
    %c0_49 = arith.constant 0 : index
    %c0_50 = arith.constant 0 : index
    %c0_51 = arith.constant 0 : index
    %114 = vector.load %arg13[%c0_49, %c0_50, %c0_51] : memref<1x64x32xf32, #tpu.memory_space<vmem>>, vector<1x64x32xf32>
    tpu.vector_store %arg13[%c0_49, %c0_50, %c0_51], %113 {strides = array<i32>} : memref<1x64x32xf32, #tpu.memory_space<vmem>>, vector<1x64x32xf32>,
    return
  }
  func.func @transform_0(%arg0: i32, %arg1: i32) -> (i32, i32, i32) {
    %c0_i32 = arith.constant 0 : i32
    %c0_i32_0 = arith.constant 0 : i32
    return %arg0, %arg1, %c0_i32 : i32, i32, i32
  }
  func.func @transform_1(%arg0: i32, %arg1: i32) -> (i32, i32, i32) {
    %c0_i32 = arith.constant 0 : i32
    %c0_i32_0 = arith.constant 0 : i32
    %c0_i32_1 = arith.constant 0 : i32
    return %arg0, %c0_i32, %c0_i32_0 : i32, i32, i32
  }
  func.func @transform_2(%arg0: i32, %arg1: i32) -> (i32, i32, i32) {
    %c0_i32 = arith.constant 0 : i32
    %c0_i32_0 = arith.constant 0 : i32
    return %arg0, %arg1, %c0_i32 : i32, i32, i32
  }
  func.func @transform_3(%arg0: i32, %arg1: i32) -> (i32, i32) {
    %c0_i32 = arith.constant 0 : i32
    %c0_i32_0 = arith.constant 0 : i32
    %c0_i32_1 = arith.constant 0 : i32
    return %c0_i32, %c0_i32_0 : i32, i32
  }
  func.func @transform_4(%arg0: i32, %arg1: i32) -> (i32, i32) {
    %c0_i32 = arith.constant 0 : i32
    %c0_i32_0 = arith.constant 0 : i32
    %c0_i32_1 = arith.constant 0 : i32
    return %c0_i32, %c0_i32_0 : i32, i32
  }
  func.func @transform_5(%arg0: i32, %arg1: i32) -> (i32, i32) {
    %c0_i32 = arith.constant 0 : i32
    %c0_i32_0 = arith.constant 0 : i32
    %c0_i32_1 = arith.constant 0 : i32
    return %c0_i32, %c0_i32_0 : i32, i32
  }
  func.func @transform_6(%arg0: i32, %arg1: i32) -> (i32, i32) {
    %c0_i32 = arith.constant 0 : i32
    %c0_i32_0 = arith.constant 0 : i32
    %c0_i32_1 = arith.constant 0 : i32
    return %c0_i32, %c0_i32_0 : i32, i32
  }
  func.func @transform_7(%arg0: i32, %arg1: i32) -> (i32, i32) {
    %c0_i32 = arith.constant 0 : i32
    %c0_i32_0 = arith.constant 0 : i32
    %c0_i32_1 = arith.constant 0 : i32
    return %c0_i32, %c0_i32_0 : i32, i32
  }
  func.func @transform_8(%arg0: i32, %arg1: i32) -> (i32, i32) {
    %c0_i32 = arith.constant 0 : i32
    %c0_i32_0 = arith.constant 0 : i32
    %c0_i32_1 = arith.constant 0 : i32
    return %c0_i32, %c0_i32_0 : i32, i32
  }
  func.func @transform_9(%arg0: i32, %arg1: i32) -> (i32, i32) {
    %c0_i32 = arith.constant 0 : i32
    %c0_i32_0 = arith.constant 0 : i32
    %c0_i32_1 = arith.constant 0 : i32
    return %c0_i32, %c0_i32_0 : i32, i32
  }
  func.func @transform_10(%arg0: i32, %arg1: i32) -> (i32, i32) {
    %c0_i32 = arith.constant 0 : i32
    %c0_i32_0 = arith.constant 0 : i32
    %c0_i32_1 = arith.constant 0 : i32
    return %c0_i32, %c0_i32_0 : i32, i32
  }
  func.func @transform_11(%arg0: i32, %arg1: i32) -> (i32, i32, i32) {
    %c0_i32 = arith.constant 0 : i32
    %c0_i32_0 = arith.constant 0 : i32
    return %arg0, %arg1, %c0_i32 : i32, i32, i32
  }
}

</mosaic_0001>

<bundles_post_ra>
// kernel: tpu_custom_call.1
= control target key start
LH: loop header
LB: loop body
LE: loop exit
PB: predicated region body
PF: predicated region fallthrough
CT: control target
= control target key end

     0   :  { %s4136_s17 = smov 0   ;;  %s4138_s18 = smov 0   ;;  %s5136_s0 = inlined_call_operand.vmem [shape: f32[2,64,32], index: 0, kind: input, shape index: {}]   ;;  %s5137_s1 = inlined_call_operand.vmem [shape: f32[2,64,32], index: 1, kind: input, shape index: {}]   ;;  %s5138_s2 = inlined_call_operand.vmem [shape: s32[2,64,32], index: 2, kind: input, shape index: {}]   ;;  %s5139_s3 = inlined_call_operand.vmem [shape: f32[32,32], index: 3, kind: input, shape index: {}]   ;;  %s5140_s4 = inlined_call_operand.vmem [shape: f32[32,64], index: 4, kind: input, shape index: {}]   ;;  %s5141_s5 = inlined_call_operand.vmem [shape: f32[32,64], index: 5, kind: input, shape index: {}]   ;;  %s5142_s6 = inlined_call_operand.vmem [shape: f32[1,64], index: 6, kind: input, shape index: {}]   ;;  %s5143_s7 = inlined_call_operand.vmem [shape: f32[32,32], index: 7, kind: input, shape index: {}]   ;;  %s5144_s8 = inlined_call_operand.vmem [shape: f32[1,32], index: 8, kind: input, shape index: {}]   ;;  %s5145_s9 = inlined_call_operand.vmem [shape: f32[32,32], index: 9, kind: input, shape index: {}]   ;;  %s5146_s10 = inlined_call_operand.vmem [shape: f32[1,32], index: 10, kind: input, shape index: {}]   ;;  %s5147_s11 = inlined_call_operand.vmem [shape: f32[2,64,32], index: 11, kind: output, shape index: {}]  }
   0x1   :  { %s4140_s19 = smov 0  }
   0x2 LB: > { %s33_s20 = sadd.s32 1, %s4060_s18  ;;  %p3182_p0 = scmp.ge.s32.totalorder %s4064_s19, 1  ;;  %s4064_s19 = sphi %s4140_s19, %s21_s19   ;;  %s4060_s18 = sphi %s4138_s18, %s5149_s18   ;;  %s4056_s17 = sphi %s4136_s17, %s5148_s17  }
   0x3   : > { %p35_p1 = scmp.ge.s32.totalorder %s33_s20, 2  ;;  %p385_p2 = scmp.lt.s32.totalorder %s4064_s19, 3 }
   0x5   : > { %s5151_s20 = smov (%p35_p1, %s33_s20), 0  ;;  %p386_p3 = pnand %p3182_p0, %p385_p2 }
   0x6   : > { %p448_p4 = scmp.lt.s32.totalorder (!%p386_p3), %s4056_s17, 1  ;;  %s4066_s28 = smov (!%p386_p3), 96  }
   0x7   : > { %389 = sbr.rel (%p386_p3) target bundleno = 2737 (0xab1), region = 64  ;;  %s4067_s29 = smov (!%p386_p3), 120  }
   0x8   : > { %s4068_s30 = smov (!%p386_p3), 88   ;;  %s4069_s12 = smov (!%p386_p3), 112  }
   0x9   : > { %s4070_s13 = smov (!%p386_p3), 80   ;;  %s4071_s14 = smov (!%p386_p3), 104  }
   0xa   : > { %s4072_s15 = smov (!%p386_p3), 72   ;;  %s4073_s21 = smov (!%p386_p3), 8  }
   0xb   : > { %s4074_s22 = smov (!%p386_p3), 16  }
   0xc   : > { %v635_v0 = vld [vmem:[%s5140_s4 + $0x18] sm:$0xff]  ;;  %v634_v1 = vld [vmem:[%s5140_s4 + $0x10] sm:$0xff]  ;;  %v633_v4 = vld [vmem:[%s5140_s4 + $0x8] sm:$0xff]  ;;  %s5153_s17 = smov (!%p448_p4, %s4056_s17), 1  ;;  %vm502_vm0 = vcmask 261120   ;;  %vm765_vm1 = vcmask 64512  }
   0xd   : > { %3544 = vmatprep.subr.mxu1 %v635_v0  ;;  %v501_v2 = vld [vmem:[%s5139_s3 + $0x18] sm:$0xff]  ;;  %v500_v3 = vld [vmem:[%s5139_s3 + $0x10] sm:$0xff]  ;;  %v499_v5 = vld [vmem:[%s5139_s3 + $0x8] sm:$0xff]  ;;  %s4175_s16 = sshll.u32 %s5153_s17, 6  ;;  %vm919_vm2 = vcmask 523264   ;;  %vm2495_vm3 = vcmask 130048  }
   0xe   : > { %3545 = vmatpush3.msra.mxu1 %v635_v0  ;;  %3524 = vmatprep.subr.mxu0 %v501_v2  ;;  %v632_v6 = vld [vmem:[%s5140_s4] sm:$0xff]  ;;  %s4181_s23 = scalar_lea.vmem %s5137_s1, %s4175_s16  ;;  %s4187_s26 = scalar_lea.vmem %s5136_s0, %s4175_s16  ;;  %vm2504_vm4 = vcmask 195584  }
   0xf   : > { %3546 = vmatprep.subr.mxu1 %v634_v1  ;;  %3525 = vmatpush3.msra.mxu0 %v501_v2  ;;  %v490_v7 = vld [vmem:[%s4181_s23] sm:$0xff]  ;;  %v491_v8 = vld [vmem:[%s4181_s23 + $0x8] sm:$0xff]  ;;  %v492_v10 = vld [vmem:[%s4181_s23 + $0x10] sm:$0xff] }
  0x10   : > { %3547 = vmatpush3.msra.mxu1 %v634_v1  ;;  %3526 = vmatprep.subr.mxu0 %v500_v3  ;;  %v498_v9 = vld [vmem:[%s5139_s3] sm:$0xff]  ;;  %v483_v12 = vld [vmem:[%s4187_s26 + $0x8] sm:$0xff]  ;;  %v493_v13 = vld [vmem:[%s4181_s23 + $0x18] sm:$0xff] }
  0x11   : > { %3548 = vmatprep.subr.mxu1 %v633_v4  ;;  %3527 = vmatpush3.msra.mxu0 %v500_v3  ;;  %v482_v11 = vld [vmem:[%s4187_s26] sm:$0xff]  ;;  %v484_v14 = vld [vmem:[%s4187_s26 + $0x10] sm:$0xff]  ;;  %v485_v16 = vld [vmem:[%s4187_s26 + $0x18] sm:$0xff] }
  0x12   : > { %3549 = vmatpush3.msra.mxu1 %v633_v4  ;;  %3528 = vmatprep.subr.mxu0 %v499_v5  ;;  %v494_v15 = vld [vmem:[%s4181_s23 + $0x20] sm:$0xff]  ;;  %v495_v17 = vld [vmem:[%s4181_s23 + $0x28] sm:$0xff]  ;;  %v496_v19 = vld [vmem:[%s4181_s23 + $0x30] sm:$0xff] }
  0x13   : > { %3550 = vmatprep.subr.mxu1 %v632_v6  ;;  %3552 = vmatprep.mubr.msk.f32.mxu1 %vm502_vm0, %v490_v7  ;;  %v486_v18 = vld [vmem:[%s4187_s26 + $0x20] sm:$0xff]  ;;  %v487_v20 = vld [vmem:[%s4187_s26 + $0x28] sm:$0xff]  ;;  %v497_v21 = vld [vmem:[%s4181_s23 + $0x38] sm:$0xff]  ;;  %s5069_s23 = scalar_lea.vmem %s5138_s2, %s4175_s16 }
  0x14   : > { %3551 = vmatpush3.msra.mxu1 %v632_v6  ;;  %3529 = vmatpush3.msra.mxu0 %v499_v5  ;;  %v488_v22 = vld [vmem:[%s4187_s26 + $0x30] sm:$0xff]  ;;  %v489_v23 = vld [vmem:[%s4187_s26 + $0x38] sm:$0xff] }
  0x15   : > { %3553 = vmatmul.mubr.msk.f32.vlgmr.msra.gmra.mxu1 %vm502_vm0, %v491_v8  ;;  %3530 = vmatprep.subr.mxu0 %v498_v9 }
  0x16   : > { %3555 = vmatprep.mubr.msk.f32.mxu1 %vm502_vm0, %v492_v10  ;;  %3531 = vmatpush3.msra.mxu0 %v498_v9 }
  0x17   : > { %3532 = vmatprep.mubr.msk.f32.mxu0 %vm502_vm0, %v482_v11 }
  0x18   : > { %3533 = vmatmul.mubr.msk.f32.vlgmr.msra.gmra.mxu0 %vm502_vm0, %v483_v12 }
  0x19   : > { %3556 = vmatmul.mubr.msk.f32.gmra.mxu1 %vm502_vm0, %v493_v13  ;;  %3535 = vmatprep.mubr.msk.f32.mxu0 %vm502_vm0, %v484_v14 }
  0x1a   : > { %3558 = vmatprep.mubr.msk.f32.mxu1 %vm502_vm0, %v494_v15 }
  0x1c   : > { %3536 = vmatmul.mubr.msk.f32.gmra.mxu0 %vm502_vm0, %v485_v16 }
  0x1d   : > { %3559 = vmatmul.mubr.msk.f32.gmra.mxu1 %vm502_vm0, %v495_v17  ;;  %3538 = vmatprep.mubr.msk.f32.mxu0 %vm502_vm0, %v486_v18 }
  0x1e   : > { %3561 = vmatprep.mubr.msk.f32.mxu1 %vm502_vm0, %v496_v19 }
  0x20   : > { %3539 = vmatmul.mubr.msk.f32.gmra.mxu0 %vm502_vm0, %v487_v20 }
  0x21   : > { %3562 = vmatmul.mubr.msk.f32.gmra.mxu1 %vm502_vm0, %v497_v21  ;;  %3541 = vmatprep.mubr.msk.f32.mxu0 %vm502_vm0, %v488_v22 }
  0x24   : > { %3542 = vmatmul.mubr.msk.f32.gmra.mxu0 %vm502_vm0, %v489_v23 }
  0xd5   : > { %v4224_v24 = vpop.f32.mrf.mxu1 }
  0xd6   : > { %1002 = vrot.lane.b32.xlu0 %v4224_v24, %s4066_s28 }
  0xd7   : > { %v4228_v25 = vpop.f32.mrf.mxu1 }
  0xd8   : > { %1000 = vrot.lane.b32.xlu1 %v4228_v25, %s4066_s28  ;;  %v4232_v26 = vpop.f32.mrf.mxu0 }
  0xd9   : > { %v4234_v27 = vpop.f32.mrf.mxu1 }
  0xda   : > { %1006 = vrot.lane.b32.xlu0 %v4234_v27, %s4066_s28  ;;  %v4238_v28 = vpop.f32.mrf.mxu0 }
  0xdb   : > { %v4240_v29 = vpop.f32.mrf.mxu1  ;;  %3580 = vmatprep.mubr.msk.f32.mxu0 %vm765_vm1, %v4238_v28 }
  0xdc   : > { %1004 = vrot.lane.b32.xlu1 %v4240_v29, %s4066_s28  ;;  %v4290_v34 = vpop.f32.mrf.mxu0 }
  0xdd   : > { %v4246_v30 = vpop.f32.mrf.mxu1 }
  0xde   : > { %1010 = vrot.lane.b32.xlu0 %v4246_v30, %s4066_s28  ;;  %v4298_v35 = vpop.f32.mrf.mxu0 }
  0xdf   : > { %v4250_v31 = vpop.f32.mrf.mxu1 }
  0xe0   : > { %1008 = vrot.lane.b32.xlu1 %v4250_v31, %s4066_s28  ;;  %v4306_v36 = vpop.f32.mrf.mxu0 }
  0xe1   : > { %v4254_v32 = vpop.f32.mrf.mxu1 }
  0xe2   : > { %3564 = vmatprep.subr.msk.mxu0 %vm765_vm1, %v4254_v32  ;;  %v4312_v37 = vpop.f32.mrf.mxu0 }
  0xe3   : > { %v4258_v33 = vpop.f32.mrf.mxu1  ;;  %3565 = vmatpush3.xpose.msk.msra.mxu0 %vm765_vm1, %v4254_v32 }
  0xe4   : > { %1014 = vrot.lane.b32.xlu1 %v4254_v32, %s4066_s28  ;;  %3566 = vmatprep.subr.msk.mxu0 %vm765_vm1, %v4258_v33  ;;  %v4318_v38 = vpop.f32.mrf.mxu0 }
  0xe6   : > { %v4324_v39 = vpop.f32.mrf.mxu0 }
  0xe7   : > { %3567 = vmatpush3.xpose.msk.msra.mxu0 %vm765_vm1, %v4258_v33 }
  0xe8   : > { %1012 = vrot.lane.b32.xlu1 %v4258_v33, %s4066_s28  ;;  %3568 = vmatprep.subr.msk.mxu0 %vm765_vm1, %v4246_v30 }
  0xeb   : > { %3569 = vmatpush3.xpose.msk.msra.mxu0 %vm765_vm1, %v4246_v30 }
  0xec   : > { %1189 = vrot.lane.b32.xlu1 %v4258_v33, %s4067_s29  ;;  %3570 = vmatprep.subr.msk.mxu0 %vm765_vm1, %v4250_v31 }
  0xef   : > { %3571 = vmatpush3.xpose.msk.msra.mxu0 %vm765_vm1, %v4250_v31 }
  0xf0   : > { %1187 = vrot.lane.b32.xlu1 %v4246_v30, %s4067_s29  ;;  %3572 = vmatprep.subr.msk.mxu0 %vm765_vm1, %v4234_v27 }
  0xf3   : > { %3573 = vmatpush3.xpose.msk.msra.mxu0 %vm765_vm1, %v4234_v27 }
  0xf4   : > { %1185 = vrot.lane.b32.xlu1 %v4250_v31, %s4067_s29  ;;  %3574 = vmatprep.subr.msk.mxu0 %vm765_vm1, %v4240_v29 }
  0xf7   : > { %3575 = vmatpush3.xpose.msk.msra.mxu0 %vm765_vm1, %v4240_v29 }
  0xf8   : > { %1183 = vrot.lane.b32.xlu1 %v4234_v27, %s4067_s29  ;;  %3576 = vmatprep.subr.msk.mxu0 %vm765_vm1, %v4224_v24 }
  0xfb   : > { %3577 = vmatpush3.xpose.msk.msra.mxu0 %vm765_vm1, %v4224_v24 }
  0xfc   : > { %1181 = vrot.lane.b32.xlu1 %v4240_v29, %s4067_s29  ;;  %3578 = vmatprep.subr.msk.mxu0 %vm765_vm1, %v4228_v25 }
  0xff   : > { %3579 = vmatpush3.xpose.msk.msra.mxu0 %vm765_vm1, %v4228_v25 }
 0x100   : > { %1179 = vrot.lane.b32.xlu1 %v4224_v24, %s4067_s29 }
 0x102   : > { %3581 = vmatmul.mubr.msk.f32.vlgmr.msra.gmra.mxu0 %vm765_vm1, %v4232_v26 }
 0x103   : > { %3583 = vmatprep.mubr.msk.f32.mxu0 %vm765_vm1, %v4298_v35 }
 0x106   : > { %3584 = vmatmul.mubr.msk.f32.gmra.mxu0 %vm765_vm1, %v4290_v34 }
 0x107   : > { %3586 = vmatprep.mubr.msk.f32.mxu0 %vm765_vm1, %v4312_v37 }
 0x10a   : > { %3587 = vmatmul.mubr.msk.f32.gmra.mxu0 %vm765_vm1, %v4306_v36 }
 0x10b   : > { %3589 = vmatprep.mubr.msk.f32.mxu0 %vm765_vm1, %v4324_v39 }
 0x10e   : > { %3590 = vmatmul.mubr.msk.f32.gmra.mxu0 %vm765_vm1, %v4318_v38 }
 0x148   : > { %v1003_v42 = vpop.permute.xlu0 %1002 }
 0x14a   : > { %v1001_v40 = vpop.permute.xlu1 %1000 }
 0x14c   : > { %v1007_v44 = vpop.permute.xlu0 %1006 }
 0x14e   : > { %v1005_v41 = vpop.permute.xlu1 %1004 }
 0x150   : > { %v1011_v47 = vpop.permute.xlu0 %1010 }
 0x152   : > { %v1009_v43 = vpop.permute.xlu1 %1008 }
 0x156   : > { %v1015_v45 = vpop.permute.xlu1 %1014 }
 0x157   : > { %3592 = vmatprep.subr.mxu1 %v1015_v45 }
 0x158   : > { %3593 = vmatpush3.msra.mxu1 %v1015_v45 }
 0x15a   : > { %v1013_v46 = vpop.permute.xlu1 %1012 }
 0x15b   : > { %3594 = vmatprep.subr.mxu1 %v1013_v46 }
 0x15c   : > { %3595 = vmatpush3.msra.mxu1 %v1013_v46 }
 0x15d   : > { %3596 = vmatprep.subr.mxu1 %v1011_v47 }
 0x15e   : > { %3597 = vmatpush3.msra.mxu1 %v1011_v47  ;;  %v1190_v0 = vpop.permute.xlu1 %1189 }
 0x15f   : > { %3598 = vmatprep.subr.mxu1 %v1009_v43 }
 0x160   : > { %3599 = vmatpush3.msra.mxu1 %v1009_v43 }
 0x161   : > { %3600 = vmatprep.subr.mxu1 %v1007_v44 }
 0x162   : > { %3601 = vmatpush3.msra.mxu1 %v1007_v44  ;;  %v1188_v1 = vpop.permute.xlu1 %1187 }
 0x163   : > { %3602 = vmatprep.subr.mxu1 %v1005_v41 }
 0x164   : > { %3603 = vmatpush3.msra.mxu1 %v1005_v41 }
 0x165   : > { %3604 = vmatprep.subr.mxu1 %v1003_v42 }
 0x166   : > { %3605 = vmatpush3.msra.mxu1 %v1003_v42  ;;  %v1186_v2 = vpop.permute.xlu1 %1185 }
 0x167   : > { %3606 = vmatprep.subr.mxu1 %v1001_v40 }
 0x168   : > { %3607 = vmatpush3.msra.mxu1 %v1001_v40 }
 0x16a   : > { %v1184_v3 = vpop.permute.xlu1 %1183 }
 0x16e   : > { %v1182_v4 = vpop.permute.xlu1 %1181 }
 0x172   : > { %v1180_v6 = vpop.permute.xlu1 %1179 }
 0x1c2   : > { %v3582_v48 = vpop.f32.mrf.mxu0 }
 0x1c3   : > { %v923_v49 = vsel %vm919_vm2, %v3582_v48, -inf }
 0x1c4   : > { %924 = vmax.xlane.f32.xlu0 %v923_v49  ;;  %v880_v50 = vpop.f32.mrf.mxu0 }
 0x1c5   : > { %v920_v52 = vsel %vm919_vm2, %v880_v50, -inf }
 0x1c6   : > { %v4333_v51 = vpop.f32.mrf.mxu0 }
 0x1c7   : > { %v929_v61 = vsel %vm919_vm2, %v4333_v51, -inf }
 0x1c8   : > { %921 = vmax.xlane.f32.xlu0 %v920_v52  ;;  %v890_v53 = vpop.f32.mrf.mxu0 }
 0x1c9   : > { %v926_v54 = vsel %vm919_vm2, %v890_v53, -inf }
 0x1ca   : > { %927 = vmax.xlane.f32.xlu1 %v926_v54  ;;  %v4337_v55 = vpop.f32.mrf.mxu0 }
 0x1cb   : > { %v935_v62 = vsel %vm919_vm2, %v4337_v55, -inf }
 0x1cc   : > { %v4339_v56 = vpop.f32.mrf.mxu0 }
 0x1cd   : > { %v932_v57 = vsel %vm919_vm2, %v4339_v56, -inf }
 0x1ce   : > { %933 = vmax.xlane.f32.xlu1 %v932_v57  ;;  %v4343_v58 = vpop.f32.mrf.mxu0 }
 0x1cf   : > { %v941_v63 = vsel %vm919_vm2, %v4343_v58, -inf }
 0x1d0   : > { %v4345_v59 = vpop.f32.mrf.mxu0 }
 0x1d1   : > { %v938_v60 = vsel %vm919_vm2, %v4345_v59, -inf }
 0x1d2   : > { %939 = vmax.xlane.f32.xlu1 %v938_v60 }
 0x1de   : > { %1191 = vrot.lane.b32.xlu0 %v4254_v32, %s4067_s29 }
 0x1e3   : > { %1161 = vrot.lane.b32.xlu1 %v4238_v28, %s4067_s29 }
 0x1e7   : > { %1165 = vrot.lane.b32.xlu1 %v4298_v35, %s4067_s29 }
 0x1eb   : > { %1169 = vrot.lane.b32.xlu1 %v4312_v37, %s4067_s29 }
 0x1ef   : > { %1173 = vrot.lane.b32.xlu1 %v4324_v39, %s4067_s29 }
 0x1f3   : > { %1422 = vrot.lane.b32.xlu1 %v4258_v33, %s4068_s30 }
 0x1f7   : > { %1420 = vrot.lane.b32.xlu1 %v4246_v30, %s4068_s30 }
 0x1fb   : > { %1416 = vrot.lane.b32.xlu1 %v4234_v27, %s4068_s30 }
 0x1fd   : > { %930 = vmax.xlane.f32.xlu0 %v929_v61 }
 0x1ff   : > { %1412 = vrot.lane.b32.xlu1 %v4224_v24, %s4068_s30 }
 0x201   : > { %936 = vmax.xlane.f32.xlu0 %v935_v62 }
 0x203   : > { %1601 = vrot.lane.b32.xlu1 %v4254_v32, %s4069_s12 }
 0x205   : > { %942 = vmax.xlane.f32.xlu0 %v941_v63 }
 0x207   : > { %1597 = vrot.lane.b32.xlu1 %v4246_v30, %s4069_s12 }
 0x20b   : > { %1593 = vrot.lane.b32.xlu1 %v4234_v27, %s4069_s12 }
 0x21b   : > { %1177 = vrot.lane.b32.xlu0 %v4228_v25, %s4067_s29 }
 0x21f   : > { %1163 = vrot.lane.b32.xlu0 %v4232_v26, %s4067_s29 }
 0x223   : > { %1167 = vrot.lane.b32.xlu0 %v4290_v34, %s4067_s29 }
 0x227   : > { %1171 = vrot.lane.b32.xlu0 %v4306_v36, %s4067_s29 }
 0x22b   : > { %1175 = vrot.lane.b32.xlu0 %v4318_v38, %s4067_s29 }
 0x22f   : > { %1424 = vrot.lane.b32.xlu0 %v4254_v32, %s4068_s30 }
 0x233   : > { %1418 = vrot.lane.b32.xlu0 %v4250_v31, %s4068_s30 }
 0x237   : > { %1414 = vrot.lane.b32.xlu0 %v4240_v29, %s4068_s30 }
 0x23b   : > { %1410 = vrot.lane.b32.xlu0 %v4228_v25, %s4068_s30  ;;  %s5090_s30 = scalar_lea.vmem %s5147_s11, %s4175_s16 }
 0x23f   : > { %1599 = vrot.lane.b32.xlu0 %v4258_v33, %s4069_s12 }
 0x243   : > { %1595 = vrot.lane.b32.xlu0 %v4250_v31, %s4069_s12 }
 0x24d   : > { %v925_v5 = vpop.xlane.xlu0 %924 }
 0x24e   : > { %v945_v7 = vsub.f32 %v3582_v48, %v925_v5 }
 0x250   : > { %v954_v10 = vmul.f32 1.442695, %v945_v7 }
 0x251   : > { %v922_v8 = vpop.xlane.xlu0 %921 }
 0x252   : > { %v944_v9 = vsub.f32 %v880_v50, %v922_v8 }
 0x253   : > { %v928_v11 = vpop.xlane.xlu1 %927 }
 0x254   : > { %v952_v12 = vmul.f32 1.442695, %v944_v9  ;;  %v946_v13 = vsub.f32 %v890_v53, %v928_v11 }
 0x255   : > { %v1192_v14 = vpop.permute.xlu0 %1191 }
 0x256   : > { %3898 = vpow2.f32 %v952_v12  ;;  %v956_v15 = vmul.f32 1.442695, %v946_v13  ;;  %3620 = vmatprep.subr.msk.mxu1 %vm765_vm1, %v1192_v14 }
 0x257   : > { %3900 = vpow2.f32 %v954_v10  ;;  %v934_v19 = vpop.xlane.xlu1 %933 }
 0x258   : > { %3902 = vpow2.f32 %v956_v15  ;;  %v948_v21 = vsub.f32 %v4339_v56, %v934_v19 }
 0x25a   : > { %v960_v41 = vmul.f32 1.442695, %v948_v21 }
 0x25b   : > { %v940_v20 = vpop.xlane.xlu1 %939 }
 0x25c   : > { %v950_v42 = vsub.f32 %v4345_v59, %v940_v20 }
 0x25e   : > { %v964_v46 = vmul.f32 1.442695, %v950_v42 }
 0x25f   : > { %v1162_v22 = vpop.permute.xlu1 %1161 }
 0x263   : > { %v4394_v16 = vpop.eup %3898  ;;  %v1166_v47 = vpop.permute.xlu1 %1165 }
 0x264   : > { %v4396_v17 = vpop.eup %3900  ;;  %3608 = vmatprep.mubr.msk.f32.mxu1 %vm919_vm2, %v4394_v16 }
 0x265   : > { %v4400_v18 = vpop.eup %3902  ;;  %3609 = vmatmul.mubr.msk.f32.vlgmr.msra.gmra.mxu1 %vm919_vm2, %v4396_v17 }
 0x266   : > { %3621 = vmatpush3.xpose.msk.msra.mxu1 %vm765_vm1, %v1192_v14  ;;  %3611 = vmatprep.mubr.msk.f32.mxu1 %vm919_vm2, %v4400_v18 }
 0x267   : > { %3622 = vmatprep.subr.msk.mxu1 %vm765_vm1, %v1190_v0  ;;  %v1170_v53 = vpop.permute.xlu1 %1169 }
 0x26a   : > { %3623 = vmatpush3.xpose.msk.msra.mxu1 %vm765_vm1, %v1190_v0 }
 0x26b   : > { %3624 = vmatprep.subr.msk.mxu1 %vm765_vm1, %v1188_v1 }
 0x26e   : > { %3625 = vmatpush3.xpose.msk.msra.mxu1 %vm765_vm1, %v1188_v1 }
 0x26f   : > { %3626 = vmatprep.subr.msk.mxu1 %vm765_vm1, %v1186_v2 }
 0x272   : > { %3627 = vmatpush3.xpose.msk.msra.mxu1 %vm765_vm1, %v1186_v2 }
 0x273   : > { %3628 = vmatprep.subr.msk.mxu1 %vm765_vm1, %v1184_v3 }
 0x276   : > { %3629 = vmatpush3.xpose.msk.msra.mxu1 %vm765_vm1, %v1184_v3 }
 0x277   : > { %3630 = vmatprep.subr.msk.mxu1 %vm765_vm1, %v1182_v4 }
 0x27a   : > { %3631 = vmatpush3.xpose.msk.msra.mxu1 %vm765_vm1, %v1182_v4 }
 0x27b   : > { %3632 = vmatprep.subr.msk.mxu1 %vm765_vm1, %v1180_v6 }
 0x27e   : > { %3633 = vmatpush3.xpose.msk.msra.mxu1 %vm765_vm1, %v1180_v6 }
 0x286   : > { %v931_v23 = vpop.xlane.xlu0 %930 }
 0x287   : > { %v947_v40 = vsub.f32 %v4333_v51, %v931_v23 }
 0x289   : > { %v958_v43 = vmul.f32 1.442695, %v947_v40 }
 0x28a   : > { %v937_v44 = vpop.xlane.xlu0 %936 }
 0x28b   : > { %3904 = vpow2.f32 %v958_v43  ;;  %v949_v45 = vsub.f32 %v4337_v55, %v937_v44  ;;  %v1174_v55 = vpop.permute.xlu1 %1173 }
 0x28c   : > { %3906 = vpow2.f32 %v960_v41 }
 0x28d   : > { %v962_v48 = vmul.f32 1.442695, %v949_v45 }
 0x28e   : > { %v943_v49 = vpop.xlane.xlu0 %942 }
 0x28f   : > { %3908 = vpow2.f32 %v962_v48  ;;  %v951_v50 = vsub.f32 %v4343_v58, %v943_v49  ;;  %v1423_v61 = vpop.permute.xlu1 %1422 }
 0x290   : > { %3910 = vpow2.f32 %v964_v46 }
 0x291   : > { %v966_v52 = vmul.f32 1.442695, %v951_v50 }
 0x292   : > { %v1178_v51 = vpop.permute.xlu0 %1177 }
 0x293   : > { %3912 = vpow2.f32 %v966_v52  ;;  %3634 = vmatprep.subr.msk.mxu1 %vm765_vm1, %v1178_v51  ;;  %v1421_v1 = vpop.permute.xlu1 %1420 }
 0x294   : > { %3635 = vmatpush3.xpose.msk.msra.mxu1 %vm765_vm1, %v1178_v51 }
 0x296   : > { %v1164_v54 = vpop.permute.xlu0 %1163 }
 0x297   : > { %v1417_v3 = vpop.permute.xlu1 %1416 }
 0x298   : > { %v4426_v56 = vpop.eup %3904 }
 0x299   : > { %v4428_v57 = vpop.eup %3906  ;;  %3612 = vmatmul.mubr.msk.f32.gmra.mxu1 %vm919_vm2, %v4426_v56 }
 0x29a   : > { %3614 = vmatprep.mubr.msk.f32.mxu1 %vm919_vm2, %v4428_v57  ;;  %v1168_v58 = vpop.permute.xlu0 %1167 }
 0x29b   : > { %v1413_v6 = vpop.permute.xlu1 %1412 }
 0x29c   : > { %v4434_v59 = vpop.eup %3908 }
 0x29d   : > { %v4436_v60 = vpop.eup %3910  ;;  %3615 = vmatmul.mubr.msk.f32.gmra.mxu1 %vm919_vm2, %v4434_v59 }
 0x29e   : > { %v1172_v62 = vpop.permute.xlu0 %1171  ;;  %3617 = vmatprep.mubr.msk.f32.mxu1 %vm919_vm2, %v4436_v60 }
 0x29f   : > { %v4454_v8 = vpop.permute.xlu1 %1601 }
 0x2a0   : > { %v4442_v63 = vpop.eup %3912 }
 0x2a1   : > { %3618 = vmatmul.mubr.msk.f32.gmra.mxu1 %vm919_vm2, %v4442_v63 }
 0x2a2   : > { %v1176_v0 = vpop.permute.xlu0 %1175  ;;  %3636 = vmatprep.mubr.msk.f32.mxu1 %vm765_vm1, %v1162_v22 }
 0x2a3   : > { %v1598_v51 = vpop.permute.xlu1 %1597 }
 0x2a5   : > { %3637 = vmatmul.mubr.msk.f32.vlgmr.msra.gmra.mxu1 %vm765_vm1, %v1164_v54 }
 0x2a6   : > { %v1425_v2 = vpop.permute.xlu0 %1424  ;;  %3639 = vmatprep.mubr.msk.f32.mxu1 %vm765_vm1, %v1166_v47 }
 0x2a7   : > { %3648 = vmatprep.subr.mxu0 %v1425_v2 }
 0x2a8   : > { %3649 = vmatpush3.msra.mxu0 %v1425_v2 }
 0x2a9   : > { %3640 = vmatmul.mubr.msk.f32.gmra.mxu1 %vm765_vm1, %v1168_v58  ;;  %3650 = vmatprep.subr.mxu0 %v1423_v61 }
 0x2aa   : > { %v1419_v4 = vpop.permute.xlu0 %1418  ;;  %3642 = vmatprep.mubr.msk.f32.mxu1 %vm765_vm1, %v1170_v53  ;;  %3651 = vmatpush3.msra.mxu0 %v1423_v61 }
 0x2ab   : > { %3652 = vmatprep.subr.mxu0 %v1421_v1 }
 0x2ac   : > { %3653 = vmatpush3.msra.mxu0 %v1421_v1 }
 0x2ad   : > { %3643 = vmatmul.mubr.msk.f32.gmra.mxu1 %vm765_vm1, %v1172_v62  ;;  %3654 = vmatprep.subr.mxu0 %v1419_v4 }
 0x2ae   : > { %v1415_v5 = vpop.permute.xlu0 %1414  ;;  %3645 = vmatprep.mubr.msk.f32.mxu1 %vm765_vm1, %v1174_v55  ;;  %3655 = vmatpush3.msra.mxu0 %v1419_v4  ;;  %v1594_v55 = vpop.permute.xlu1 %1593 }
 0x2af   : > { %3656 = vmatprep.subr.mxu0 %v1417_v3 }
 0x2b0   : > { %3657 = vmatpush3.msra.mxu0 %v1417_v3 }
 0x2b1   : > { %3646 = vmatmul.mubr.msk.f32.gmra.mxu1 %vm765_vm1, %v1176_v0  ;;  %3658 = vmatprep.subr.mxu0 %v1415_v5 }
 0x2b2   : > { %3659 = vmatpush3.msra.mxu0 %v1415_v5  ;;  %v1411_v7 = vpop.permute.xlu0 %1410 }
 0x2b3   : > { %3660 = vmatprep.subr.mxu0 %v1413_v6 }
 0x2b4   : > { %3661 = vmatpush3.msra.mxu0 %v1413_v6 }
 0x2b5   : > { %3662 = vmatprep.subr.mxu0 %v1411_v7 }
 0x2b6   : > { %3663 = vmatpush3.msra.mxu0 %v1411_v7  ;;  %v1600_v53 = vpop.permute.xlu0 %1599 }
 0x2b7   : > { %3676 = vmatprep.subr.msk.mxu0 %vm765_vm1, %v4454_v8 }
 0x2ba   : > { %v1596_v54 = vpop.permute.xlu0 %1595 }
 0x325   : > { %v4458_v9 = vpop.f32.mrf.mxu1 }
 0x327   : > { %v4460_v10 = vpop.f32.mrf.mxu1 }
 0x359   : > { %v4462_v11 = vpop.f32.mrf.mxu1 }
 0x35b   : > { %v4464_v12 = vpop.f32.mrf.mxu1 }
 0x35d   : > { %v4466_v13 = vpop.f32.mrf.mxu1 }
 0x35f   : > { %v4468_v14 = vpop.f32.mrf.mxu1 }
 0x361   : > { %v4470_v15 = vpop.f32.mrf.mxu1 }
 0x363   : > { %v4472_v19 = vpop.f32.mrf.mxu1 }
 0x365   : > { %v3638_v20 = vpop.f32.mrf.mxu1 }
 0x366   : > { %v1333_v21 = vsel %vm919_vm2, %v3638_v20, -inf }
 0x367   : > { %1334 = vmax.xlane.f32.xlu0 %v1333_v21  ;;  %v1291_v22 = vpop.f32.mrf.mxu1 }
 0x368   : > { %v1330_v23 = vsel %vm919_vm2, %v1291_v22, -inf }
 0x369   : > { %1331 = vmax.xlane.f32.xlu1 %v1330_v23  ;;  %v4480_v40 = vpop.f32.mrf.mxu1 }
 0x36a   : > { %v1339_v46 = vsel %vm919_vm2, %v4480_v40, -inf }
 0x36b   : > { %v4482_v41 = vpop.f32.mrf.mxu1 }
 0x36c   : > { %v1336_v44 = vsel %vm919_vm2, %v4482_v41, -inf }
 0x36d   : > { %v4484_v42 = vpop.f32.mrf.mxu1 }
 0x36e   : > { %v1345_v49 = vsel %vm919_vm2, %v4484_v42, -inf }
 0x36f   : > { %v4486_v43 = vpop.f32.mrf.mxu1 }
 0x370   : > { %v1342_v47 = vsel %vm919_vm2, %v4486_v43, -inf }
 0x371   : > { %v4490_v45 = vpop.f32.mrf.mxu1 }
 0x372   : > { %v1351_v52 = vsel %vm919_vm2, %v4490_v45, -inf }
 0x373   : > { %v4496_v48 = vpop.f32.mrf.mxu1 }
 0x374   : > { %v1348_v50 = vsel %vm919_vm2, %v4496_v48, -inf }
 0x37a   : > { %1589 = vrot.lane.b32.xlu1 %v4224_v24, %s4069_s12 }
 0x37d   : > { %1591 = vrot.lane.b32.xlu0 %v4240_v29, %s4069_s12 }
 0x39c   : > { %1337 = vmax.xlane.f32.xlu0 %v1336_v44 }
 0x39e   : > { %1340 = vmax.xlane.f32.xlu1 %v1339_v46 }
 0x3a0   : > { %1343 = vmax.xlane.f32.xlu0 %v1342_v47 }
 0x3a2   : > { %1346 = vmax.xlane.f32.xlu1 %v1345_v49 }
 0x3a4   : > { %1349 = vmax.xlane.f32.xlu0 %v1348_v50 }
 0x3a6   : > { %1352 = vmax.xlane.f32.xlu1 %v1351_v52 }
 0x3b7   : > { %1571 = vrot.lane.b32.xlu1 %v4238_v28, %s4069_s12 }
 0x3ba   : > { %1587 = vrot.lane.b32.xlu0 %v4228_v25, %s4069_s12 }
 0x3bb   : > { %1575 = vrot.lane.b32.xlu1 %v4298_v35, %s4069_s12 }
 0x3be   : > { %1573 = vrot.lane.b32.xlu0 %v4232_v26, %s4069_s12 }
 0x3bf   : > { %1579 = vrot.lane.b32.xlu1 %v4312_v37, %s4069_s12 }
 0x3c2   : > { %1577 = vrot.lane.b32.xlu0 %v4290_v34, %s4069_s12 }
 0x3c3   : > { %1583 = vrot.lane.b32.xlu1 %v4324_v39, %s4069_s12 }
 0x3c6   : > { %1581 = vrot.lane.b32.xlu0 %v4306_v36, %s4069_s12 }
 0x3c7   : > { %1832 = vrot.lane.b32.xlu1 %v4258_v33, %s4070_s13 }
 0x3ca   : > { %1585 = vrot.lane.b32.xlu0 %v4318_v38, %s4069_s12  ;;  %s4075_s12 = smov 24  }
 0x3cb   : > { %1830 = vrot.lane.b32.xlu1 %v4246_v30, %s4070_s13 }
 0x3ce   : > { %1834 = vrot.lane.b32.xlu0 %v4254_v32, %s4070_s13 }
 0x3cf   : > { %1826 = vrot.lane.b32.xlu1 %v4234_v27, %s4070_s13 }
 0x3d2   : > { %1828 = vrot.lane.b32.xlu0 %v4250_v31, %s4070_s13 }
 0x3d3   : > { %1822 = vrot.lane.b32.xlu1 %v4224_v24, %s4070_s13 }
 0x3d6   : > { %1824 = vrot.lane.b32.xlu0 %v4240_v29, %s4070_s13 }
 0x3d7   : > { %2011 = vrot.lane.b32.xlu1 %v4254_v32, %s4071_s14 }
 0x3da   : > { %1820 = vrot.lane.b32.xlu0 %v4228_v25, %s4070_s13 }
 0x3db   : > { %2007 = vrot.lane.b32.xlu1 %v4246_v30, %s4071_s14 }
 0x3de   : > { %2009 = vrot.lane.b32.xlu0 %v4258_v33, %s4071_s14 }
 0x3df   : > { %2003 = vrot.lane.b32.xlu1 %v4234_v27, %s4071_s14 }
 0x3e2   : > { %2005 = vrot.lane.b32.xlu0 %v4250_v31, %s4071_s14 }
 0x3f0   : > { %v1335_v58 = vpop.xlane.xlu0 %1334 }
 0x3f1   : > { %v1355_v61 = vsub.f32 %v3638_v20, %v1335_v58 }
 0x3f2   : > { %v1332_v62 = vpop.xlane.xlu1 %1331 }
 0x3f3   : > { %v1354_v0 = vsub.f32 %v1291_v22, %v1332_v62  ;;  %v1364_v1 = vmul.f32 1.442695, %v1355_v61 }
 0x3f4   : > { %v1592_v5 = vpop.permute.xlu0 %1591 }
 0x3f5   : > { %v1362_v2 = vmul.f32 1.442695, %v1354_v0 }
 0x3f6   : > { %v1590_v6 = vpop.permute.xlu1 %1589 }
 0x3f7   : > { %3914 = vpow2.f32 %v1362_v2 }
 0x3f8   : > { %3916 = vpow2.f32 %v1364_v1 }
 0x404   : > { %v4540_v3 = vpop.eup %3914 }
 0x405   : > { %v4542_v4 = vpop.eup %3916  ;;  %3664 = vmatprep.mubr.msk.f32.mxu0 %vm919_vm2, %v4540_v3 }
 0x406   : > { %3665 = vmatmul.mubr.msk.f32.vlgmr.msra.gmra.mxu0 %vm919_vm2, %v4542_v4 }
 0x407   : > { %3677 = vmatpush3.xpose.msk.msra.mxu0 %vm765_vm1, %v4454_v8 }
 0x408   : > { %3678 = vmatprep.subr.msk.mxu0 %vm765_vm1, %v1600_v53 }
 0x40b   : > { %3679 = vmatpush3.xpose.msk.msra.mxu0 %vm765_vm1, %v1600_v53 }
 0x40c   : > { %3680 = vmatprep.subr.msk.mxu0 %vm765_vm1, %v1598_v51 }
 0x40f   : > { %3681 = vmatpush3.xpose.msk.msra.mxu0 %vm765_vm1, %v1598_v51 }
 0x410   : > { %3682 = vmatprep.subr.msk.mxu0 %vm765_vm1, %v1596_v54 }
 0x413   : > { %3683 = vmatpush3.xpose.msk.msra.mxu0 %vm765_vm1, %v1596_v54 }
 0x414   : > { %3684 = vmatprep.subr.msk.mxu0 %vm765_vm1, %v1594_v55 }
 0x417   : > { %3685 = vmatpush3.xpose.msk.msra.mxu0 %vm765_vm1, %v1594_v55 }
 0x418   : > { %3686 = vmatprep.subr.msk.mxu0 %vm765_vm1, %v1592_v5 }
 0x41b   : > { %3687 = vmatpush3.xpose.msk.msra.mxu0 %vm765_vm1, %v1592_v5 }
 0x41c   : > { %3688 = vmatprep.subr.msk.mxu0 %vm765_vm1, %v1590_v6 }
 0x41f   : > { %3689 = vmatpush3.xpose.msk.msra.mxu0 %vm765_vm1, %v1590_v6 }
 0x425   : > { %v1338_v7 = vpop.xlane.xlu0 %1337 }
 0x426   : > { %v1356_v8 = vsub.f32 %v4482_v41, %v1338_v7 }
 0x427   : > { %v1341_v20 = vpop.xlane.xlu1 %1340 }
 0x428   : > { %v1366_v21 = vmul.f32 1.442695, %v1356_v8  ;;  %v1357_v22 = vsub.f32 %v4480_v40, %v1341_v20 }
 0x429   : > { %v1344_v23 = vpop.xlane.xlu0 %1343 }
 0x42a   : > { %3918 = vpow2.f32 %v1366_v21  ;;  %v1368_v44 = vmul.f32 1.442695, %v1357_v22  ;;  %v1358_v46 = vsub.f32 %v4486_v43, %v1344_v23 }
 0x42b   : > { %v1347_v47 = vpop.xlane.xlu1 %1346 }
 0x42c   : > { %3920 = vpow2.f32 %v1368_v44  ;;  %v1370_v49 = vmul.f32 1.442695, %v1358_v46  ;;  %v1359_v50 = vsub.f32 %v4484_v42, %v1347_v47 }
 0x42d   : > { %v1350_v52 = vpop.xlane.xlu0 %1349 }
 0x42e   : > { %3922 = vpow2.f32 %v1370_v49  ;;  %v1372_v53 = vmul.f32 1.442695, %v1359_v50  ;;  %v1360_v51 = vsub.f32 %v4496_v48, %v1350_v52 }
 0x42f   : > { %v1353_v41 = vpop.xlane.xlu1 %1352 }
 0x430   : > { %3924 = vpow2.f32 %v1372_v53  ;;  %v1374_v54 = vmul.f32 1.442695, %v1360_v51  ;;  %v1361_v40 = vsub.f32 %v4490_v45, %v1353_v41 }
 0x431   : > { %v1588_v55 = vpop.permute.xlu0 %1587 }
 0x432   : > { %3926 = vpow2.f32 %v1374_v54  ;;  %v1376_v58 = vmul.f32 1.442695, %v1361_v40  ;;  %3690 = vmatprep.subr.msk.mxu0 %vm765_vm1, %v1588_v55 }
 0x433   : > { %3691 = vmatpush3.xpose.msk.msra.mxu0 %vm765_vm1, %v1588_v55  ;;  %v1572_v43 = vpop.permute.xlu1 %1571 }
 0x434   : > { %3928 = vpow2.f32 %v1376_v58 }
 0x435   : > { %v1574_v42 = vpop.permute.xlu0 %1573 }
 0x437   : > { %v4570_v61 = vpop.eup %3918  ;;  %v1576_v62 = vpop.permute.xlu1 %1575 }
 0x438   : > { %3667 = vmatprep.mubr.msk.f32.mxu0 %vm919_vm2, %v4570_v61 }
 0x439   : > { %v4574_v48 = vpop.eup %3920  ;;  %v1578_v0 = vpop.permute.xlu0 %1577 }
 0x43a   : > { %3668 = vmatmul.mubr.msk.f32.gmra.mxu0 %vm919_vm2, %v4574_v48 }
 0x43b   : > { %v4578_v45 = vpop.eup %3922  ;;  %v1580_v1 = vpop.permute.xlu1 %1579 }
 0x43c   : > { %3670 = vmatprep.mubr.msk.f32.mxu0 %vm919_vm2, %v4578_v45 }
 0x43d   : > { %v4582_v2 = vpop.eup %3924  ;;  %v1582_v5 = vpop.permute.xlu0 %1581 }
 0x43e   : > { %3671 = vmatmul.mubr.msk.f32.gmra.mxu0 %vm919_vm2, %v4582_v2 }
 0x43f   : > { %v4586_v6 = vpop.eup %3926  ;;  %v1584_v7 = vpop.permute.xlu1 %1583 }
 0x440   : > { %3673 = vmatprep.mubr.msk.f32.mxu0 %vm919_vm2, %v4586_v6 }
 0x441   : > { %v4590_v8 = vpop.eup %3928  ;;  %v1586_v20 = vpop.permute.xlu0 %1585 }
 0x442   : > { %3674 = vmatmul.mubr.msk.f32.gmra.mxu0 %vm919_vm2, %v4590_v8 }
 0x443   : > { %3692 = vmatprep.mubr.msk.f32.mxu0 %vm765_vm1, %v1572_v43  ;;  %v1833_v21 = vpop.permute.xlu1 %1832 }
 0x445   : > { %v1835_v22 = vpop.permute.xlu0 %1834 }
 0x446   : > { %3693 = vmatmul.mubr.msk.f32.vlgmr.msra.gmra.mxu0 %vm765_vm1, %v1574_v42  ;;  %3704 = vmatprep.subr.mxu1 %v1835_v22 }
 0x447   : > { %3695 = vmatprep.mubr.msk.f32.mxu0 %vm765_vm1, %v1576_v62  ;;  %3705 = vmatpush3.msra.mxu1 %v1835_v22  ;;  %v1831_v23 = vpop.permute.xlu1 %1830 }
 0x448   : > { %3706 = vmatprep.subr.mxu1 %v1833_v21 }
 0x449   : > { %v1829_v44 = vpop.permute.xlu0 %1828  ;;  %3707 = vmatpush3.msra.mxu1 %v1833_v21 }
 0x44a   : > { %3696 = vmatmul.mubr.msk.f32.gmra.mxu0 %vm765_vm1, %v1578_v0  ;;  %3708 = vmatprep.subr.mxu1 %v1831_v23 }
 0x44b   : > { %3698 = vmatprep.mubr.msk.f32.mxu0 %vm765_vm1, %v1580_v1  ;;  %3709 = vmatpush3.msra.mxu1 %v1831_v23  ;;  %v1827_v46 = vpop.permute.xlu1 %1826 }
 0x44c   : > { %3710 = vmatprep.subr.mxu1 %v1829_v44 }
 0x44d   : > { %v1825_v47 = vpop.permute.xlu0 %1824  ;;  %3711 = vmatpush3.msra.mxu1 %v1829_v44 }
 0x44e   : > { %3699 = vmatmul.mubr.msk.f32.gmra.mxu0 %vm765_vm1, %v1582_v5  ;;  %3712 = vmatprep.subr.mxu1 %v1827_v46 }
 0x44f   : > { %3701 = vmatprep.mubr.msk.f32.mxu0 %vm765_vm1, %v1584_v7  ;;  %3713 = vmatpush3.msra.mxu1 %v1827_v46  ;;  %v1823_v49 = vpop.permute.xlu1 %1822 }
 0x450   : > { %3714 = vmatprep.subr.mxu1 %v1825_v47 }
 0x451   : > { %3715 = vmatpush3.msra.mxu1 %v1825_v47  ;;  %v1821_v50 = vpop.permute.xlu0 %1820 }
 0x452   : > { %3702 = vmatmul.mubr.msk.f32.gmra.mxu0 %vm765_vm1, %v1586_v20  ;;  %3716 = vmatprep.subr.mxu1 %v1823_v49 }
 0x453   : > { %3717 = vmatpush3.msra.mxu1 %v1823_v49  ;;  %v4602_v52 = vpop.permute.xlu1 %2011 }
 0x454   : > { %3718 = vmatprep.subr.mxu1 %v1821_v50 }
 0x455   : > { %3719 = vmatpush3.msra.mxu1 %v1821_v50 }
 0x456   : > { %3732 = vmatprep.subr.msk.mxu1 %vm765_vm1, %v4602_v52 }
 0x4c6   : > { %v4606_v53 = vpop.f32.mrf.mxu0 }
 0x4c8   : > { %v4608_v51 = vpop.f32.mrf.mxu0 }
 0x4fa   : > { %v4610_v41 = vpop.f32.mrf.mxu0 }
 0x4fc   : > { %v4612_v54 = vpop.f32.mrf.mxu0 }
 0x4fe   : > { %v4614_v40 = vpop.f32.mrf.mxu0 }
 0x500   : > { %v4616_v55 = vpop.f32.mrf.mxu0 }
 0x502   : > { %v4618_v58 = vpop.f32.mrf.mxu0 }
 0x504   : > { %v4620_v43 = vpop.f32.mrf.mxu0 }
 0x506   : > { %v3694_v42 = vpop.f32.mrf.mxu0 }
 0x507   : > { %v1743_v62 = vsel %vm919_vm2, %v3694_v42, -inf }
 0x508   : > { %1744 = vmax.xlane.f32.xlu0 %v1743_v62  ;;  %v1701_v0 = vpop.f32.mrf.mxu0 }
 0x509   : > { %v1740_v1 = vsel %vm919_vm2, %v1701_v0, -inf }
 0x50a   : > { %1741 = vmax.xlane.f32.xlu1 %v1740_v1  ;;  %v4628_v5 = vpop.f32.mrf.mxu0 }
 0x50b   : > { %v1749_v44 = vsel %vm919_vm2, %v4628_v5, -inf }
 0x50c   : > { %v4630_v7 = vpop.f32.mrf.mxu0 }
 0x50d   : > { %v1746_v22 = vsel %vm919_vm2, %v4630_v7, -inf }
 0x50e   : > { %v4632_v20 = vpop.f32.mrf.mxu0 }
 0x50f   : > { %v1755_v49 = vsel %vm919_vm2, %v4632_v20, -inf }
 0x510   : > { %v4634_v21 = vpop.f32.mrf.mxu0 }
 0x511   : > { %v1752_v46 = vsel %vm919_vm2, %v4634_v21, -inf }
 0x512   : > { %v4638_v23 = vpop.f32.mrf.mxu0 }
 0x513   : > { %v1761_v62 = vsel %vm919_vm2, %v4638_v23, -inf }
 0x514   : > { %v4644_v47 = vpop.f32.mrf.mxu0 }
 0x515   : > { %v1758_v50 = vsel %vm919_vm2, %v4644_v47, -inf }
 0x51b   : > { %1999 = vrot.lane.b32.xlu1 %v4224_v24, %s4071_s14 }
 0x51e   : > { %2001 = vrot.lane.b32.xlu0 %v4240_v29, %s4071_s14 }
 0x53d   : > { %1747 = vmax.xlane.f32.xlu0 %v1746_v22 }
 0x53f   : > { %1750 = vmax.xlane.f32.xlu1 %v1749_v44 }
 0x541   : > { %1753 = vmax.xlane.f32.xlu0 %v1752_v46 }
 0x543   : > { %1756 = vmax.xlane.f32.xlu1 %v1755_v49 }
 0x545   : > { %1759 = vmax.xlane.f32.xlu0 %v1758_v50 }
 0x547   : > { %1762 = vmax.xlane.f32.xlu1 %v1761_v62 }
 0x558   : > { %1981 = vrot.lane.b32.xlu1 %v4238_v28, %s4071_s14  ;;  %v2008_v28 = vpop.permute.xlu1 %2007 }
 0x55b   : > { %1997 = vrot.lane.b32.xlu0 %v4228_v25, %s4071_s14 }
 0x55c   : > { %1985 = vrot.lane.b32.xlu1 %v4298_v35, %s4071_s14 }
 0x55f   : > { %1983 = vrot.lane.b32.xlu0 %v4232_v26, %s4071_s14  ;;  %v2010_v26 = vpop.permute.xlu0 %2009 }
 0x560   : > { %1989 = vrot.lane.b32.xlu1 %v4312_v37, %s4071_s14 }
 0x563   : > { %1987 = vrot.lane.b32.xlu0 %v4290_v34, %s4071_s14  ;;  %v2004_v34 = vpop.permute.xlu1 %2003 }
 0x564   : > { %1993 = vrot.lane.b32.xlu1 %v4324_v39, %s4071_s14 }
 0x567   : > { %1991 = vrot.lane.b32.xlu0 %v4306_v36, %s4071_s14 }
 0x568   : > { %2242 = vrot.lane.b32.xlu1 %v4258_v33, %s4072_s15  ;;  %v2006_v33 = vpop.permute.xlu0 %2005 }
 0x56b   : > { %1995 = vrot.lane.b32.xlu0 %v4318_v38, %s4071_s14 }
 0x56c   : > { %2240 = vrot.lane.b32.xlu1 %v4246_v30, %s4072_s15 }
 0x56f   : > { %2244 = vrot.lane.b32.xlu0 %v4254_v32, %s4072_s15 }
 0x570   : > { %2236 = vrot.lane.b32.xlu1 %v4234_v27, %s4072_s15 }
 0x573   : > { %2238 = vrot.lane.b32.xlu0 %v4250_v31, %s4072_s15 }
 0x577   : > { %2234 = vrot.lane.b32.xlu0 %v4240_v29, %s4072_s15 }
 0x591   : > { %v1745_v35 = vpop.xlane.xlu0 %1744 }
 0x592   : > { %v1765_v36 = vsub.f32 %v3694_v42, %v1745_v35 }
 0x593   : > { %v1742_v37 = vpop.xlane.xlu1 %1741 }
 0x594   : > { %v1764_v30 = vsub.f32 %v1701_v0, %v1742_v37  ;;  %v1774_v38 = vmul.f32 1.442695, %v1765_v36 }
 0x595   : > { %v2002_v29 = vpop.permute.xlu0 %2001 }
 0x596   : > { %v1772_v39 = vmul.f32 1.442695, %v1764_v30 }
 0x597   : > { %v2000_v31 = vpop.permute.xlu1 %1999 }
 0x598   : > { %3930 = vpow2.f32 %v1772_v39 }
 0x599   : > { %3932 = vpow2.f32 %v1774_v38 }
 0x5a5   : > { %v4682_v32 = vpop.eup %3930 }
 0x5a6   : > { %v4684_v27 = vpop.eup %3932  ;;  %3720 = vmatprep.mubr.msk.f32.mxu1 %vm919_vm2, %v4682_v32 }
 0x5a7   : > { %3721 = vmatmul.mubr.msk.f32.vlgmr.msra.gmra.mxu1 %vm919_vm2, %v4684_v27 }
 0x5a8   : > { %3733 = vmatpush3.xpose.msk.msra.mxu1 %vm765_vm1, %v4602_v52 }
 0x5a9   : > { %3734 = vmatprep.subr.msk.mxu1 %vm765_vm1, %v2010_v26 }
 0x5ac   : > { %3735 = vmatpush3.xpose.msk.msra.mxu1 %vm765_vm1, %v2010_v26 }
 0x5ad   : > { %3736 = vmatprep.subr.msk.mxu1 %vm765_vm1, %v2008_v28 }
 0x5b0   : > { %3737 = vmatpush3.xpose.msk.msra.mxu1 %vm765_vm1, %v2008_v28 }
 0x5b1   : > { %3738 = vmatprep.subr.msk.mxu1 %vm765_vm1, %v2006_v33 }
 0x5b4   : > { %3739 = vmatpush3.xpose.msk.msra.mxu1 %vm765_vm1, %v2006_v33 }
 0x5b5   : > { %3740 = vmatprep.subr.msk.mxu1 %vm765_vm1, %v2004_v34 }
 0x5b8   : > { %3741 = vmatpush3.xpose.msk.msra.mxu1 %vm765_vm1, %v2004_v34 }
 0x5b9   : > { %3742 = vmatprep.subr.msk.mxu1 %vm765_vm1, %v2002_v29 }
 0x5bc   : > { %3743 = vmatpush3.xpose.msk.msra.mxu1 %vm765_vm1, %v2002_v29 }
 0x5bd   : > { %3744 = vmatprep.subr.msk.mxu1 %vm765_vm1, %v2000_v31 }
 0x5c0   : > { %3745 = vmatpush3.xpose.msk.msra.mxu1 %vm765_vm1, %v2000_v31 }
 0x5c6   : > { %v1748_v52 = vpop.xlane.xlu0 %1747 }
 0x5c7   : > { %v1766_v42 = vsub.f32 %v4630_v7, %v1748_v52 }
 0x5c8   : > { %v1751_v0 = vpop.xlane.xlu1 %1750 }
 0x5c9   : > { %v1776_v1 = vmul.f32 1.442695, %v1766_v42  ;;  %v1767_v22 = vsub.f32 %v4628_v5, %v1751_v0 }
 0x5ca   : > { %v1754_v44 = vpop.xlane.xlu0 %1753 }
 0x5cb   : > { %3934 = vpow2.f32 %v1776_v1  ;;  %v1778_v46 = vmul.f32 1.442695, %v1767_v22  ;;  %v1768_v49 = vsub.f32 %v4634_v21, %v1754_v44 }
 0x5cc   : > { %v1757_v50 = vpop.xlane.xlu1 %1756 }
 0x5cd   : > { %3936 = vpow2.f32 %v1778_v46  ;;  %v1780_v62 = vmul.f32 1.442695, %v1768_v49  ;;  %v1769_v26 = vsub.f32 %v4632_v20, %v1757_v50 }
 0x5ce   : > { %v1760_v28 = vpop.xlane.xlu0 %1759 }
 0x5cf   : > { %3938 = vpow2.f32 %v1780_v62  ;;  %v1782_v33 = vmul.f32 1.442695, %v1769_v26  ;;  %v1770_v34 = vsub.f32 %v4644_v47, %v1760_v28 }
 0x5d0   : > { %v1763_v7 = vpop.xlane.xlu1 %1762 }
 0x5d1   : > { %3940 = vpow2.f32 %v1782_v33  ;;  %v1784_v35 = vmul.f32 1.442695, %v1770_v34  ;;  %v1771_v5 = vsub.f32 %v4638_v23, %v1763_v7 }
 0x5d2   : > { %v1998_v36 = vpop.permute.xlu0 %1997 }
 0x5d3   : > { %3942 = vpow2.f32 %v1784_v35  ;;  %v1786_v37 = vmul.f32 1.442695, %v1771_v5  ;;  %3746 = vmatprep.subr.msk.mxu1 %vm765_vm1, %v1998_v36 }
 0x5d4   : > { %3747 = vmatpush3.xpose.msk.msra.mxu1 %vm765_vm1, %v1998_v36  ;;  %v1982_v21 = vpop.permute.xlu1 %1981 }
 0x5d5   : > { %3944 = vpow2.f32 %v1786_v37 }
 0x5d6   : > { %v1984_v20 = vpop.permute.xlu0 %1983 }
 0x5d8   : > { %v4712_v30 = vpop.eup %3934  ;;  %v1986_v38 = vpop.permute.xlu1 %1985 }
 0x5d9   : > { %3723 = vmatprep.mubr.msk.f32.mxu1 %vm919_vm2, %v4712_v30 }
 0x5da   : > { %v4716_v47 = vpop.eup %3936  ;;  %v1988_v39 = vpop.permute.xlu0 %1987 }
 0x5db   : > { %3724 = vmatmul.mubr.msk.f32.gmra.mxu1 %vm919_vm2, %v4716_v47 }
 0x5dc   : > { %v4720_v23 = vpop.eup %3938  ;;  %v1990_v29 = vpop.permute.xlu1 %1989 }
 0x5dd   : > { %3726 = vmatprep.mubr.msk.f32.mxu1 %vm919_vm2, %v4720_v23 }
 0x5de   : > { %v4724_v31 = vpop.eup %3940  ;;  %v1992_v52 = vpop.permute.xlu0 %1991 }
 0x5df   : > { %3727 = vmatmul.mubr.msk.f32.gmra.mxu1 %vm919_vm2, %v4724_v31 }
 0x5e0   : > { %v4728_v42 = vpop.eup %3942  ;;  %v1994_v0 = vpop.permute.xlu1 %1993 }
 0x5e1   : > { %3729 = vmatprep.mubr.msk.f32.mxu1 %vm919_vm2, %v4728_v42 }
 0x5e2   : > { %v4732_v1 = vpop.eup %3944  ;;  %v1996_v22 = vpop.permute.xlu0 %1995 }
 0x5e3   : > { %3730 = vmatmul.mubr.msk.f32.gmra.mxu1 %vm919_vm2, %v4732_v1 }
 0x5e4   : > { %3748 = vmatprep.mubr.msk.f32.mxu1 %vm765_vm1, %v1982_v21  ;;  %v2243_v44 = vpop.permute.xlu1 %2242 }
 0x5e6   : > { %v2245_v46 = vpop.permute.xlu0 %2244 }
 0x5e7   : > { %3749 = vmatmul.mubr.msk.f32.vlgmr.msra.gmra.mxu1 %vm765_vm1, %v1984_v20  ;;  %3760 = vmatprep.subr.mxu0 %v2245_v46 }
 0x5e8   : > { %3848 = vmatprep.subr.mxu1 %v2245_v46  ;;  %3751 = vmatprep.mubr.msk.f32.mxu1 %vm765_vm1, %v1986_v38  ;;  %v2241_v49 = vpop.permute.xlu1 %2240 }
 0x5e9   : > { %3761 = vmatpush3.msra.mxu0 %v2245_v46  ;;  %3856 = vmatpush3.msra.mxu1 %v2245_v46 }
 0x5ea   : > { %3762 = vmatprep.subr.mxu0 %v2243_v44  ;;  %3849 = vmatprep.subr.mxu1 %v2243_v44  ;;  %v2239_v50 = vpop.permute.xlu0 %2238 }
 0x5eb   : > { %3763 = vmatpush3.msra.mxu0 %v2243_v44  ;;  %3857 = vmatpush3.msra.mxu1 %v2243_v44 }
 0x5ec   : > { %3752 = vmatmul.mubr.msk.f32.gmra.mxu1 %vm765_vm1, %v1988_v39  ;;  %3764 = vmatprep.subr.mxu0 %v2241_v49  ;;  %v2237_v62 = vpop.permute.xlu1 %2236 }
 0x5ed   : > { %3850 = vmatprep.subr.mxu1 %v2241_v49  ;;  %3754 = vmatprep.mubr.msk.f32.mxu1 %vm765_vm1, %v1990_v29 }
 0x5ee   : > { %3765 = vmatpush3.msra.mxu0 %v2241_v49  ;;  %3858 = vmatpush3.msra.mxu1 %v2241_v49  ;;  %v2235_v26 = vpop.permute.xlu0 %2234 }
 0x5ef   : > { %3766 = vmatprep.subr.mxu0 %v2239_v50  ;;  %3851 = vmatprep.subr.mxu1 %v2239_v50 }
 0x5f0   : > { %3767 = vmatpush3.msra.mxu0 %v2239_v50  ;;  %3859 = vmatpush3.msra.mxu1 %v2239_v50 }
 0x5f1   : > { %3755 = vmatmul.mubr.msk.f32.gmra.mxu1 %vm765_vm1, %v1992_v52  ;;  %3768 = vmatprep.subr.mxu0 %v2237_v62 }
 0x5f2   : > { %3852 = vmatprep.subr.mxu1 %v2237_v62  ;;  %3757 = vmatprep.mubr.msk.f32.mxu1 %vm765_vm1, %v1994_v0 }
 0x5f3   : > { %3769 = vmatpush3.msra.mxu0 %v2237_v62  ;;  %3860 = vmatpush3.msra.mxu1 %v2237_v62 }
 0x5f4   : > { %3770 = vmatprep.subr.mxu0 %v2235_v26  ;;  %3853 = vmatprep.subr.mxu1 %v2235_v26 }
 0x5f5   : > { %3771 = vmatpush3.msra.mxu0 %v2235_v26  ;;  %3861 = vmatpush3.msra.mxu1 %v2235_v26 }
 0x5f6   : > { %3758 = vmatmul.mubr.msk.f32.gmra.mxu1 %vm765_vm1, %v1996_v22 }
 0x667   : > { %v4744_v28 = vpop.f32.mrf.mxu1 }
 0x669   : > { %v4746_v33 = vpop.f32.mrf.mxu1 }
 0x69b   : > { %v4748_v34 = vpop.f32.mrf.mxu1 }
 0x69d   : > { %v4750_v7 = vpop.f32.mrf.mxu1 }
 0x69f   : > { %v4752_v35 = vpop.f32.mrf.mxu1 }
 0x6a1   : > { %v4754_v5 = vpop.f32.mrf.mxu1 }
 0x6a3   : > { %v4756_v36 = vpop.f32.mrf.mxu1 }
 0x6a5   : > { %v4758_v37 = vpop.f32.mrf.mxu1 }
 0x6a7   : > { %v4760_v21 = vpop.f32.mrf.mxu1 }
 0x6a8   : > { %v2153_v20 = vsel %vm919_vm2, %v4760_v21, -inf }
 0x6a9   : > { %2154 = vmax.xlane.f32.xlu0 %v2153_v20  ;;  %v4764_v38 = vpop.f32.mrf.mxu1 }
 0x6aa   : > { %v2150_v39 = vsel %vm919_vm2, %v4764_v38, -inf }
 0x6ab   : > { %2151 = vmax.xlane.f32.xlu1 %v2150_v39 }
 0x6ac   : > { %v4768_v29 = vpop.f32.mrf.mxu1 }
 0x6ad   : > { %v2159_v0 = vsel %vm919_vm2, %v4768_v29, -inf }
 0x6ae   : > { %v4770_v52 = vpop.f32.mrf.mxu1 }
 0x6af   : > { %2160 = vmax.xlane.f32.xlu1 %v2159_v0  ;;  %v2156_v22 = vsel %vm919_vm2, %v4770_v52, -inf  ;;  %v1378_v0 = vsel %vm919_vm2, %v4540_v3, 0.0  ;;  %v1797_v3 = vsel %vm919_vm2, %v4716_v47, 0.0  ;;  %v1806_v47 = vsel %vm919_vm2, %v4728_v42, 0.0 }
 0x6b0   : > { %2157 = vmax.xlane.f32.xlu0 %v2156_v22  ;;  %v1381_v22 = vsel %vm919_vm2, %v4542_v4, 0.0  ;;  %v1794_v4 = vsel %vm919_vm2, %v4712_v30, 0.0  ;;  %v1399_v30 = vsel %vm919_vm2, %v4590_v8, 0.0  ;;  %v968_v8 = vsel %vm919_vm2, %v4394_v16, 0.0 }
 0x6b1   : > { %v4776_v44 = vpop.f32.mrf.mxu1 }
 0x6b2   : > { %v2165_v46 = vsel %vm919_vm2, %v4776_v44, -inf }
 0x6b3   : > { %v4780_v49 = vpop.f32.mrf.mxu1  ;;  %2166 = vmax.xlane.f32.xlu1 %v2165_v46  ;;  %v1791_v46 = vsel %vm919_vm2, %v4684_v27, 0.0  ;;  %v1800_v27 = vsel %vm919_vm2, %v4720_v23, 0.0  ;;  %v971_v23 = vsel %vm919_vm2, %v4396_v17, 0.0 }
 0x6b4   : > { %v2162_v50 = vsel %vm919_vm2, %v4780_v49, -inf }
 0x6b5   : > { %2163 = vmax.xlane.f32.xlu0 %v2162_v50  ;;  %v1788_v50 = vsel %vm919_vm2, %v4682_v32, 0.0  ;;  %v1393_v32 = vsel %vm919_vm2, %v4582_v2, 0.0  ;;  %v1396_v2 = vsel %vm919_vm2, %v4586_v6, 0.0 }
 0x6b6   : > { %v4784_v62 = vpop.f32.mrf.mxu1 }
 0x6b7   : > { %v2171_v26 = vsel %vm919_vm2, %v4784_v62, -inf }
 0x6b8   : > { %v4788_v20 = vpop.f32.mrf.mxu1  ;;  %2172 = vmax.xlane.f32.xlu1 %v2171_v26 }
 0x6b9   : > { %v2168_v39 = vsel %vm919_vm2, %v4788_v20, -inf }
 0x6ba   : > { %2169 = vmax.xlane.f32.xlu0 %v2168_v39 }
 0x6c9   : > { %2232 = vrot.lane.b32.xlu1 %v4224_v24, %s4072_s15  ;;  %v1387_v24 = vsel %vm919_vm2, %v4574_v48, 0.0  ;;  %v1390_v48 = vsel %vm919_vm2, %v4578_v45, 0.0  ;;  %v1809_v45 = vsel %vm919_vm2, %v4732_v1, 0.0 }
 0x6d0   : > { %2230 = vrot.lane.b32.xlu0 %v4228_v25, %s4072_s15  ;;  %v1384_v25 = vsel %vm919_vm2, %v4570_v61, 0.0  ;;  %v1803_v61 = vsel %vm919_vm2, %v4724_v31, 0.0 }
 0x6ed   : > { %1379 = vadd.xlane.f32.xlu1 %v1378_v0 }
 0x6ef   : > { %1382 = vadd.xlane.f32.xlu0 %v1381_v22 }
 0x6f1   : > { %1792 = vadd.xlane.f32.xlu1 %v1791_v46 }
 0x6f3   : > { %1789 = vadd.xlane.f32.xlu0 %v1788_v50 }
 0x6f5   : > { %1388 = vadd.xlane.f32.xlu1 %v1387_v24 }
 0x6f7   : > { %1385 = vadd.xlane.f32.xlu0 %v1384_v25 }
 0x6f9   : > { %1798 = vadd.xlane.f32.xlu1 %v1797_v3 }
 0x6fb   : > { %1795 = vadd.xlane.f32.xlu0 %v1794_v4 }
 0x6fd   : > { %1394 = vadd.xlane.f32.xlu1 %v1393_v32 }
 0x6ff   : > { %1391 = vadd.xlane.f32.xlu0 %v1390_v48 }
 0x701   : > { %1804 = vadd.xlane.f32.xlu1 %v1803_v61 }
 0x703   : > { %1801 = vadd.xlane.f32.xlu0 %v1800_v27 }
 0x705   : > { %1400 = vadd.xlane.f32.xlu1 %v1399_v30 }
 0x707   : > { %1397 = vadd.xlane.f32.xlu0 %v1396_v2 }
 0x709   : > { %1810 = vadd.xlane.f32.xlu1 %v1809_v45 }
 0x70b   : > { %1807 = vadd.xlane.f32.xlu0 %v1806_v47 }
 0x70d   : > { %972 = vadd.xlane.f32.xlu1 %v971_v23 }
 0x70f   : > { %969 = vadd.xlane.f32.xlu0 %v968_v8 }
 0x732   : > { %v2155_v31 = vpop.xlane.xlu0 %2154 }
 0x733   : > { %v2175_v6 = vsub.f32 %v4760_v21, %v2155_v31 }
 0x734   : > { %v2152_v26 = vpop.xlane.xlu1 %2151 }
 0x735   : > { %v2184_v39 = vmul.f32 1.442695, %v2175_v6  ;;  %v2174_v1 = vsub.f32 %v4764_v38, %v2152_v26 }
 0x737   : > { %3946 = vpow2.f32 %v2184_v39  ;;  %v2182_v0 = vmul.f32 1.442695, %v2174_v1 }
 0x738   : > { %v2161_v22 = vpop.xlane.xlu1 %2160 }
 0x739   : > { %3948 = vpow2.f32 %v2182_v0  ;;  %v2158_v42 = vpop.xlane.xlu0 %2157  ;;  %v2177_v46 = vsub.f32 %v4768_v29, %v2161_v22 }
 0x73a   : > { %v2176_v17 = vsub.f32 %v4770_v52, %v2158_v42 }
 0x73b   : > { %v2188_v50 = vmul.f32 1.442695, %v2177_v46  ;;  %v977_v46 = vsel %vm919_vm2, %v4426_v56, 0.0  ;;  %v986_v56 = vsel %vm919_vm2, %v4436_v60, 0.0 }
 0x73c   : > { %v2186_v24 = vmul.f32 1.442695, %v2176_v17  ;;  %v2167_v16 = vpop.xlane.xlu1 %2166  ;;  %v974_v17 = vsel %vm919_vm2, %v4400_v18, 0.0 }
 0x73d   : > { %3950 = vpow2.f32 %v2188_v50  ;;  %v2179_v25 = vsub.f32 %v4776_v44, %v2167_v16  ;;  %v983_v50 = vsel %vm919_vm2, %v4434_v59, 0.0  ;;  %v989_v16 = vsel %vm919_vm2, %v4442_v63, 0.0 }
 0x73e   : > { %3952 = vpow2.f32 %v2186_v24  ;;  %v2164_v21 = vpop.xlane.xlu0 %2163  ;;  %v980_v24 = vsel %vm919_vm2, %v4428_v57, 0.0 }
 0x73f   : > { %v2178_v3 = vsub.f32 %v4780_v49, %v2164_v21  ;;  %v2192_v38 = vmul.f32 1.442695, %v2179_v25 }
 0x741   : > { %v2190_v4 = vmul.f32 1.442695, %v2178_v3  ;;  %3954 = vpow2.f32 %v2192_v38  ;;  %v2173_v32 = vpop.xlane.xlu1 %2172 }
 0x742   : > { %v2181_v48 = vsub.f32 %v4784_v62, %v2173_v32 }
 0x743   : > { %3956 = vpow2.f32 %v2190_v4  ;;  %v2170_v29 = vpop.xlane.xlu0 %2169 }
 0x744   : > { %v3947_v61 = vpop.eup %3946  ;;  %v2180_v52 = vsub.f32 %v4788_v20, %v2170_v29  ;;  %v2196_v27 = vmul.f32 1.442695, %v2181_v48 }
 0x745   : > { %v2233_v30 = vpop.permute.xlu1 %2232  ;;  %v2201_v2 = vsel %vm919_vm2, %v3947_v61, 0.0 }
 0x746   : > { %v3949_v44 = vpop.eup %3948  ;;  %v2194_v45 = vmul.f32 1.442695, %v2180_v52  ;;  %3958 = vpow2.f32 %v2196_v27  ;;  %3772 = vmatprep.subr.mxu0 %v2233_v30  ;;  %3854 = vmatprep.subr.mxu1 %v2233_v30 }
 0x747   : > { %v2231_v49 = vpop.permute.xlu0 %2230  ;;  %2202 = vadd.xlane.f32.xlu1 %v2201_v2  ;;  %3773 = vmatpush3.msra.mxu0 %v2233_v30  ;;  %v2198_v47 = vsel %vm919_vm2, %v3949_v44, 0.0 }
 0x748   : > { %3960 = vpow2.f32 %v2194_v45  ;;  %3862 = vmatpush3.msra.mxu1 %v2233_v30  ;;  %3774 = vmatprep.subr.mxu0 %v2231_v49 }
 0x749   : > { %3855 = vmatprep.subr.mxu1 %v2231_v49  ;;  %3776 = vmatprep.mubr.msk.f32.mxu0 %vm919_vm2, %v3949_v44 }
 0x74a   : > { %v3951_v62 = vpop.eup %3950  ;;  %2199 = vadd.xlane.f32.xlu0 %v2198_v47  ;;  %3775 = vmatpush3.msra.mxu0 %v2231_v49 }
 0x74b   : > { %v3953_v20 = vpop.eup %3952  ;;  %3863 = vmatpush3.msra.mxu1 %v2231_v49  ;;  %3777 = vmatmul.mubr.msk.f32.vlgmr.msra.gmra.mxu0 %vm919_vm2, %v3947_v61  ;;  %v2207_v23 = vsel %vm919_vm2, %v3951_v62, 0.0 }
 0x74c   : > { %3779 = vmatprep.mubr.msk.f32.mxu0 %vm919_vm2, %v3953_v20  ;;  %v2204_v8 = vsel %vm919_vm2, %v3953_v20, 0.0  ;;  %2208 = vadd.xlane.f32.xlu1 %v2207_v23 }
 0x74e   : > { %v3955_v31 = vpop.eup %3954  ;;  %2205 = vadd.xlane.f32.xlu0 %v2204_v8 }
 0x74f   : > { %3780 = vmatmul.mubr.msk.f32.gmra.mxu0 %vm919_vm2, %v3951_v62  ;;  %v2213_v6 = vsel %vm919_vm2, %v3955_v31, 0.0 }
 0x750   : > { %v3957_v26 = vpop.eup %3956  ;;  %2214 = vadd.xlane.f32.xlu1 %v2213_v6 }
 0x751   : > { %3782 = vmatprep.mubr.msk.f32.mxu1 %vm919_vm2, %v3957_v26  ;;  %v2210_v39 = vsel %vm919_vm2, %v3957_v26, 0.0 }
 0x752   : > { %2211 = vadd.xlane.f32.xlu0 %v2210_v39  ;;  %3783 = vmatmul.mubr.msk.f32.vlgmr.msra.gmra.mxu1 %vm919_vm2, %v3955_v31 }
 0x753   : > { %v3959_v1 = vpop.eup %3958 }
 0x754   : > { %v2219_v0 = vsel %vm919_vm2, %v3959_v1, 0.0 }
 0x755   : > { %v3961_v22 = vpop.eup %3960  ;;  %2220 = vadd.xlane.f32.xlu1 %v2219_v0 }
 0x756   : > { %3785 = vmatprep.mubr.msk.f32.mxu1 %vm919_vm2, %v3961_v22  ;;  %v2216_v42 = vsel %vm919_vm2, %v3961_v22, 0.0 }
 0x757   : > { %2217 = vadd.xlane.f32.xlu0 %v2216_v42  ;;  %3786 = vmatmul.mubr.msk.f32.gmra.mxu1 %vm919_vm2, %v3959_v1 }
 0x759   : > { %978 = vadd.xlane.f32.xlu1 %v977_v46 }
 0x75b   : > { %975 = vadd.xlane.f32.xlu0 %v974_v17 }
 0x75d   : > { %984 = vadd.xlane.f32.xlu1 %v983_v50 }
 0x75f   : > { %981 = vadd.xlane.f32.xlu0 %v980_v24 }
 0x761   : > { %990 = vadd.xlane.f32.xlu1 %v989_v16 }
 0x763   : > { %987 = vadd.xlane.f32.xlu0 %v986_v56 }
 0x776   : > { %v1380_v25 = vpop.xlane.xlu1 %1379 }
 0x777   : > { %3962 = vrcp.f32 %v1380_v25 }
 0x778   : > { %v1383_v18 = vpop.xlane.xlu0 %1382 }
 0x779   : > { %3964 = vrcp.f32 %v1383_v18 }
 0x77a   : > { %v1793_v21 = vpop.xlane.xlu1 %1792 }
 0x77b   : > { %3966 = vrcp.f32 %v1793_v21 }
 0x77c   : > { %v1790_v59 = vpop.xlane.xlu0 %1789 }
 0x77d   : > { %3968 = vrcp.f32 %v1790_v59  ;;  %v2513_v59 = vld [vmem:[%s5141_s5] sm:$0xff] }
 0x77e   : > { %v1389_v3 = vpop.xlane.xlu1 %1388 }
 0x77f   : > { %3970 = vrcp.f32 %v1389_v3 }
 0x780   : > { %v1386_v57 = vpop.xlane.xlu0 %1385 }
 0x781   : > { %3972 = vrcp.f32 %v1386_v57 }
 0x782   : > { %v1799_v38 = vpop.xlane.xlu1 %1798 }
 0x783   : > { %3974 = vrcp.f32 %v1799_v38 }
 0x784   : > { %v3963_v63 = vpop.eup %3962  ;;  %v1796_v4 = vpop.xlane.xlu0 %1795 }
 0x785   : > { %3976 = vrcp.f32 %v1796_v4  ;;  %v1563_v60 = vmul.f32 %v3963_v63, %v4608_v51 }
 0x786   : > { %v3965_v32 = vpop.eup %3964  ;;  %v1395_v48 = vpop.xlane.xlu1 %1394 }
 0x787   : > { %3978 = vrcp.f32 %v1395_v48  ;;  %v1564_v29 = vmul.f32 %v3965_v32, %v4606_v53  ;;  %2399 = vrot.lane.b32.xlu0 %v1563_v60, %s4073_s21 }
 0x788   : > { %v3967_v61 = vpop.eup %3966  ;;  %v1392_v52 = vpop.xlane.xlu0 %1391 }
 0x789   : > { %3980 = vrcp.f32 %v1392_v52  ;;  %2401 = vrot.lane.b32.xlu1 %v1564_v29, %s4073_s21  ;;  %v1974_v27 = vmul.f32 %v3967_v61, %v4744_v28 }
 0x78a   : > { %v3969_v30 = vpop.eup %3968  ;;  %v1805_v2 = vpop.xlane.xlu1 %1804 }
 0x78b   : > { %3982 = vrcp.f32 %v1805_v2  ;;  %v1973_v51 = vmul.f32 %v3969_v30, %v4746_v33  ;;  %2433 = vrot.lane.b32.xlu0 %v1974_v27, %s4074_s22 }
 0x78c   : > { %v3971_v44 = vpop.eup %3970  ;;  %v1802_v53 = vpop.xlane.xlu0 %1801 }
 0x78d   : > { %3984 = vrcp.f32 %v1802_v53  ;;  %2431 = vrot.lane.b32.xlu1 %v1973_v51, %s4074_s22  ;;  %v1566_v45 = vmul.f32 %v3971_v44, %v4610_v41 }
 0x78e   : > { %v3973_v49 = vpop.eup %3972  ;;  %v1401_v47 = vpop.xlane.xlu1 %1400 }
 0x78f   : > { %3986 = vrcp.f32 %v1401_v47  ;;  %v1565_v28 = vmul.f32 %v3973_v49, %v4612_v54  ;;  %2405 = vrot.lane.b32.xlu0 %v1566_v45, %s4073_s21 }
 0x790   : > { %v3975_v62 = vpop.eup %3974  ;;  %v1398_v20 = vpop.xlane.xlu0 %1397 }
 0x791   : > { %3988 = vrcp.f32 %v1398_v20  ;;  %2403 = vrot.lane.b32.xlu1 %v1565_v28, %s4073_s21  ;;  %v1976_v33 = vmul.f32 %v3975_v62, %v4748_v34 }
 0x792   : > { %v3977_v23 = vpop.eup %3976  ;;  %v1811_v8 = vpop.xlane.xlu1 %1810 }
 0x793   : > { %3990 = vrcp.f32 %v1811_v8  ;;  %v1975_v31 = vmul.f32 %v3977_v23, %v4750_v7  ;;  %2437 = vrot.lane.b32.xlu0 %v1976_v33, %s4074_s22 }
 0x794   : > { %v3979_v41 = vpop.eup %3978  ;;  %v1808_v6 = vpop.xlane.xlu0 %1807 }
 0x795   : > { %3992 = vrcp.f32 %v1808_v6  ;;  %2435 = vrot.lane.b32.xlu1 %v1975_v31, %s4074_s22  ;;  %v1568_v54 = vmul.f32 %v3979_v41, %v4614_v40  ;;  %v2516_v40 = vld [vmem:[%s5141_s5 + $0x18] sm:$0xff] }
 0x796   : > { %v3981_v26 = vpop.eup %3980  ;;  %3788 = vmatprep.subr.mxu0 %v2516_v40  ;;  %v4908_v16 = vpop.xlane.xlu1 %972 }
 0x797   : > { %v1567_v39 = vmul.f32 %v3981_v26, %v4616_v55  ;;  %2409 = vrot.lane.b32.xlu0 %v1568_v54, %s4073_s21  ;;  %v2515_v55 = vld [vmem:[%s5141_s5 + $0x10] sm:$0xff]  ;;  %3789 = vmatpush3.msra.mxu0 %v2516_v40 }
 0x798   : > { %v3983_v34 = vpop.eup %3982  ;;  %3790 = vmatprep.subr.mxu0 %v2515_v55 }
 0x799   : > { %2407 = vrot.lane.b32.xlu1 %v1567_v39, %s4073_s21  ;;  %v1978_v1 = vmul.f32 %v3983_v34, %v4752_v35  ;;  %3791 = vmatpush3.msra.mxu0 %v2515_v55 }
 0x79a   : > { %v3985_v7 = vpop.eup %3984 }
 0x79b   : > { %v1977_v0 = vmul.f32 %v3985_v7, %v4754_v5  ;;  %2441 = vrot.lane.b32.xlu0 %v1978_v1, %s4074_s22 }
 0x79c   : > { %v3987_v22 = vpop.eup %3986 }
 0x79d   : > { %2439 = vrot.lane.b32.xlu1 %v1977_v0, %s4074_s22  ;;  %v1570_v42 = vmul.f32 %v3987_v22, %v4618_v58  ;;  %v4906_v58 = vpop.xlane.xlu0 %969 }
 0x79e   : > { %v3989_v35 = vpop.eup %3988 }
 0x79f   : > { %v1569_v5 = vmul.f32 %v3989_v35, %v4620_v43  ;;  %2413 = vrot.lane.b32.xlu0 %v1570_v42, %s4073_s21 }
 0x7a0   : > { %v3991_v46 = vpop.eup %3990 }
 0x7a1   : > { %2411 = vrot.lane.b32.xlu1 %v1569_v5, %s4073_s21  ;;  %v1980_v17 = vmul.f32 %v3991_v46, %v4756_v36  ;;  %v2514_v36 = vld [vmem:[%s5141_s5 + $0x8] sm:$0xff] }
 0x7a2   : > { %v3993_v50 = vpop.eup %3992  ;;  %3792 = vmatprep.subr.mxu0 %v2514_v36 }
 0x7a3   : > { %v1979_v24 = vmul.f32 %v3993_v50, %v4758_v37  ;;  %2445 = vrot.lane.b32.xlu0 %v1980_v17, %s4074_s22  ;;  %3793 = vmatpush3.msra.mxu0 %v2514_v36 }
 0x7a4   : > { %3794 = vmatprep.subr.mxu0 %v2513_v59 }
 0x7a5   : > { %2443 = vrot.lane.b32.xlu1 %v1979_v24, %s4074_s22  ;;  %3795 = vmatpush3.msra.mxu0 %v2513_v59 }
 0x7d0   : > { %v2203_v43 = vpop.xlane.xlu1 %2202 }
 0x7d1   : > { %3994 = vrcp.f32 %v2203_v43 }
 0x7d3   : > { %v2200_v56 = vpop.xlane.xlu0 %2199 }
 0x7d4   : > { %3996 = vrcp.f32 %v2200_v56 }
 0x7d5   : > { %v2209_v25 = vpop.xlane.xlu1 %2208 }
 0x7d6   : > { %3998 = vrcp.f32 %v2209_v25 }
 0x7d7   : > { %v2206_v18 = vpop.xlane.xlu0 %2205 }
 0x7d8   : > { %4000 = vrcp.f32 %v2206_v18 }
 0x7d9   : > { %v2215_v21 = vpop.xlane.xlu1 %2214 }
 0x7da   : > { %4002 = vrcp.f32 %v2215_v21 }
 0x7db   : > { %v2212_v37 = vpop.xlane.xlu0 %2211 }
 0x7dc   : > { %4004 = vrcp.f32 %v2212_v37 }
 0x7de   : > { %v2221_v3 = vpop.xlane.xlu1 %2220  ;;  %v3995_v38 = vpop.eup %3994 }
 0x7df   : > { %4006 = vrcp.f32 %v2221_v3 }
 0x7e0   : > { %v2218_v57 = vpop.xlane.xlu0 %2217 }
 0x7e1   : > { %4008 = vrcp.f32 %v2218_v57  ;;  %v3997_v60 = vpop.eup %3996 }
 0x7e2   : > { %v979_v41 = vpop.xlane.xlu1 %978  ;;  %4010 = vrcp.f32 %v4906_v58 }
 0x7e3   : > { %v3999_v29 = vpop.eup %3998  ;;  %4012 = vrcp.f32 %v4908_v16 }
 0x7e4   : > { %v976_v31 = vpop.xlane.xlu0 %975 }
 0x7e5   : > { %v4001_v27 = vpop.eup %4000  ;;  %4014 = vrcp.f32 %v976_v31 }
 0x7e6   : > { %v985_v54 = vpop.xlane.xlu1 %984  ;;  %4016 = vrcp.f32 %v979_v41 }
 0x7e7   : > { %v4003_v2 = vpop.eup %4002 }
 0x7e8   : > { %v982_v6 = vpop.xlane.xlu0 %981 }
 0x7e9   : > { %v4005_v45 = vpop.eup %4004  ;;  %4018 = vrcp.f32 %v982_v6 }
 0x7ea   : > { %v991_v39 = vpop.xlane.xlu1 %990  ;;  %4020 = vrcp.f32 %v985_v54 }
 0x7ec   : > { %v4007_v28 = vpop.eup %4006  ;;  %v988_v26 = vpop.xlane.xlu0 %987 }
 0x7ed   : > { %4022 = vrcp.f32 %v988_v26 }
 0x7ee   : > { %v4009_v33 = vpop.eup %4008  ;;  %4024 = vrcp.f32 %v991_v39 }
 0x7ef   : > { %v4011_v43 = vpop.eup %4010 }
 0x7f0   : > { %v4013_v25 = vpop.eup %4012  ;;  %v1153_v21 = vmul.f32 %v4011_v43, %v4460_v10 }
 0x7f1   : > { %v1154_v16 = vmul.f32 %v4013_v25, %v4458_v9 }
 0x7f2   : > { %v4015_v58 = vpop.eup %4014 }
 0x7f3   : > { %v4017_v37 = vpop.eup %4016 }
 0x7f9   : > { %v2400_v34 = vpop.permute.xlu0 %2399 }
 0x7fa   : > { %v2487_v59 = vsel %vm765_vm1, %v1153_v21, %v2400_v34  ;;  %v2728_v34 = vld [vmem:[%s5143_s7 + $0x18] sm:$0xff] }
 0x7fb   : > { %v2402_v1 = vpop.permute.xlu1 %2401  ;;  %3808 = vmatprep.subr.mxu1 %v2728_v34 }
 0x7fc   : > { %v2488_v3 = vsel %vm765_vm1, %v1154_v16, %v2402_v1  ;;  %v2727_v1 = vld [vmem:[%s5143_s7 + $0x10] sm:$0xff]  ;;  %3809 = vmatpush3.msra.mxu1 %v2728_v34 }
 0x7fd   : > { %v2434_v7 = vpop.permute.xlu0 %2433  ;;  %3810 = vmatprep.subr.mxu1 %v2727_v1 }
 0x7fe   : > { %3811 = vmatpush3.msra.mxu1 %v2727_v1 }
 0x7ff   : > { %v2432_v0 = vpop.permute.xlu1 %2431 }
 0x800   : > { %v2496_v57 = vsel %vm2495_vm3, %v2487_v59, %v2432_v0  ;;  %v2725_v0 = vld [vmem:[%s5143_s7] sm:$0xff] }
 0x801   : > { %v2406_v22 = vpop.permute.xlu0 %2405 }
 0x803   : > { %v2404_v40 = vpop.permute.xlu1 %2403 }
 0x805   : > { %v2438_v55 = vpop.permute.xlu0 %2437 }
 0x807   : > { %v2436_v42 = vpop.permute.xlu1 %2435 }
 0x809   : > { %v2410_v35 = vpop.permute.xlu0 %2409 }
 0x80b   : > { %v3778_v63 = vpop.f32.mrf.mxu0  ;;  %v2408_v5 = vpop.permute.xlu1 %2407 }
 0x80c   : > { %v2384_v4 = vmul.f32 %v3995_v38, %v3778_v63  ;;  %v2497_v63 = vsel %vm2495_vm3, %v2488_v3, %v2434_v7  ;;  %v2726_v7 = vld [vmem:[%s5143_s7 + $0x8] sm:$0xff] }
 0x80d   : > { %v2344_v32 = vpop.f32.mrf.mxu0  ;;  %v2442_v46 = vpop.permute.xlu0 %2441  ;;  %3812 = vmatprep.subr.mxu1 %v2726_v7 }
 0x80e   : > { %v2383_v48 = vmul.f32 %v3997_v60, %v2344_v32  ;;  %2465 = vrot.lane.b32.xlu0 %v2384_v4, %s4075_s12  ;;  %v1155_v4 = vmul.f32 %v4015_v58, %v4464_v12  ;;  %v4019_v60 = vpop.eup %4018  ;;  %v1156_v32 = vmul.f32 %v4017_v37, %v4462_v11  ;;  %3813 = vmatpush3.msra.mxu1 %v2726_v7 }
 0x80f   : > { %v3781_v61 = vpop.f32.mrf.mxu0  ;;  %v2440_v17 = vpop.permute.xlu1 %2439  ;;  %3814 = vmatprep.subr.mxu1 %v2725_v0 }
 0x810   : > { %v2386_v52 = vmul.f32 %v3999_v29, %v3781_v61  ;;  %2463 = vrot.lane.b32.xlu1 %v2383_v48, %s4075_s12  ;;  %v4021_v29 = vpop.eup %4020  ;;  %v2489_v61 = vsel %vm765_vm1, %v1155_v4, %v2404_v40  ;;  %3815 = vmatpush3.msra.mxu1 %v2725_v0  ;;  %v2867_v40 = vld [vmem:[%s5145_s9 + $0x10] sm:$0xff] }
 0x811   : > { %v2354_v30 = vpop.f32.mrf.mxu0  ;;  %v2414_v50 = vpop.permute.xlu0 %2413 }
 0x812   : > { %v2385_v51 = vmul.f32 %v4001_v27, %v2354_v30  ;;  %v3784_v44 = vpop.f32.mrf.mxu1  ;;  %2469 = vrot.lane.b32.xlu0 %v2386_v52, %s4075_s12  ;;  %v2490_v52 = vsel %vm765_vm1, %v1156_v32, %v2406_v22  ;;  %v2498_v27 = vsel %vm2495_vm3, %v2489_v61, %v2436_v42  ;;  %v2868_v22 = vld [vmem:[%s5145_s9 + $0x18] sm:$0xff]  ;;  %v2865_v42 = vld [vmem:[%s5145_s9] sm:$0xff] }
 0x813   : > { %v2388_v53 = vmul.f32 %v4003_v2, %v3784_v44  ;;  %v2412_v24 = vpop.permute.xlu1 %2411  ;;  %v2499_v30 = vsel %vm2495_vm3, %v2490_v52, %v2438_v55  ;;  %v1157_v2 = vmul.f32 %v4019_v60, %v4468_v14  ;;  %v1158_v44 = vmul.f32 %v4021_v29, %v4466_v13  ;;  %3828 = vmatprep.subr.mxu0 %v2868_v22  ;;  %v2866_v55 = vld [vmem:[%s5145_s9 + $0x8] sm:$0xff] }
 0x814   : > { %v2364_v49 = vpop.f32.mrf.mxu1  ;;  %2467 = vrot.lane.b32.xlu1 %v2385_v51, %s4075_s12  ;;  %v4023_v51 = vpop.eup %4022 }
 0x815   : > { %v2387_v47 = vmul.f32 %v4005_v45, %v2364_v49  ;;  %v2446_v56 = vpop.permute.xlu0 %2445  ;;  %v4025_v49 = vpop.eup %4024 }
 0x816   : > { %2473 = vrot.lane.b32.xlu0 %v2388_v53, %s4075_s12 }
 0x817   : > { %v3787_v62 = vpop.f32.mrf.mxu1  ;;  %v2444_v18 = vpop.permute.xlu1 %2443 }
 0x818   : > { %v2390_v20 = vmul.f32 %v4007_v28, %v3787_v62  ;;  %2471 = vrot.lane.b32.xlu1 %v2387_v47, %s4075_s12  ;;  %v2491_v47 = vsel %vm765_vm1, %v1157_v2, %v2408_v5  ;;  %v2492_v28 = vsel %vm765_vm1, %v1158_v44, %v2410_v35  ;;  %v3303_v35 = vld [vmem:[%s5142_s6] ss:$0 sm:$0xff] }
 0x819   : > { %v2374_v23 = vpop.f32.mrf.mxu1  ;;  %v2500_v62 = vsel %vm2495_vm3, %v2491_v47, %v2440_v17 }
 0x81a   : > { %v2389_v8 = vmul.f32 %v4009_v33, %v2374_v23  ;;  %2477 = vrot.lane.b32.xlu0 %v2390_v20, %s4075_s12  ;;  %v2501_v20 = vsel %vm2495_vm3, %v2492_v28, %v2442_v46  ;;  %v1159_v33 = vmul.f32 %v4023_v51, %v4472_v19  ;;  %v1160_v23 = vmul.f32 %v4025_v49, %v4470_v15 }
 0x81c   : > { %2475 = vrot.lane.b32.xlu1 %v2389_v8, %s4075_s12  ;;  %v2493_v31 = vsel %vm765_vm1, %v1159_v33, %v2412_v24  ;;  %v2494_v6 = vsel %vm765_vm1, %v1160_v23, %v2414_v50 }
 0x81d   : > { %v2502_v54 = vsel %vm2495_vm3, %v2493_v31, %v2444_v18  ;;  %v2503_v19 = vsel %vm2495_vm3, %v2494_v6, %v2446_v56 }
 0x880   : > { %v2466_v36 = vpop.permute.xlu0 %2465 }
 0x881   : > { %v2506_v9 = vsel %vm2504_vm4, %v2497_v63, %v2466_v36 }
 0x882   : > { %v2464_v38 = vpop.permute.xlu1 %2463 }
 0x883   : > { %v2505_v10 = vsel %vm2504_vm4, %v2496_v57, %v2464_v38 }
 0x884   : > { %v2470_v48 = vpop.permute.xlu0 %2469  ;;  %3796 = vmatprep.mubr.msk.f32.mxu0 %vm502_vm0, %v2505_v10 }
 0x885   : > { %3797 = vmatmul.mubr.msk.f32.vlgmr.msra.gmra.mxu0 %vm502_vm0, %v2506_v9  ;;  %v2508_v53 = vsel %vm2504_vm4, %v2499_v30, %v2470_v48 }
 0x886   : > { %v2468_v12 = vpop.permute.xlu1 %2467  ;;  %3829 = vmatpush3.msra.mxu0 %v2868_v22 }
 0x887   : > { %v2507_v11 = vsel %vm2504_vm4, %v2498_v27, %v2468_v12  ;;  %3830 = vmatprep.subr.mxu0 %v2867_v40 }
 0x888   : > { %v2474_v45 = vpop.permute.xlu0 %2473  ;;  %3799 = vmatprep.mubr.msk.f32.mxu0 %vm502_vm0, %v2507_v11  ;;  %3831 = vmatpush3.msra.mxu0 %v2867_v40 }
 0x889   : > { %3800 = vmatmul.mubr.msk.f32.gmra.mxu0 %vm502_vm0, %v2508_v53  ;;  %v2510_v8 = vsel %vm2504_vm4, %v2501_v20, %v2474_v45  ;;  %3832 = vmatprep.subr.mxu0 %v2866_v55 }
 0x88a   : > { %v2472_v14 = vpop.permute.xlu1 %2471  ;;  %3833 = vmatpush3.msra.mxu0 %v2866_v55 }
 0x88b   : > { %v2509_v13 = vsel %vm2504_vm4, %v2500_v62, %v2472_v14  ;;  %3834 = vmatprep.subr.mxu0 %v2865_v42 }
 0x88c   : > { %3802 = vmatprep.mubr.msk.f32.mxu0 %vm502_vm0, %v2509_v13  ;;  %v2478_v41 = vpop.permute.xlu0 %2477  ;;  %3835 = vmatpush3.msra.mxu0 %v2865_v42 }
 0x88d   : > { %3803 = vmatmul.mubr.msk.f32.gmra.mxu0 %vm502_vm0, %v2510_v8  ;;  %v2512_v15 = vsel %vm2504_vm4, %v2503_v19, %v2478_v41 }
 0x88e   : > { %v2476_v26 = vpop.permute.xlu1 %2475 }
 0x88f   : > { %v2511_v39 = vsel %vm2504_vm4, %v2502_v54, %v2476_v26 }
 0x890   : > { %3805 = vmatprep.mubr.msk.f32.mxu0 %vm502_vm0, %v2511_v39 }
 0x891   : > { %3806 = vmatmul.mubr.msk.f32.gmra.mxu0 %vm502_vm0, %v2512_v15 }
 0x945   : > { %v3798_v5 = vpop.f32.mrf.mxu0 }
 0x946   : > { %v4985_v46 = vadd.f32 %v3798_v5, %v3303_v35 }
 0x947   : > { %v2614_v17 = vpop.f32.mrf.mxu0 }
 0x948   : > { %v2654_v50 = vmul.f32 %v4985_v46, %v4985_v46  ;;  %v4989_v24 = vadd.f32 %v3303_v35, %v2614_v17 }
 0x949   : > { %v3801_v43 = vpop.f32.mrf.mxu0 }
 0x94a   : > { %v2662_v56 = vmul.f32 %v2654_v50, %v4985_v46  ;;  %v2653_v25 = vmul.f32 %v4989_v24, %v4989_v24  ;;  %v4994_v18 = vadd.f32 %v3801_v43, %v3303_v35 }
 0x94b   : > { %v2624_v21 = vpop.f32.mrf.mxu0 }
 0x94c   : > { %v2670_v58 = vmul.f32 0.044715, %v2662_v56  ;;  %v2661_v16 = vmul.f32 %v2653_v25, %v4989_v24  ;;  %v2656_v36 = vmul.f32 %v4994_v18, %v4994_v18  ;;  %v4999_v37 = vadd.f32 %v3303_v35, %v2624_v21 }
 0x94d   : > { %v3804_v59 = vpop.f32.mrf.mxu0 }
 0x94e   : > { %v2678_v3 = vadd.f32 %v2670_v58, %v4985_v46  ;;  %v2669_v57 = vmul.f32 0.044715, %v2661_v16  ;;  %v2664_v38 = vmul.f32 %v2656_v36, %v4994_v18  ;;  %v2655_v63 = vmul.f32 %v4999_v37, %v4999_v37 }
 0x94f   : > { %v5005_v4 = vadd.f32 %v3804_v59, %v3303_v35  ;;  %v2634_v10 = vpop.f32.mrf.mxu0 }
 0x950   : > { %v2686_v60 = vmul.f32 0.7978846, %v2678_v3  ;;  %v2677_v32 = vadd.f32 %v2669_v57, %v4989_v24  ;;  %v2672_v9 = vmul.f32 0.044715, %v2664_v38  ;;  %v2663_v48 = vmul.f32 %v2655_v63, %v4999_v37 }
 0x951   : > { %v2658_v29 = vmul.f32 %v5005_v4, %v5005_v4  ;;  %v5011_v61 = vadd.f32 %v3303_v35, %v2634_v10  ;;  %v3807_v52 = vpop.f32.mrf.mxu0 }
 0x952   : > { %4026 = vtanh.f32 %v2686_v60  ;;  %v2685_v27 = vmul.f32 0.7978846, %v2677_v32  ;;  %v2680_v12 = vadd.f32 %v2672_v9, %v4994_v18  ;;  %v2671_v30 = vmul.f32 0.044715, %v2663_v48 }
 0x953   : > { %v2666_v2 = vmul.f32 %v2658_v29, %v5005_v4  ;;  %v2657_v11 = vmul.f32 %v5011_v61, %v5011_v61  ;;  %v5017_v51 = vadd.f32 %v3807_v52, %v3303_v35  ;;  %v2644_v44 = vpop.f32.mrf.mxu0 }
 0x954   : > { %4028 = vtanh.f32 %v2685_v27  ;;  %v2688_v53 = vmul.f32 0.7978846, %v2680_v12  ;;  %v2679_v45 = vadd.f32 %v2671_v30, %v4999_v37  ;;  %v5020_v49 = vadd.f32 %v3303_v35, %v2644_v44 }
 0x955   : > { %v2674_v47 = vmul.f32 0.044715, %v2666_v2  ;;  %v2665_v28 = vmul.f32 %v2657_v11, %v5011_v61  ;;  %v2660_v62 = vmul.f32 %v5017_v51, %v5017_v51 }
 0x956   : > { %4030 = vtanh.f32 %v2688_v53  ;;  %v2687_v14 = vmul.f32 0.7978846, %v2679_v45  ;;  %v2659_v20 = vmul.f32 %v5020_v49, %v5020_v49  ;;  %v3014_v53 = vld [vmem:[%s5069_s23 + $0x8] sm:$0xff] }
 0x957   : > { %v2682_v33 = vadd.f32 %v2674_v47, %v5005_v4  ;;  %v2673_v13 = vmul.f32 0.044715, %v2665_v28  ;;  %v2668_v23 = vmul.f32 %v2660_v62, %v5017_v51  ;;  %v5080_v47 = vld [vmem:[%s5144_s8] ss:$0 sm:$0xff]  ;;  %vm3030_vm5 = vcmp.eq.s32.totalorder %v3014_v53, 1 }
 0x958   : > { %4032 = vtanh.f32 %v2687_v14  ;;  %v2667_v8 = vmul.f32 %v2659_v20, %v5020_v49  ;;  %v3013_v28 = vld [vmem:[%s5069_s23] sm:$0xff]  ;;  %vm3022_vm6 = vcmp.eq.s32.totalorder %v3014_v53, 0  ;;  %v3016_v20 = vld [vmem:[%s5069_s23 + $0x18] sm:$0xff] }
 0x959   : > { %v2690_v31 = vmul.f32 0.7978846, %v2682_v33  ;;  %v2681_v41 = vadd.f32 %v2673_v13, %v5011_v61  ;;  %v2676_v6 = vmul.f32 0.044715, %v2668_v23  ;;  %vm3029_vm7 = vcmp.eq.s32.totalorder %v3013_v28, 1 }
 0x95a   : > { %v2675_v54 = vmul.f32 0.044715, %v2667_v8  ;;  %vm3021_vm8 = vcmp.eq.s32.totalorder %v3013_v28, 0  ;;  %vm3032_vm9 = vcmp.eq.s32.totalorder %v3016_v20, 1  ;;  %vm3024_vm10 = vcmp.eq.s32.totalorder %v3016_v20, 0 }
 0x95b   : > { %4034 = vtanh.f32 %v2690_v31  ;;  %v2689_v26 = vmul.f32 0.7978846, %v2681_v41  ;;  %v2684_v19 = vadd.f32 %v2676_v6, %v5017_v51  ;;  %v3015_v41 = vld [vmem:[%s5069_s23 + $0x10] sm:$0xff] }
 0x95c   : > { %v2683_v39 = vadd.f32 %v2675_v54, %v5020_v49  ;;  %vm3031_vm11 = vcmp.eq.s32.totalorder %v3015_v41, 1  ;;  %vm3023_vm12 = vcmp.eq.s32.totalorder %v3015_v41, 0 }
 0x95d   : > { %4036 = vtanh.f32 %v2689_v26  ;;  %v2692_v15 = vmul.f32 0.7978846, %v2684_v19 }
 0x95e   : > { %v2691_v34 = vmul.f32 0.7978846, %v2683_v39 }
 0x95f   : > { %v4027_v1 = vpop.eup %4026  ;;  %4038 = vtanh.f32 %v2692_v15 }
 0x960   : > { %4040 = vtanh.f32 %v2691_v34  ;;  %v2702_v7 = vadd.f32 1.0, %v4027_v1 }
 0x961   : > { %v4029_v0 = vpop.eup %4028 }
 0x962   : > { %v2710_v22 = vmul.f32 0.5, %v2702_v7  ;;  %v2701_v40 = vadd.f32 1.0, %v4029_v0  ;;  %v3018_v0 = vld [vmem:[%s5069_s23 + $0x28] sm:$0xff] }
 0x963   : > { %v4031_v55 = vpop.eup %4030  ;;  %vm3034_vm13 = vcmp.eq.s32.totalorder %v3018_v0, 1  ;;  %vm3026_vm14 = vcmp.eq.s32.totalorder %v3018_v0, 0 }
 0x964   : > { %v2718_v42 = vmul.f32 %v2710_v22, %v4985_v46  ;;  %v2709_v35 = vmul.f32 0.5, %v2701_v40  ;;  %v2704_v5 = vadd.f32 1.0, %v4031_v55 }
 0x965   : > { %v4033_v17 = vpop.eup %4032 }
 0x966   : > { %2878 = vrot.lane.b32.xlu0 %v2718_v42, %s4066_s28  ;;  %v2717_v50 = vmul.f32 %v2709_v35, %v4989_v24  ;;  %v2712_v43 = vmul.f32 0.5, %v2704_v5  ;;  %v2703_v56 = vadd.f32 1.0, %v4033_v17  ;;  %v3017_v35 = vld [vmem:[%s5069_s23 + $0x20] sm:$0xff] }
 0x967   : > { %vm3033_vm15 = vcmp.eq.s32.totalorder %v3017_v35, 1  ;;  %vm3025_vm1 = vcmp.eq.s32.totalorder %v3017_v35, 0 }
 0x968   : > { %v4035_v25 = vpop.eup %4034  ;;  %2876 = vrot.lane.b32.xlu1 %v2717_v50, %s4066_s28  ;;  %3816 = vmatprep.mubr.msk.f32.mxu1 %vm502_vm0, %v2717_v50  ;;  %v2720_v21 = vmul.f32 %v2712_v43, %v4994_v18  ;;  %v2711_v58 = vmul.f32 0.5, %v2703_v56 }
 0x969   : > { %3817 = vmatmul.mubr.msk.f32.vlgmr.msra.gmra.mxu1 %vm502_vm0, %v2718_v42  ;;  %v2706_v46 = vadd.f32 1.0, %v4035_v25  ;;  %v3020_v25 = vld [vmem:[%s5069_s23 + $0x38] sm:$0xff] }
 0x96a   : > { %v4037_v16 = vpop.eup %4036  ;;  %2882 = vrot.lane.b32.xlu0 %v2720_v21, %s4066_s28  ;;  %v2719_v36 = vmul.f32 %v2711_v58, %v4999_v37  ;;  %vm3036_vm2 = vcmp.eq.s32.totalorder %v3020_v25, 1  ;;  %vm3028_vm3 = vcmp.eq.s32.totalorder %v3020_v25, 0 }
 0x96b   : > { %v2714_v59 = vmul.f32 0.5, %v2706_v46  ;;  %v2705_v24 = vadd.f32 1.0, %v4037_v16 }
 0x96c   : > { %v4039_v3 = vpop.eup %4038  ;;  %2880 = vrot.lane.b32.xlu1 %v2719_v36, %s4066_s28  ;;  %3819 = vmatprep.mubr.msk.f32.mxu1 %vm502_vm0, %v2719_v36  ;;  %v3019_v36 = vld [vmem:[%s5069_s23 + $0x30] sm:$0xff] }
 0x96d   : > { %v4041_v57 = vpop.eup %4040  ;;  %3820 = vmatmul.mubr.msk.f32.gmra.mxu1 %vm502_vm0, %v2720_v21  ;;  %v2722_v18 = vmul.f32 %v2714_v59, %v5005_v4  ;;  %v2713_v38 = vmul.f32 0.5, %v2705_v24  ;;  %v2708_v63 = vadd.f32 1.0, %v4039_v3  ;;  %vm3035_vm4 = vcmp.eq.s32.totalorder %v3019_v36, 1 }
 0x96e   : > { %v2707_v10 = vadd.f32 1.0, %v4041_v57 }
 0x96f   : > { %2886 = vrot.lane.b32.xlu0 %v2722_v18, %s4066_s28  ;;  %v2721_v60 = vmul.f32 %v2713_v38, %v5011_v61  ;;  %v2716_v37 = vmul.f32 0.5, %v2708_v63 }
 0x970   : > { %v2715_v32 = vmul.f32 0.5, %v2707_v10 }
 0x971   : > { %2884 = vrot.lane.b32.xlu1 %v2721_v60, %s4066_s28  ;;  %3822 = vmatprep.mubr.msk.f32.mxu1 %vm502_vm0, %v2721_v60  ;;  %v2724_v9 = vmul.f32 %v2716_v37, %v5017_v51 }
 0x972   : > { %3823 = vmatmul.mubr.msk.f32.gmra.mxu1 %vm502_vm0, %v2722_v18  ;;  %v2723_v48 = vmul.f32 %v2715_v32, %v5020_v49  ;;  %v5075_v49 = vld [vmem:[%s5146_s10] ss:$0 sm:$0xff] }
 0x973   : > { %2890 = vrot.lane.b32.xlu0 %v2724_v9, %s4066_s28 }
 0x974   : > { %3825 = vmatprep.mubr.msk.f32.mxu1 %vm502_vm0, %v2723_v48 }
 0x975   : > { %2888 = vrot.lane.b32.xlu1 %v2723_v48, %s4066_s28 }
 0x976   : > { %3826 = vmatmul.mubr.msk.f32.gmra.mxu1 %vm502_vm0, %v2724_v9 }
 0x9d8   : > { %v2879_v4 = vpop.permute.xlu0 %2878 }
 0x9da   : > { %v2877_v29 = vpop.permute.xlu1 %2876 }
 0x9db   : > { %3836 = vmatprep.mubr.msk.f32.mxu0 %vm502_vm0, %v2877_v29 }
 0x9dc   : > { %v2883_v61 = vpop.permute.xlu0 %2882  ;;  %3837 = vmatmul.mubr.msk.f32.vlgmr.msra.gmra.mxu0 %vm502_vm0, %v2879_v4 }
 0x9de   : > { %v2881_v52 = vpop.permute.xlu1 %2880 }
 0x9df   : > { %3839 = vmatprep.mubr.msk.f32.mxu0 %vm502_vm0, %v2881_v52 }
 0x9e0   : > { %3840 = vmatmul.mubr.msk.f32.gmra.mxu0 %vm502_vm0, %v2883_v61 }
 0x9e1   : > { %v2887_v27 = vpop.permute.xlu0 %2886 }
 0x9e3   : > { %v2885_v12 = vpop.permute.xlu1 %2884 }
 0x9e4   : > { %3842 = vmatprep.mubr.msk.f32.mxu0 %vm502_vm0, %v2885_v12 }
 0x9e5   : > { %3843 = vmatmul.mubr.msk.f32.gmra.mxu0 %vm502_vm0, %v2887_v27  ;;  %v2891_v2 = vpop.permute.xlu0 %2890 }
 0x9e7   : > { %v2889_v30 = vpop.permute.xlu1 %2888 }
 0x9e8   : > { %3845 = vmatprep.mubr.msk.f32.mxu0 %vm502_vm0, %v2889_v30 }
 0x9e9   : > { %3846 = vmatmul.mubr.msk.f32.gmra.mxu0 %vm502_vm0, %v2891_v2 }
 0xa29   : > { %v3818_v11 = vpop.f32.mrf.mxu1 }
 0xa2a   : > { %v2832_v33 = vadd.f32 %v3818_v11, %v5080_v47 }
 0xa2b   : > { %v2826_v51 = vpop.f32.mrf.mxu1 }
 0xa2c   : > { %v2827_v6 = vadd.f32 %v5080_v47, %v2826_v51 }
 0xa2d   : > { %v3821_v44 = vpop.f32.mrf.mxu1 }
 0xa2e   : > { %v2842_v15 = vadd.f32 %v3821_v44, %v5080_v47 }
 0xa2f   : > { %v2836_v45 = vpop.f32.mrf.mxu1 }
 0xa30   : > { %v2837_v55 = vadd.f32 %v5080_v47, %v2836_v45 }
 0xa32   : > { %v3824_v13 = vpop.f32.mrf.mxu1 }
 0xa33   : > { %v2852_v21 = vadd.f32 %v3824_v13, %v5080_v47 }
 0xa34   : > { %v2846_v34 = vpop.f32.mrf.mxu1 }
 0xa35   : > { %v2847_v59 = vadd.f32 %v5080_v47, %v2846_v34 }
 0xa36   : > { %v3827_v50 = vpop.f32.mrf.mxu1 }
 0xa37   : > { %v2862_v63 = vadd.f32 %v3827_v50, %v5080_v47 }
 0xa38   : > { %v2856_v57 = vpop.f32.mrf.mxu1 }
 0xa39   : > { %v2857_v9 = vadd.f32 %v5080_v47, %v2856_v57 }
 0xa9c   : > { %v3838_v62 = vpop.f32.mrf.mxu0 }
 0xa9d   : > { %v2980_v14 = vadd.f32 %v3838_v62, %v5075_v49 }
 0xa9e   : > { %v2974_v23 = vpop.f32.mrf.mxu0 }
 0xa9f   : > { %v3038_v8 = vsel %vm3030_vm5, %v2980_v14, 0.0  ;;  %v2975_v31 = vadd.f32 %v5075_v49, %v2974_v23  ;;  %vm3027_vm5 = vcmp.eq.s32.totalorder %v3019_v36, 0 }
 0xaa0   : > { %v3046_v54 = vsel %vm3022_vm6, %v2832_v33, %v3038_v8  ;;  %v3841_v26 = vpop.f32.mrf.mxu0 }
 0xaa1   : > { %3054 = vst.msk [vmem:[%s5090_s30 + $0x8] sm:$0xff] %vm502_vm0, %v3046_v54  ;;  %v3037_v19 = vsel %vm3029_vm7, %v2975_v31, 0.0  ;;  %v2990_v39 = vadd.f32 %v3841_v26, %v5075_v49 }
 0xaa2   : > { %v3045_v1 = vsel %vm3021_vm8, %v2827_v6, %v3037_v19  ;;  %v2984_v7 = vpop.f32.mrf.mxu0 }
 0xaa3   : > { %3053 = vst.msk [vmem:[%s5090_s30] sm:$0xff] %vm502_vm0, %v3045_v1  ;;  %v3040_v22 = vsel %vm3032_vm9, %v2990_v39, 0.0  ;;  %v2985_v40 = vadd.f32 %v5075_v49, %v2984_v7 }
 0xaa4   : > { %v3048_v42 = vsel %vm3024_vm10, %v2842_v15, %v3040_v22 }
 0xaa5   : > { %3056 = vst.msk [vmem:[%s5090_s30 + $0x18] sm:$0xff] %vm502_vm0, %v3048_v42  ;;  %v3039_v5 = vsel %vm3031_vm11, %v2985_v40, 0.0  ;;  %v3844_v17 = vpop.f32.mrf.mxu0 }
 0xaa6   : > { %v3047_v43 = vsel %vm3023_vm12, %v2837_v55, %v3039_v5  ;;  %v3000_v56 = vadd.f32 %v3844_v17, %v5075_v49 }
 0xaa7   : > { %3055 = vst.msk [vmem:[%s5090_s30 + $0x10] sm:$0xff] %vm502_vm0, %v3047_v43  ;;  %v2994_v58 = vpop.f32.mrf.mxu0 }
 0xaa8   : > { %v3042_v46 = vsel %vm3034_vm13, %v3000_v56, 0.0  ;;  %v2995_v16 = vadd.f32 %v5075_v49, %v2994_v58 }
 0xaa9   : > { %v3050_v24 = vsel %vm3026_vm14, %v2852_v21, %v3042_v46  ;;  %v3847_v3 = vpop.f32.mrf.mxu0 }
 0xaaa   : > { %3058 = vst.msk [vmem:[%s5090_s30 + $0x28] sm:$0xff] %vm502_vm0, %v3050_v24  ;;  %v3041_v18 = vsel %vm3033_vm15, %v2995_v16, 0.0  ;;  %v3010_v38 = vadd.f32 %v3847_v3, %v5075_v49 }
 0xaab   : > { %v3049_v10 = vsel %vm3025_vm1, %v2847_v59, %v3041_v18  ;;  %v3004_v60 = vpop.f32.mrf.mxu0 }
 0xaac   : > { %3057 = vst.msk [vmem:[%s5090_s30 + $0x20] sm:$0xff] %vm502_vm0, %v3049_v10  ;;  %v3044_v37 = vsel %vm3036_vm2, %v3010_v38, 0.0  ;;  %v3005_v32 = vadd.f32 %v5075_v49, %v3004_v60 }
 0xaad   : > { %v3052_v48 = vsel %vm3028_vm3, %v2862_v63, %v3044_v37 }
 0xaae   : > { %3060 = vst.msk [vmem:[%s5090_s30 + $0x38] sm:$0xff] %vm502_vm0, %v3052_v48  ;;  %v3043_v4 = vsel %vm3035_vm4, %v3005_v32, 0.0 }
 0xaaf   : > { %v3051_v29 = vsel %vm3027_vm5, %v2857_v9, %v3043_v4 }
 0xab0   : > { %3059 = vst.msk [vmem:[%s5090_s30 + $0x30] sm:$0xff] %vm502_vm0, %v3051_v29 }
 0xab1 PF: > { %s21_s19 = sadd.s32 1, %s4064_s19   ;;  %s5148_s17 = smov %s4060_s18 }
 0xab2   : > { %p18_p5 = scmp.ge.s32.totalorder %s21_s19, 4   ;;  %s5149_s18 = smov %s5151_s20 }
 0xab4   :  { %20 = sbr.rel (!%p18_p5) target bundleno = 2 (0x2), region = 100 }

// kernel: tpu_custom_call.1
= control target key start
LH: loop header
LB: loop body
LE: loop exit
PB: predicated region body
PF: predicated region fallthrough
CT: control target
= control target key end

     0   :  { %s4136_s17 = smov 0   ;;  %s4138_s18 = smov 0   ;;  %s5136_s0 = inlined_call_operand.vmem [shape: f32[2,64,32], index: 0, kind: input, shape index: {}]   ;;  %s5137_s1 = inlined_call_operand.vmem [shape: f32[2,64,32], index: 1, kind: input, shape index: {}]   ;;  %s5138_s2 = inlined_call_operand.vmem [shape: s32[2,64,32], index: 2, kind: input, shape index: {}]   ;;  %s5139_s3 = inlined_call_operand.vmem [shape: f32[32,32], index: 3, kind: input, shape index: {}]   ;;  %s5140_s4 = inlined_call_operand.vmem [shape: f32[32,64], index: 4, kind: input, shape index: {}]   ;;  %s5141_s5 = inlined_call_operand.vmem [shape: f32[32,64], index: 5, kind: input, shape index: {}]   ;;  %s5142_s6 = inlined_call_operand.vmem [shape: f32[1,64], index: 6, kind: input, shape index: {}]   ;;  %s5143_s7 = inlined_call_operand.vmem [shape: f32[32,32], index: 7, kind: input, shape index: {}]   ;;  %s5144_s8 = inlined_call_operand.vmem [shape: f32[1,32], index: 8, kind: input, shape index: {}]   ;;  %s5145_s9 = inlined_call_operand.vmem [shape: f32[32,32], index: 9, kind: input, shape index: {}]   ;;  %s5146_s10 = inlined_call_operand.vmem [shape: f32[1,32], index: 10, kind: input, shape index: {}]   ;;  %s5147_s11 = inlined_call_operand.vmem [shape: f32[2,64,32], index: 11, kind: output, shape index: {}]  }
   0x1   :  { %s4140_s19 = smov 0  }
   0x2 LB: > { %s33_s20 = sadd.s32 1, %s4060_s18  ;;  %p3182_p0 = scmp.ge.s32.totalorder %s4064_s19, 1  ;;  %s4064_s19 = sphi %s4140_s19, %s21_s19   ;;  %s4060_s18 = sphi %s4138_s18, %s5149_s18   ;;  %s4056_s17 = sphi %s4136_s17, %s5148_s17  }
   0x3   : > { %p35_p1 = scmp.ge.s32.totalorder %s33_s20, 2  ;;  %p385_p2 = scmp.lt.s32.totalorder %s4064_s19, 3 }
   0x5   : > { %s5151_s20 = smov (%p35_p1, %s33_s20), 0  ;;  %p386_p3 = pnand %p3182_p0, %p385_p2 }
   0x6   : > { %p448_p4 = scmp.lt.s32.totalorder (!%p386_p3), %s4056_s17, 1  ;;  %s4066_s28 = smov (!%p386_p3), 96  }
   0x7   : > { %389 = sbr.rel (%p386_p3) target bundleno = 2737 (0xab1), region = 64  ;;  %s4067_s29 = smov (!%p386_p3), 120  }
   0x8   : > { %s4068_s30 = smov (!%p386_p3), 88   ;;  %s4069_s12 = smov (!%p386_p3), 112  }
   0x9   : > { %s4070_s13 = smov (!%p386_p3), 80   ;;  %s4071_s14 = smov (!%p386_p3), 104  }
   0xa   : > { %s4072_s15 = smov (!%p386_p3), 72   ;;  %s4073_s21 = smov (!%p386_p3), 8  }
   0xb   : > { %s4074_s22 = smov (!%p386_p3), 16  }
   0xc   : > { %v635_v0 = vld [vmem:[%s5140_s4 + $0x18] sm:$0xff]  ;;  %v634_v1 = vld [vmem:[%s5140_s4 + $0x10] sm:$0xff]  ;;  %v633_v4 = vld [vmem:[%s5140_s4 + $0x8] sm:$0xff]  ;;  %s5153_s17 = smov (!%p448_p4, %s4056_s17), 1  ;;  %vm502_vm0 = vcmask 261120   ;;  %vm765_vm1 = vcmask 64512  }
   0xd   : > { %3544 = vmatprep.subr.mxu1 %v635_v0  ;;  %v501_v2 = vld [vmem:[%s5139_s3 + $0x18] sm:$0xff]  ;;  %v500_v3 = vld [vmem:[%s5139_s3 + $0x10] sm:$0xff]  ;;  %v499_v5 = vld [vmem:[%s5139_s3 + $0x8] sm:$0xff]  ;;  %s4175_s16 = sshll.u32 %s5153_s17, 6  ;;  %vm919_vm2 = vcmask 523264   ;;  %vm2495_vm3 = vcmask 130048  }
   0xe   : > { %3545 = vmatpush3.msra.mxu1 %v635_v0  ;;  %3524 = vmatprep.subr.mxu0 %v501_v2  ;;  %v632_v6 = vld [vmem:[%s5140_s4] sm:$0xff]  ;;  %s4181_s23 = scalar_lea.vmem %s5137_s1, %s4175_s16  ;;  %s4187_s26 = scalar_lea.vmem %s5136_s0, %s4175_s16  ;;  %vm2504_vm4 = vcmask 195584  }
   0xf   : > { %3546 = vmatprep.subr.mxu1 %v634_v1  ;;  %3525 = vmatpush3.msra.mxu0 %v501_v2  ;;  %v490_v7 = vld [vmem:[%s4181_s23] sm:$0xff]  ;;  %v491_v8 = vld [vmem:[%s4181_s23 + $0x8] sm:$0xff]  ;;  %v492_v10 = vld [vmem:[%s4181_s23 + $0x10] sm:$0xff] }
  0x10   : > { %3547 = vmatpush3.msra.mxu1 %v634_v1  ;;  %3526 = vmatprep.subr.mxu0 %v500_v3  ;;  %v498_v9 = vld [vmem:[%s5139_s3] sm:$0xff]  ;;  %v483_v12 = vld [vmem:[%s4187_s26 + $0x8] sm:$0xff]  ;;  %v493_v13 = vld [vmem:[%s4181_s23 + $0x18] sm:$0xff] }
  0x11   : > { %3548 = vmatprep.subr.mxu1 %v633_v4  ;;  %3527 = vmatpush3.msra.mxu0 %v500_v3  ;;  %v482_v11 = vld [vmem:[%s4187_s26] sm:$0xff]  ;;  %v484_v14 = vld [vmem:[%s4187_s26 + $0x10] sm:$0xff]  ;;  %v485_v16 = vld [vmem:[%s4187_s26 + $0x18] sm:$0xff] }
  0x12   : > { %3549 = vmatpush3.msra.mxu1 %v633_v4  ;;  %3528 = vmatprep.subr.mxu0 %v499_v5  ;;  %v494_v15 = vld [vmem:[%s4181_s23 + $0x20] sm:$0xff]  ;;  %v495_v17 = vld [vmem:[%s4181_s23 + $0x28] sm:$0xff]  ;;  %v496_v19 = vld [vmem:[%s4181_s23 + $0x30] sm:$0xff] }
  0x13   : > { %3550 = vmatprep.subr.mxu1 %v632_v6  ;;  %3552 = vmatprep.mubr.msk.f32.mxu1 %vm502_vm0, %v490_v7  ;;  %v486_v18 = vld [vmem:[%s4187_s26 + $0x20] sm:$0xff]  ;;  %v487_v20 = vld [vmem:[%s4187_s26 + $0x28] sm:$0xff]  ;;  %v497_v21 = vld [vmem:[%s4181_s23 + $0x38] sm:$0xff]  ;;  %s5069_s23 = scalar_lea.vmem %s5138_s2, %s4175_s16 }
  0x14   : > { %3551 = vmatpush3.msra.mxu1 %v632_v6  ;;  %3529 = vmatpush3.msra.mxu0 %v499_v5  ;;  %v488_v22 = vld [vmem:[%s4187_s26 + $0x30] sm:$0xff]  ;;  %v489_v23 = vld [vmem:[%s4187_s26 + $0x38] sm:$0xff] }
  0x15   : > { %3553 = vmatmul.mubr.msk.f32.vlgmr.msra.gmra.mxu1 %vm502_vm0, %v491_v8  ;;  %3530 = vmatprep.subr.mxu0 %v498_v9 }
  0x16   : > { %3555 = vmatprep.mubr.msk.f32.mxu1 %vm502_vm0, %v492_v10  ;;  %3531 = vmatpush3.msra.mxu0 %v498_v9 }
  0x17   : > { %3532 = vmatprep.mubr.msk.f32.mxu0 %vm502_vm0, %v482_v11 }
  0x18   : > { %3533 = vmatmul.mubr.msk.f32.vlgmr.msra.gmra.mxu0 %vm502_vm0, %v483_v12 }
  0x19   : > { %3556 = vmatmul.mubr.msk.f32.gmra.mxu1 %vm502_vm0, %v493_v13  ;;  %3535 = vmatprep.mubr.msk.f32.mxu0 %vm502_vm0, %v484_v14 }
  0x1a   : > { %3558 = vmatprep.mubr.msk.f32.mxu1 %vm502_vm0, %v494_v15 }
  0x1c   : > { %3536 = vmatmul.mubr.msk.f32.gmra.mxu0 %vm502_vm0, %v485_v16 }
  0x1d   : > { %3559 = vmatmul.mubr.msk.f32.gmra.mxu1 %vm502_vm0, %v495_v17  ;;  %3538 = vmatprep.mubr.msk.f32.mxu0 %vm502_vm0, %v486_v18 }
  0x1e   : > { %3561 = vmatprep.mubr.msk.f32.mxu1 %vm502_vm0, %v496_v19 }
  0x20   : > { %3539 = vmatmul.mubr.msk.f32.gmra.mxu0 %vm502_vm0, %v487_v20 }
  0x21   : > { %3562 = vmatmul.mubr.msk.f32.gmra.mxu1 %vm502_vm0, %v497_v21  ;;  %3541 = vmatprep.mubr.msk.f32.mxu0 %vm502_vm0, %v488_v22 }
  0x24   : > { %3542 = vmatmul.mubr.msk.f32.gmra.mxu0 %vm502_vm0, %v489_v23 }
  0xd5   : > { %v4224_v24 = vpop.f32.mrf.mxu1 }
  0xd6   : > { %1002 = vrot.lane.b32.xlu0 %v4224_v24, %s4066_s28 }
  0xd7   : > { %v4228_v25 = vpop.f32.mrf.mxu1 }
  0xd8   : > { %1000 = vrot.lane.b32.xlu1 %v4228_v25, %s4066_s28  ;;  %v4232_v26 = vpop.f32.mrf.mxu0 }
  0xd9   : > { %v4234_v27 = vpop.f32.mrf.mxu1 }
  0xda   : > { %1006 = vrot.lane.b32.xlu0 %v4234_v27, %s4066_s28  ;;  %v4238_v28 = vpop.f32.mrf.mxu0 }
  0xdb   : > { %v4240_v29 = vpop.f32.mrf.mxu1  ;;  %3580 = vmatprep.mubr.msk.f32.mxu0 %vm765_vm1, %v4238_v28 }
  0xdc   : > { %1004 = vrot.lane.b32.xlu1 %v4240_v29, %s4066_s28  ;;  %v4290_v34 = vpop.f32.mrf.mxu0 }
  0xdd   : > { %v4246_v30 = vpop.f32.mrf.mxu1 }
  0xde   : > { %1010 = vrot.lane.b32.xlu0 %v4246_v30, %s4066_s28  ;;  %v4298_v35 = vpop.f32.mrf.mxu0 }
  0xdf   : > { %v4250_v31 = vpop.f32.mrf.mxu1 }
  0xe0   : > { %1008 = vrot.lane.b32.xlu1 %v4250_v31, %s4066_s28  ;;  %v4306_v36 = vpop.f32.mrf.mxu0 }
  0xe1   : > { %v4254_v32 = vpop.f32.mrf.mxu1 }
  0xe2   : > { %3564 = vmatprep.subr.msk.mxu0 %vm765_vm1, %v4254_v32  ;;  %v4312_v37 = vpop.f32.mrf.mxu0 }
  0xe3   : > { %v4258_v33 = vpop.f32.mrf.mxu1  ;;  %3565 = vmatpush3.xpose.msk.msra.mxu0 %vm765_vm1, %v4254_v32 }
  0xe4   : > { %1014 = vrot.lane.b32.xlu1 %v4254_v32, %s4066_s28  ;;  %3566 = vmatprep.subr.msk.mxu0 %vm765_vm1, %v4258_v33  ;;  %v4318_v38 = vpop.f32.mrf.mxu0 }
  0xe6   : > { %v4324_v39 = vpop.f32.mrf.mxu0 }
  0xe7   : > { %3567 = vmatpush3.xpose.msk.msra.mxu0 %vm765_vm1, %v4258_v33 }
  0xe8   : > { %1012 = vrot.lane.b32.xlu1 %v4258_v33, %s4066_s28  ;;  %3568 = vmatprep.subr.msk.mxu0 %vm765_vm1, %v4246_v30 }
  0xeb   : > { %3569 = vmatpush3.xpose.msk.msra.mxu0 %vm765_vm1, %v4246_v30 }
  0xec   : > { %1189 = vrot.lane.b32.xlu1 %v4258_v33, %s4067_s29  ;;  %3570 = vmatprep.subr.msk.mxu0 %vm765_vm1, %v4250_v31 }
  0xef   : > { %3571 = vmatpush3.xpose.msk.msra.mxu0 %vm765_vm1, %v4250_v31 }
  0xf0   : > { %1187 = vrot.lane.b32.xlu1 %v4246_v30, %s4067_s29  ;;  %3572 = vmatprep.subr.msk.mxu0 %vm765_vm1, %v4234_v27 }
  0xf3   : > { %3573 = vmatpush3.xpose.msk.msra.mxu0 %vm765_vm1, %v4234_v27 }
  0xf4   : > { %1185 = vrot.lane.b32.xlu1 %v4250_v31, %s4067_s29  ;;  %3574 = vmatprep.subr.msk.mxu0 %vm765_vm1, %v4240_v29 }
  0xf7   : > { %3575 = vmatpush3.xpose.msk.msra.mxu0 %vm765_vm1, %v4240_v29 }
  0xf8   : > { %1183 = vrot.lane.b32.xlu1 %v4234_v27, %s4067_s29  ;;  %3576 = vmatprep.subr.msk.mxu0 %vm765_vm1, %v4224_v24 }
  0xfb   : > { %3577 = vmatpush3.xpose.msk.msra.mxu0 %vm765_vm1, %v4224_v24 }
  0xfc   : > { %1181 = vrot.lane.b32.xlu1 %v4240_v29, %s4067_s29  ;;  %3578 = vmatprep.subr.msk.mxu0 %vm765_vm1, %v4228_v25 }
  0xff   : > { %3579 = vmatpush3.xpose.msk.msra.mxu0 %vm765_vm1, %v4228_v25 }
 0x100   : > { %1179 = vrot.lane.b32.xlu1 %v4224_v24, %s4067_s29 }
 0x102   : > { %3581 = vmatmul.mubr.msk.f32.vlgmr.msra.gmra.mxu0 %vm765_vm1, %v4232_v26 }
 0x103   : > { %3583 = vmatprep.mubr.msk.f32.mxu0 %vm765_vm1, %v4298_v35 }
 0x106   : > { %3584 = vmatmul.mubr.msk.f32.gmra.mxu0 %vm765_vm1, %v4290_v34 }
 0x107   : > { %3586 = vmatprep.mubr.msk.f32.mxu0 %vm765_vm1, %v4312_v37 }
 0x10a   : > { %3587 = vmatmul.mubr.msk.f32.gmra.mxu0 %vm765_vm1, %v4306_v36 }
 0x10b   : > { %3589 = vmatprep.mubr.msk.f32.mxu0 %vm765_vm1, %v4324_v39 }
 0x10e   : > { %3590 = vmatmul.mubr.msk.f32.gmra.mxu0 %vm765_vm1, %v4318_v38 }
 0x148   : > { %v1003_v42 = vpop.permute.xlu0 %1002 }
 0x14a   : > { %v1001_v40 = vpop.permute.xlu1 %1000 }
 0x14c   : > { %v1007_v44 = vpop.permute.xlu0 %1006 }
 0x14e   : > { %v1005_v41 = vpop.permute.xlu1 %1004 }
 0x150   : > { %v1011_v47 = vpop.permute.xlu0 %1010 }
 0x152   : > { %v1009_v43 = vpop.permute.xlu1 %1008 }
 0x156   : > { %v1015_v45 = vpop.permute.xlu1 %1014 }
 0x157   : > { %3592 = vmatprep.subr.mxu1 %v1015_v45 }
 0x158   : > { %3593 = vmatpush3.msra.mxu1 %v1015_v45 }
 0x15a   : > { %v1013_v46 = vpop.permute.xlu1 %1012 }
 0x15b   : > { %3594 = vmatprep.subr.mxu1 %v1013_v46 }
 0x15c   : > { %3595 = vmatpush3.msra.mxu1 %v1013_v46 }
 0x15d   : > { %3596 = vmatprep.subr.mxu1 %v1011_v47 }
 0x15e   : > { %3597 = vmatpush3.msra.mxu1 %v1011_v47  ;;  %v1190_v0 = vpop.permute.xlu1 %1189 }
 0x15f   : > { %3598 = vmatprep.subr.mxu1 %v1009_v43 }
 0x160   : > { %3599 = vmatpush3.msra.mxu1 %v1009_v43 }
 0x161   : > { %3600 = vmatprep.subr.mxu1 %v1007_v44 }
 0x162   : > { %3601 = vmatpush3.msra.mxu1 %v1007_v44  ;;  %v1188_v1 = vpop.permute.xlu1 %1187 }
 0x163   : > { %3602 = vmatprep.subr.mxu1 %v1005_v41 }
 0x164   : > { %3603 = vmatpush3.msra.mxu1 %v1005_v41 }
 0x165   : > { %3604 = vmatprep.subr.mxu1 %v1003_v42 }
 0x166   : > { %3605 = vmatpush3.msra.mxu1 %v1003_v42  ;;  %v1186_v2 = vpop.permute.xlu1 %1185 }
 0x167   : > { %3606 = vmatprep.subr.mxu1 %v1001_v40 }
 0x168   : > { %3607 = vmatpush3.msra.mxu1 %v1001_v40 }
 0x16a   : > { %v1184_v3 = vpop.permute.xlu1 %1183 }
 0x16e   : > { %v1182_v4 = vpop.permute.xlu1 %1181 }
 0x172   : > { %v1180_v6 = vpop.permute.xlu1 %1179 }
 0x1c2   : > { %v3582_v48 = vpop.f32.mrf.mxu0 }
 0x1c3   : > { %v923_v49 = vsel %vm919_vm2, %v3582_v48, -inf }
 0x1c4   : > { %924 = vmax.xlane.f32.xlu0 %v923_v49  ;;  %v880_v50 = vpop.f32.mrf.mxu0 }
 0x1c5   : > { %v920_v52 = vsel %vm919_vm2, %v880_v50, -inf }
 0x1c6   : > { %v4333_v51 = vpop.f32.mrf.mxu0 }
 0x1c7   : > { %v929_v61 = vsel %vm919_vm2, %v4333_v51, -inf }
 0x1c8   : > { %921 = vmax.xlane.f32.xlu0 %v920_v52  ;;  %v890_v53 = vpop.f32.mrf.mxu0 }
 0x1c9   : > { %v926_v54 = vsel %vm919_vm2, %v890_v53, -inf }
 0x1ca   : > { %927 = vmax.xlane.f32.xlu1 %v926_v54  ;;  %v4337_v55 = vpop.f32.mrf.mxu0 }
 0x1cb   : > { %v935_v62 = vsel %vm919_vm2, %v4337_v55, -inf }
 0x1cc   : > { %v4339_v56 = vpop.f32.mrf.mxu0 }
 0x1cd   : > { %v932_v57 = vsel %vm919_vm2, %v4339_v56, -inf }
 0x1ce   : > { %933 = vmax.xlane.f32.xlu1 %v932_v57  ;;  %v4343_v58 = vpop.f32.mrf.mxu0 }
 0x1cf   : > { %v941_v63 = vsel %vm919_vm2, %v4343_v58, -inf }
 0x1d0   : > { %v4345_v59 = vpop.f32.mrf.mxu0 }
 0x1d1   : > { %v938_v60 = vsel %vm919_vm2, %v4345_v59, -inf }
 0x1d2   : > { %939 = vmax.xlane.f32.xlu1 %v938_v60 }
 0x1de   : > { %1191 = vrot.lane.b32.xlu0 %v4254_v32, %s4067_s29 }
 0x1e3   : > { %1161 = vrot.lane.b32.xlu1 %v4238_v28, %s4067_s29 }
 0x1e7   : > { %1165 = vrot.lane.b32.xlu1 %v4298_v35, %s4067_s29 }
 0x1eb   : > { %1169 = vrot.lane.b32.xlu1 %v4312_v37, %s4067_s29 }
 0x1ef   : > { %1173 = vrot.lane.b32.xlu1 %v4324_v39, %s4067_s29 }
 0x1f3   : > { %1422 = vrot.lane.b32.xlu1 %v4258_v33, %s4068_s30 }
 0x1f7   : > { %1420 = vrot.lane.b32.xlu1 %v4246_v30, %s4068_s30 }
 0x1fb   : > { %1416 = vrot.lane.b32.xlu1 %v4234_v27, %s4068_s30 }
 0x1fd   : > { %930 = vmax.xlane.f32.xlu0 %v929_v61 }
 0x1ff   : > { %1412 = vrot.lane.b32.xlu1 %v4224_v24, %s4068_s30 }
 0x201   : > { %936 = vmax.xlane.f32.xlu0 %v935_v62 }
 0x203   : > { %1601 = vrot.lane.b32.xlu1 %v4254_v32, %s4069_s12 }
 0x205   : > { %942 = vmax.xlane.f32.xlu0 %v941_v63 }
 0x207   : > { %1597 = vrot.lane.b32.xlu1 %v4246_v30, %s4069_s12 }
 0x20b   : > { %1593 = vrot.lane.b32.xlu1 %v4234_v27, %s4069_s12 }
 0x21b   : > { %1177 = vrot.lane.b32.xlu0 %v4228_v25, %s4067_s29 }
 0x21f   : > { %1163 = vrot.lane.b32.xlu0 %v4232_v26, %s4067_s29 }
 0x223   : > { %1167 = vrot.lane.b32.xlu0 %v4290_v34, %s4067_s29 }
 0x227   : > { %1171 = vrot.lane.b32.xlu0 %v4306_v36, %s4067_s29 }
 0x22b   : > { %1175 = vrot.lane.b32.xlu0 %v4318_v38, %s4067_s29 }
 0x22f   : > { %1424 = vrot.lane.b32.xlu0 %v4254_v32, %s4068_s30 }
 0x233   : > { %1418 = vrot.lane.b32.xlu0 %v4250_v31, %s4068_s30 }
 0x237   : > { %1414 = vrot.lane.b32.xlu0 %v4240_v29, %s4068_s30 }
 0x23b   : > { %1410 = vrot.lane.b32.xlu0 %v4228_v25, %s4068_s30  ;;  %s5090_s30 = scalar_lea.vmem %s5147_s11, %s4175_s16 }
 0x23f   : > { %1599 = vrot.lane.b32.xlu0 %v4258_v33, %s4069_s12 }
 0x243   : > { %1595 = vrot.lane.b32.xlu0 %v4250_v31, %s4069_s12 }
 0x24d   : > { %v925_v5 = vpop.xlane.xlu0 %924 }
 0x24e   : > { %v945_v7 = vsub.f32 %v3582_v48, %v925_v5 }
 0x250   : > { %v954_v10 = vmul.f32 1.442695, %v945_v7 }
 0x251   : > { %v922_v8 = vpop.xlane.xlu0 %921 }
 0x252   : > { %v944_v9 = vsub.f32 %v880_v50, %v922_v8 }
 0x253   : > { %v928_v11 = vpop.xlane.xlu1 %927 }
 0x254   : > { %v952_v12 = vmul.f32 1.442695, %v944_v9  ;;  %v946_v13 = vsub.f32 %v890_v53, %v928_v11 }
 0x255   : > { %v1192_v14 = vpop.permute.xlu0 %1191 }
 0x256   : > { %3898 = vpow2.f32 %v952_v12  ;;  %v956_v15 = vmul.f32 1.442695, %v946_v13  ;;  %3620 = vmatprep.subr.msk.mxu1 %vm765_vm1, %v1192_v14 }
 0x257   : > { %3900 = vpow2.f32 %v954_v10  ;;  %v934_v19 = vpop.xlane.xlu1 %933 }
 0x258   : > { %3902 = vpow2.f32 %v956_v15  ;;  %v948_v21 = vsub.f32 %v4339_v56, %v934_v19 }
 0x25a   : > { %v960_v41 = vmul.f32 1.442695, %v948_v21 }
 0x25b   : > { %v940_v20 = vpop.xlane.xlu1 %939 }
 0x25c   : > { %v950_v42 = vsub.f32 %v4345_v59, %v940_v20 }
 0x25e   : > { %v964_v46 = vmul.f32 1.442695, %v950_v42 }
 0x25f   : > { %v1162_v22 = vpop.permute.xlu1 %1161 }
 0x263   : > { %v4394_v16 = vpop.eup %3898  ;;  %v1166_v47 = vpop.permute.xlu1 %1165 }
 0x264   : > { %v4396_v17 = vpop.eup %3900  ;;  %3608 = vmatprep.mubr.msk.f32.mxu1 %vm919_vm2, %v4394_v16 }
 0x265   : > { %v4400_v18 = vpop.eup %3902  ;;  %3609 = vmatmul.mubr.msk.f32.vlgmr.msra.gmra.mxu1 %vm919_vm2, %v4396_v17 }
 0x266   : > { %3621 = vmatpush3.xpose.msk.msra.mxu1 %vm765_vm1, %v1192_v14  ;;  %3611 = vmatprep.mubr.msk.f32.mxu1 %vm919_vm2, %v4400_v18 }
 0x267   : > { %3622 = vmatprep.subr.msk.mxu1 %vm765_vm1, %v1190_v0  ;;  %v1170_v53 = vpop.permute.xlu1 %1169 }
 0x26a   : > { %3623 = vmatpush3.xpose.msk.msra.mxu1 %vm765_vm1, %v1190_v0 }
 0x26b   : > { %3624 = vmatprep.subr.msk.mxu1 %vm765_vm1, %v1188_v1 }
 0x26e   : > { %3625 = vmatpush3.xpose.msk.msra.mxu1 %vm765_vm1, %v1188_v1 }
 0x26f   : > { %3626 = vmatprep.subr.msk.mxu1 %vm765_vm1, %v1186_v2 }
 0x272   : > { %3627 = vmatpush3.xpose.msk.msra.mxu1 %vm765_vm1, %v1186_v2 }
 0x273   : > { %3628 = vmatprep.subr.msk.mxu1 %vm765_vm1, %v1184_v3 }
 0x276   : > { %3629 = vmatpush3.xpose.msk.msra.mxu1 %vm765_vm1, %v1184_v3 }
 0x277   : > { %3630 = vmatprep.subr.msk.mxu1 %vm765_vm1, %v1182_v4 }
 0x27a   : > { %3631 = vmatpush3.xpose.msk.msra.mxu1 %vm765_vm1, %v1182_v4 }
 0x27b   : > { %3632 = vmatprep.subr.msk.mxu1 %vm765_vm1, %v1180_v6 }
 0x27e   : > { %3633 = vmatpush3.xpose.msk.msra.mxu1 %vm765_vm1, %v1180_v6 }
 0x286   : > { %v931_v23 = vpop.xlane.xlu0 %930 }
 0x287   : > { %v947_v40 = vsub.f32 %v4333_v51, %v931_v23 }
 0x289   : > { %v958_v43 = vmul.f32 1.442695, %v947_v40 }
 0x28a   : > { %v937_v44 = vpop.xlane.xlu0 %936 }
 0x28b   : > { %3904 = vpow2.f32 %v958_v43  ;;  %v949_v45 = vsub.f32 %v4337_v55, %v937_v44  ;;  %v1174_v55 = vpop.permute.xlu1 %1173 }
 0x28c   : > { %3906 = vpow2.f32 %v960_v41 }
 0x28d   : > { %v962_v48 = vmul.f32 1.442695, %v949_v45 }
 0x28e   : > { %v943_v49 = vpop.xlane.xlu0 %942 }
 0x28f   : > { %3908 = vpow2.f32 %v962_v48  ;;  %v951_v50 = vsub.f32 %v4343_v58, %v943_v49  ;;  %v1423_v61 = vpop.permute.xlu1 %1422 }
 0x290   : > { %3910 = vpow2.f32 %v964_v46 }
 0x291   : > { %v966_v52 = vmul.f32 1.442695, %v951_v50 }
 0x292   : > { %v1178_v51 = vpop.permute.xlu0 %1177 }
 0x293   : > { %3912 = vpow2.f32 %v966_v52  ;;  %3634 = vmatprep.subr.msk.mxu1 %vm765_vm1, %v1178_v51  ;;  %v1421_v1 = vpop.permute.xlu1 %1420 }
 0x294   : > { %3635 = vmatpush3.xpose.msk.msra.mxu1 %vm765_vm1, %v1178_v51 }
 0x296   : > { %v1164_v54 = vpop.permute.xlu0 %1163 }
 0x297   : > { %v1417_v3 = vpop.permute.xlu1 %1416 }
 0x298   : > { %v4426_v56 = vpop.eup %3904 }
 0x299   : > { %v4428_v57 = vpop.eup %3906  ;;  %3612 = vmatmul.mubr.msk.f32.gmra.mxu1 %vm919_vm2, %v4426_v56 }
 0x29a   : > { %3614 = vmatprep.mubr.msk.f32.mxu1 %vm919_vm2, %v4428_v57  ;;  %v1168_v58 = vpop.permute.xlu0 %1167 }
 0x29b   : > { %v1413_v6 = vpop.permute.xlu1 %1412 }
 0x29c   : > { %v4434_v59 = vpop.eup %3908 }
 0x29d   : > { %v4436_v60 = vpop.eup %3910  ;;  %3615 = vmatmul.mubr.msk.f32.gmra.mxu1 %vm919_vm2, %v4434_v59 }
 0x29e   : > { %v1172_v62 = vpop.permute.xlu0 %1171  ;;  %3617 = vmatprep.mubr.msk.f32.mxu1 %vm919_vm2, %v4436_v60 }
 0x29f   : > { %v4454_v8 = vpop.permute.xlu1 %1601 }
 0x2a0   : > { %v4442_v63 = vpop.eup %3912 }
 0x2a1   : > { %3618 = vmatmul.mubr.msk.f32.gmra.mxu1 %vm919_vm2, %v4442_v63 }
 0x2a2   : > { %v1176_v0 = vpop.permute.xlu0 %1175  ;;  %3636 = vmatprep.mubr.msk.f32.mxu1 %vm765_vm1, %v1162_v22 }
 0x2a3   : > { %v1598_v51 = vpop.permute.xlu1 %1597 }
 0x2a5   : > { %3637 = vmatmul.mubr.msk.f32.vlgmr.msra.gmra.mxu1 %vm765_vm1, %v1164_v54 }
 0x2a6   : > { %v1425_v2 = vpop.permute.xlu0 %1424  ;;  %3639 = vmatprep.mubr.msk.f32.mxu1 %vm765_vm1, %v1166_v47 }
 0x2a7   : > { %3648 = vmatprep.subr.mxu0 %v1425_v2 }
 0x2a8   : > { %3649 = vmatpush3.msra.mxu0 %v1425_v2 }
 0x2a9   : > { %3640 = vmatmul.mubr.msk.f32.gmra.mxu1 %vm765_vm1, %v1168_v58  ;;  %3650 = vmatprep.subr.mxu0 %v1423_v61 }
 0x2aa   : > { %v1419_v4 = vpop.permute.xlu0 %1418  ;;  %3642 = vmatprep.mubr.msk.f32.mxu1 %vm765_vm1, %v1170_v53  ;;  %3651 = vmatpush3.msra.mxu0 %v1423_v61 }
 0x2ab   : > { %3652 = vmatprep.subr.mxu0 %v1421_v1 }
 0x2ac   : > { %3653 = vmatpush3.msra.mxu0 %v1421_v1 }
 0x2ad   : > { %3643 = vmatmul.mubr.msk.f32.gmra.mxu1 %vm765_vm1, %v1172_v62  ;;  %3654 = vmatprep.subr.mxu0 %v1419_v4 }
 0x2ae   : > { %v1415_v5 = vpop.permute.xlu0 %1414  ;;  %3645 = vmatprep.mubr.msk.f32.mxu1 %vm765_vm1, %v1174_v55  ;;  %3655 = vmatpush3.msra.mxu0 %v1419_v4  ;;  %v1594_v55 = vpop.permute.xlu1 %1593 }
 0x2af   : > { %3656 = vmatprep.subr.mxu0 %v1417_v3 }
 0x2b0   : > { %3657 = vmatpush3.msra.mxu0 %v1417_v3 }
 0x2b1   : > { %3646 = vmatmul.mubr.msk.f32.gmra.mxu1 %vm765_vm1, %v1176_v0  ;;  %3658 = vmatprep.subr.mxu0 %v1415_v5 }
 0x2b2   : > { %3659 = vmatpush3.msra.mxu0 %v1415_v5  ;;  %v1411_v7 = vpop.permute.xlu0 %1410 }
 0x2b3   : > { %3660 = vmatprep.subr.mxu0 %v1413_v6 }
 0x2b4   : > { %3661 = vmatpush3.msra.mxu0 %v1413_v6 }
 0x2b5   : > { %3662 = vmatprep.subr.mxu0 %v1411_v7 }
 0x2b6   : > { %3663 = vmatpush3.msra.mxu0 %v1411_v7  ;;  %v1600_v53 = vpop.permute.xlu0 %1599 }
 0x2b7   : > { %3676 = vmatprep.subr.msk.mxu0 %vm765_vm1, %v4454_v8 }
 0x2ba   : > { %v1596_v54 = vpop.permute.xlu0 %1595 }
 0x325   : > { %v4458_v9 = vpop.f32.mrf.mxu1 }
 0x327   : > { %v4460_v10 = vpop.f32.mrf.mxu1 }
 0x359   : > { %v4462_v11 = vpop.f32.mrf.mxu1 }
 0x35b   : > { %v4464_v12 = vpop.f32.mrf.mxu1 }
 0x35d   : > { %v4466_v13 = vpop.f32.mrf.mxu1 }
 0x35f   : > { %v4468_v14 = vpop.f32.mrf.mxu1 }
 0x361   : > { %v4470_v15 = vpop.f32.mrf.mxu1 }
 0x363   : > { %v4472_v19 = vpop.f32.mrf.mxu1 }
 0x365   : > { %v3638_v20 = vpop.f32.mrf.mxu1 }
 0x366   : > { %v1333_v21 = vsel %vm919_vm2, %v3638_v20, -inf }
 0x367   : > { %1334 = vmax.xlane.f32.xlu0 %v1333_v21  ;;  %v1291_v22 = vpop.f32.mrf.mxu1 }
 0x368   : > { %v1330_v23 = vsel %vm919_vm2, %v1291_v22, -inf }
 0x369   : > { %1331 = vmax.xlane.f32.xlu1 %v1330_v23  ;;  %v4480_v40 = vpop.f32.mrf.mxu1 }
 0x36a   : > { %v1339_v46 = vsel %vm919_vm2, %v4480_v40, -inf }
 0x36b   : > { %v4482_v41 = vpop.f32.mrf.mxu1 }
 0x36c   : > { %v1336_v44 = vsel %vm919_vm2, %v4482_v41, -inf }
 0x36d   : > { %v4484_v42 = vpop.f32.mrf.mxu1 }
 0x36e   : > { %v1345_v49 = vsel %vm919_vm2, %v4484_v42, -inf }
 0x36f   : > { %v4486_v43 = vpop.f32.mrf.mxu1 }
 0x370   : > { %v1342_v47 = vsel %vm919_vm2, %v4486_v43, -inf }
 0x371   : > { %v4490_v45 = vpop.f32.mrf.mxu1 }
 0x372   : > { %v1351_v52 = vsel %vm919_vm2, %v4490_v45, -inf }
 0x373   : > { %v4496_v48 = vpop.f32.mrf.mxu1 }
 0x374   : > { %v1348_v50 = vsel %vm919_vm2, %v4496_v48, -inf }
 0x37a   : > { %1589 = vrot.lane.b32.xlu1 %v4224_v24, %s4069_s12 }
 0x37d   : > { %1591 = vrot.lane.b32.xlu0 %v4240_v29, %s4069_s12 }
 0x39c   : > { %1337 = vmax.xlane.f32.xlu0 %v1336_v44 }
 0x39e   : > { %1340 = vmax.xlane.f32.xlu1 %v1339_v46 }
 0x3a0   : > { %1343 = vmax.xlane.f32.xlu0 %v1342_v47 }
 0x3a2   : > { %1346 = vmax.xlane.f32.xlu1 %v1345_v49 }
 0x3a4   : > { %1349 = vmax.xlane.f32.xlu0 %v1348_v50 }
 0x3a6   : > { %1352 = vmax.xlane.f32.xlu1 %v1351_v52 }
 0x3b7   : > { %1571 = vrot.lane.b32.xlu1 %v4238_v28, %s4069_s12 }
 0x3ba   : > { %1587 = vrot.lane.b32.xlu0 %v4228_v25, %s4069_s12 }
 0x3bb   : > { %1575 = vrot.lane.b32.xlu1 %v4298_v35, %s4069_s12 }
 0x3be   : > { %1573 = vrot.lane.b32.xlu0 %v4232_v26, %s4069_s12 }
 0x3bf   : > { %1579 = vrot.lane.b32.xlu1 %v4312_v37, %s4069_s12 }
 0x3c2   : > { %1577 = vrot.lane.b32.xlu0 %v4290_v34, %s4069_s12 }
 0x3c3   : > { %1583 = vrot.lane.b32.xlu1 %v4324_v39, %s4069_s12 }
 0x3c6   : > { %1581 = vrot.lane.b32.xlu0 %v4306_v36, %s4069_s12 }
 0x3c7   : > { %1832 = vrot.lane.b32.xlu1 %v4258_v33, %s4070_s13 }
 0x3ca   : > { %1585 = vrot.lane.b32.xlu0 %v4318_v38, %s4069_s12  ;;  %s4075_s12 = smov 24  }
 0x3cb   : > { %1830 = vrot.lane.b32.xlu1 %v4246_v30, %s4070_s13 }
 0x3ce   : > { %1834 = vrot.lane.b32.xlu0 %v4254_v32, %s4070_s13 }
 0x3cf   : > { %1826 = vrot.lane.b32.xlu1 %v4234_v27, %s4070_s13 }
 0x3d2   : > { %1828 = vrot.lane.b32.xlu0 %v4250_v31, %s4070_s13 }
 0x3d3   : > { %1822 = vrot.lane.b32.xlu1 %v4224_v24, %s4070_s13 }
 0x3d6   : > { %1824 = vrot.lane.b32.xlu0 %v4240_v29, %s4070_s13 }
 0x3d7   : > { %2011 = vrot.lane.b32.xlu1 %v4254_v32, %s4071_s14 }
 0x3da   : > { %1820 = vrot.lane.b32.xlu0 %v4228_v25, %s4070_s13 }
 0x3db   : > { %2007 = vrot.lane.b32.xlu1 %v4246_v30, %s4071_s14 }
 0x3de   : > { %2009 = vrot.lane.b32.xlu0 %v4258_v33, %s4071_s14 }
 0x3df   : > { %2003 = vrot.lane.b32.xlu1 %v4234_v27, %s4071_s14 }
 0x3e2   : > { %2005 = vrot.lane.b32.xlu0 %v4250_v31, %s4071_s14 }
 0x3f0   : > { %v1335_v58 = vpop.xlane.xlu0 %1334 }
 0x3f1   : > { %v1355_v61 = vsub.f32 %v3638_v20, %v1335_v58 }
 0x3f2   : > { %v1332_v62 = vpop.xlane.xlu1 %1331 }
 0x3f3   : > { %v1354_v0 = vsub.f32 %v1291_v22, %v1332_v62  ;;  %v1364_v1 = vmul.f32 1.442695, %v1355_v61 }
 0x3f4   : > { %v1592_v5 = vpop.permute.xlu0 %1591 }
 0x3f5   : > { %v1362_v2 = vmul.f32 1.442695, %v1354_v0 }
 0x3f6   : > { %v1590_v6 = vpop.permute.xlu1 %1589 }
 0x3f7   : > { %3914 = vpow2.f32 %v1362_v2 }
 0x3f8   : > { %3916 = vpow2.f32 %v1364_v1 }
 0x404   : > { %v4540_v3 = vpop.eup %3914 }
 0x405   : > { %v4542_v4 = vpop.eup %3916  ;;  %3664 = vmatprep.mubr.msk.f32.mxu0 %vm919_vm2, %v4540_v3 }
 0x406   : > { %3665 = vmatmul.mubr.msk.f32.vlgmr.msra.gmra.mxu0 %vm919_vm2, %v4542_v4 }
 0x407   : > { %3677 = vmatpush3.xpose.msk.msra.mxu0 %vm765_vm1, %v4454_v8 }
 0x408   : > { %3678 = vmatprep.subr.msk.mxu0 %vm765_vm1, %v1600_v53 }
 0x40b   : > { %3679 = vmatpush3.xpose.msk.msra.mxu0 %vm765_vm1, %v1600_v53 }
 0x40c   : > { %3680 = vmatprep.subr.msk.mxu0 %vm765_vm1, %v1598_v51 }
 0x40f   : > { %3681 = vmatpush3.xpose.msk.msra.mxu0 %vm765_vm1, %v1598_v51 }
 0x410   : > { %3682 = vmatprep.subr.msk.mxu0 %vm765_vm1, %v1596_v54 }
 0x413   : > { %3683 = vmatpush3.xpose.msk.msra.mxu0 %vm765_vm1, %v1596_v54 }
 0x414   : > { %3684 = vmatprep.subr.msk.mxu0 %vm765_vm1, %v1594_v55 }
 0x417   : > { %3685 = vmatpush3.xpose.msk.msra.mxu0 %vm765_vm1, %v1594_v55 }
 0x418   : > { %3686 = vmatprep.subr.msk.mxu0 %vm765_vm1, %v1592_v5 }
 0x41b   : > { %3687 = vmatpush3.xpose.msk.msra.mxu0 %vm765_vm1, %v1592_v5 }
 0x41c   : > { %3688 = vmatprep.subr.msk.mxu0 %vm765_vm1, %v1590_v6 }
 0x41f   : > { %3689 = vmatpush3.xpose.msk.msra.mxu0 %vm765_vm1, %v1590_v6 }
 0x425   : > { %v1338_v7 = vpop.xlane.xlu0 %1337 }
 0x426   : > { %v1356_v8 = vsub.f32 %v4482_v41, %v1338_v7 }
 0x427   : > { %v1341_v20 = vpop.xlane.xlu1 %1340 }
 0x428   : > { %v1366_v21 = vmul.f32 1.442695, %v1356_v8  ;;  %v1357_v22 = vsub.f32 %v4480_v40, %v1341_v20 }
 0x429   : > { %v1344_v23 = vpop.xlane.xlu0 %1343 }
 0x42a   : > { %3918 = vpow2.f32 %v1366_v21  ;;  %v1368_v44 = vmul.f32 1.442695, %v1357_v22  ;;  %v1358_v46 = vsub.f32 %v4486_v43, %v1344_v23 }
 0x42b   : > { %v1347_v47 = vpop.xlane.xlu1 %1346 }
 0x42c   : > { %3920 = vpow2.f32 %v1368_v44  ;;  %v1370_v49 = vmul.f32 1.442695, %v1358_v46  ;;  %v1359_v50 = vsub.f32 %v4484_v42, %v1347_v47 }
 0x42d   : > { %v1350_v52 = vpop.xlane.xlu0 %1349 }
 0x42e   : > { %3922 = vpow2.f32 %v1370_v49  ;;  %v1372_v53 = vmul.f32 1.442695, %v1359_v50  ;;  %v1360_v51 = vsub.f32 %v4496_v48, %v1350_v52 }
 0x42f   : > { %v1353_v41 = vpop.xlane.xlu1 %1352 }
 0x430   : > { %3924 = vpow2.f32 %v1372_v53  ;;  %v1374_v54 = vmul.f32 1.442695, %v1360_v51  ;;  %v1361_v40 = vsub.f32 %v4490_v45, %v1353_v41 }
 0x431   : > { %v1588_v55 = vpop.permute.xlu0 %1587 }
 0x432   : > { %3926 = vpow2.f32 %v1374_v54  ;;  %v1376_v58 = vmul.f32 1.442695, %v1361_v40  ;;  %3690 = vmatprep.subr.msk.mxu0 %vm765_vm1, %v1588_v55 }
 0x433   : > { %3691 = vmatpush3.xpose.msk.msra.mxu0 %vm765_vm1, %v1588_v55  ;;  %v1572_v43 = vpop.permute.xlu1 %1571 }
 0x434   : > { %3928 = vpow2.f32 %v1376_v58 }
 0x435   : > { %v1574_v42 = vpop.permute.xlu0 %1573 }
 0x437   : > { %v4570_v61 = vpop.eup %3918  ;;  %v1576_v62 = vpop.permute.xlu1 %1575 }
 0x438   : > { %3667 = vmatprep.mubr.msk.f32.mxu0 %vm919_vm2, %v4570_v61 }
 0x439   : > { %v4574_v48 = vpop.eup %3920  ;;  %v1578_v0 = vpop.permute.xlu0 %1577 }
 0x43a   : > { %3668 = vmatmul.mubr.msk.f32.gmra.mxu0 %vm919_vm2, %v4574_v48 }
 0x43b   : > { %v4578_v45 = vpop.eup %3922  ;;  %v1580_v1 = vpop.permute.xlu1 %1579 }
 0x43c   : > { %3670 = vmatprep.mubr.msk.f32.mxu0 %vm919_vm2, %v4578_v45 }
 0x43d   : > { %v4582_v2 = vpop.eup %3924  ;;  %v1582_v5 = vpop.permute.xlu0 %1581 }
 0x43e   : > { %3671 = vmatmul.mubr.msk.f32.gmra.mxu0 %vm919_vm2, %v4582_v2 }
 0x43f   : > { %v4586_v6 = vpop.eup %3926  ;;  %v1584_v7 = vpop.permute.xlu1 %1583 }
 0x440   : > { %3673 = vmatprep.mubr.msk.f32.mxu0 %vm919_vm2, %v4586_v6 }
 0x441   : > { %v4590_v8 = vpop.eup %3928  ;;  %v1586_v20 = vpop.permute.xlu0 %1585 }
 0x442   : > { %3674 = vmatmul.mubr.msk.f32.gmra.mxu0 %vm919_vm2, %v4590_v8 }
 0x443   : > { %3692 = vmatprep.mubr.msk.f32.mxu0 %vm765_vm1, %v1572_v43  ;;  %v1833_v21 = vpop.permute.xlu1 %1832 }
 0x445   : > { %v1835_v22 = vpop.permute.xlu0 %1834 }
 0x446   : > { %3693 = vmatmul.mubr.msk.f32.vlgmr.msra.gmra.mxu0 %vm765_vm1, %v1574_v42  ;;  %3704 = vmatprep.subr.mxu1 %v1835_v22 }
 0x447   : > { %3695 = vmatprep.mubr.msk.f32.mxu0 %vm765_vm1, %v1576_v62  ;;  %3705 = vmatpush3.msra.mxu1 %v1835_v22  ;;  %v1831_v23 = vpop.permute.xlu1 %1830 }
 0x448   : > { %3706 = vmatprep.subr.mxu1 %v1833_v21 }
 0x449   : > { %v1829_v44 = vpop.permute.xlu0 %1828  ;;  %3707 = vmatpush3.msra.mxu1 %v1833_v21 }
 0x44a   : > { %3696 = vmatmul.mubr.msk.f32.gmra.mxu0 %vm765_vm1, %v1578_v0  ;;  %3708 = vmatprep.subr.mxu1 %v1831_v23 }
 0x44b   : > { %3698 = vmatprep.mubr.msk.f32.mxu0 %vm765_vm1, %v1580_v1  ;;  %3709 = vmatpush3.msra.mxu1 %v1831_v23  ;;  %v1827_v46 = vpop.permute.xlu1 %1826 }
 0x44c   : > { %3710 = vmatprep.subr.mxu1 %v1829_v44 }
 0x44d   : > { %v1825_v47 = vpop.permute.xlu0 %1824  ;;  %3711 = vmatpush3.msra.mxu1 %v1829_v44 }
 0x44e   : > { %3699 = vmatmul.mubr.msk.f32.gmra.mxu0 %vm765_vm1, %v1582_v5  ;;  %3712 = vmatprep.subr.mxu1 %v1827_v46 }
 0x44f   : > { %3701 = vmatprep.mubr.msk.f32.mxu0 %vm765_vm1, %v1584_v7  ;;  %3713 = vmatpush3.msra.mxu1 %v1827_v46  ;;  %v1823_v49 = vpop.permute.xlu1 %1822 }
 0x450   : > { %3714 = vmatprep.subr.mxu1 %v1825_v47 }
 0x451   : > { %3715 = vmatpush3.msra.mxu1 %v1825_v47  ;;  %v1821_v50 = vpop.permute.xlu0 %1820 }
 0x452   : > { %3702 = vmatmul.mubr.msk.f32.gmra.mxu0 %vm765_vm1, %v1586_v20  ;;  %3716 = vmatprep.subr.mxu1 %v1823_v49 }
 0x453   : > { %3717 = vmatpush3.msra.mxu1 %v1823_v49  ;;  %v4602_v52 = vpop.permute.xlu1 %2011 }
 0x454   : > { %3718 = vmatprep.subr.mxu1 %v1821_v50 }
 0x455   : > { %3719 = vmatpush3.msra.mxu1 %v1821_v50 }
 0x456   : > { %3732 = vmatprep.subr.msk.mxu1 %vm765_vm1, %v4602_v52 }
 0x4c6   : > { %v4606_v53 = vpop.f32.mrf.mxu0 }
 0x4c8   : > { %v4608_v51 = vpop.f32.mrf.mxu0 }
 0x4fa   : > { %v4610_v41 = vpop.f32.mrf.mxu0 }
 0x4fc   : > { %v4612_v54 = vpop.f32.mrf.mxu0 }
 0x4fe   : > { %v4614_v40 = vpop.f32.mrf.mxu0 }
 0x500   : > { %v4616_v55 = vpop.f32.mrf.mxu0 }
 0x502   : > { %v4618_v58 = vpop.f32.mrf.mxu0 }
 0x504   : > { %v4620_v43 = vpop.f32.mrf.mxu0 }
 0x506   : > { %v3694_v42 = vpop.f32.mrf.mxu0 }
 0x507   : > { %v1743_v62 = vsel %vm919_vm2, %v3694_v42, -inf }
 0x508   : > { %1744 = vmax.xlane.f32.xlu0 %v1743_v62  ;;  %v1701_v0 = vpop.f32.mrf.mxu0 }
 0x509   : > { %v1740_v1 = vsel %vm919_vm2, %v1701_v0, -inf }
 0x50a   : > { %1741 = vmax.xlane.f32.xlu1 %v1740_v1  ;;  %v4628_v5 = vpop.f32.mrf.mxu0 }
 0x50b   : > { %v1749_v44 = vsel %vm919_vm2, %v4628_v5, -inf }
 0x50c   : > { %v4630_v7 = vpop.f32.mrf.mxu0 }
 0x50d   : > { %v1746_v22 = vsel %vm919_vm2, %v4630_v7, -inf }
 0x50e   : > { %v4632_v20 = vpop.f32.mrf.mxu0 }
 0x50f   : > { %v1755_v49 = vsel %vm919_vm2, %v4632_v20, -inf }
 0x510   : > { %v4634_v21 = vpop.f32.mrf.mxu0 }
 0x511   : > { %v1752_v46 = vsel %vm919_vm2, %v4634_v21, -inf }
 0x512   : > { %v4638_v23 = vpop.f32.mrf.mxu0 }
 0x513   : > { %v1761_v62 = vsel %vm919_vm2, %v4638_v23, -inf }
 0x514   : > { %v4644_v47 = vpop.f32.mrf.mxu0 }
 0x515   : > { %v1758_v50 = vsel %vm919_vm2, %v4644_v47, -inf }
 0x51b   : > { %1999 = vrot.lane.b32.xlu1 %v4224_v24, %s4071_s14 }
 0x51e   : > { %2001 = vrot.lane.b32.xlu0 %v4240_v29, %s4071_s14 }
 0x53d   : > { %1747 = vmax.xlane.f32.xlu0 %v1746_v22 }
 0x53f   : > { %1750 = vmax.xlane.f32.xlu1 %v1749_v44 }
 0x541   : > { %1753 = vmax.xlane.f32.xlu0 %v1752_v46 }
 0x543   : > { %1756 = vmax.xlane.f32.xlu1 %v1755_v49 }
 0x545   : > { %1759 = vmax.xlane.f32.xlu0 %v1758_v50 }
 0x547   : > { %1762 = vmax.xlane.f32.xlu1 %v1761_v62 }
 0x558   : > { %1981 = vrot.lane.b32.xlu1 %v4238_v28, %s4071_s14  ;;  %v2008_v28 = vpop.permute.xlu1 %2007 }
 0x55b   : > { %1997 = vrot.lane.b32.xlu0 %v4228_v25, %s4071_s14 }
 0x55c   : > { %1985 = vrot.lane.b32.xlu1 %v4298_v35, %s4071_s14 }
 0x55f   : > { %1983 = vrot.lane.b32.xlu0 %v4232_v26, %s4071_s14  ;;  %v2010_v26 = vpop.permute.xlu0 %2009 }
 0x560   : > { %1989 = vrot.lane.b32.xlu1 %v4312_v37, %s4071_s14 }
 0x563   : > { %1987 = vrot.lane.b32.xlu0 %v4290_v34, %s4071_s14  ;;  %v2004_v34 = vpop.permute.xlu1 %2003 }
 0x564   : > { %1993 = vrot.lane.b32.xlu1 %v4324_v39, %s4071_s14 }
 0x567   : > { %1991 = vrot.lane.b32.xlu0 %v4306_v36, %s4071_s14 }
 0x568   : > { %2242 = vrot.lane.b32.xlu1 %v4258_v33, %s4072_s15  ;;  %v2006_v33 = vpop.permute.xlu0 %2005 }
 0x56b   : > { %1995 = vrot.lane.b32.xlu0 %v4318_v38, %s4071_s14 }
 0x56c   : > { %2240 = vrot.lane.b32.xlu1 %v4246_v30, %s4072_s15 }
 0x56f   : > { %2244 = vrot.lane.b32.xlu0 %v4254_v32, %s4072_s15 }
 0x570   : > { %2236 = vrot.lane.b32.xlu1 %v4234_v27, %s4072_s15 }
 0x573   : > { %2238 = vrot.lane.b32.xlu0 %v4250_v31, %s4072_s15 }
 0x577   : > { %2234 = vrot.lane.b32.xlu0 %v4240_v29, %s4072_s15 }
 0x591   : > { %v1745_v35 = vpop.xlane.xlu0 %1744 }
 0x592   : > { %v1765_v36 = vsub.f32 %v3694_v42, %v1745_v35 }
 0x593   : > { %v1742_v37 = vpop.xlane.xlu1 %1741 }
 0x594   : > { %v1764_v30 = vsub.f32 %v1701_v0, %v1742_v37  ;;  %v1774_v38 = vmul.f32 1.442695, %v1765_v36 }
 0x595   : > { %v2002_v29 = vpop.permute.xlu0 %2001 }
 0x596   : > { %v1772_v39 = vmul.f32 1.442695, %v1764_v30 }
 0x597   : > { %v2000_v31 = vpop.permute.xlu1 %1999 }
 0x598   : > { %3930 = vpow2.f32 %v1772_v39 }
 0x599   : > { %3932 = vpow2.f32 %v1774_v38 }
 0x5a5   : > { %v4682_v32 = vpop.eup %3930 }
 0x5a6   : > { %v4684_v27 = vpop.eup %3932  ;;  %3720 = vmatprep.mubr.msk.f32.mxu1 %vm919_vm2, %v4682_v32 }
 0x5a7   : > { %3721 = vmatmul.mubr.msk.f32.vlgmr.msra.gmra.mxu1 %vm919_vm2, %v4684_v27 }
 0x5a8   : > { %3733 = vmatpush3.xpose.msk.msra.mxu1 %vm765_vm1, %v4602_v52 }
 0x5a9   : > { %3734 = vmatprep.subr.msk.mxu1 %vm765_vm1, %v2010_v26 }
 0x5ac   : > { %3735 = vmatpush3.xpose.msk.msra.mxu1 %vm765_vm1, %v2010_v26 }
 0x5ad   : > { %3736 = vmatprep.subr.msk.mxu1 %vm765_vm1, %v2008_v28 }
 0x5b0   : > { %3737 = vmatpush3.xpose.msk.msra.mxu1 %vm765_vm1, %v2008_v28 }
 0x5b1   : > { %3738 = vmatprep.subr.msk.mxu1 %vm765_vm1, %v2006_v33 }
 0x5b4   : > { %3739 = vmatpush3.xpose.msk.msra.mxu1 %vm765_vm1, %v2006_v33 }
 0x5b5   : > { %3740 = vmatprep.subr.msk.mxu1 %vm765_vm1, %v2004_v34 }
 0x5b8   : > { %3741 = vmatpush3.xpose.msk.msra.mxu1 %vm765_vm1, %v2004_v34 }
 0x5b9   : > { %3742 = vmatprep.subr.msk.mxu1 %vm765_vm1, %v2002_v29 }
 0x5bc   : > { %3743 = vmatpush3.xpose.msk.msra.mxu1 %vm765_vm1, %v2002_v29 }
 0x5bd   : > { %3744 = vmatprep.subr.msk.mxu1 %vm765_vm1, %v2000_v31 }
 0x5c0   : > { %3745 = vmatpush3.xpose.msk.msra.mxu1 %vm765_vm1, %v2000_v31 }
 0x5c6   : > { %v1748_v52 = vpop.xlane.xlu0 %1747 }
 0x5c7   : > { %v1766_v42 = vsub.f32 %v4630_v7, %v1748_v52 }
 0x5c8   : > { %v1751_v0 = vpop.xlane.xlu1 %1750 }
 0x5c9   : > { %v1776_v1 = vmul.f32 1.442695, %v1766_v42  ;;  %v1767_v22 = vsub.f32 %v4628_v5, %v1751_v0 }
 0x5ca   : > { %v1754_v44 = vpop.xlane.xlu0 %1753 }
 0x5cb   : > { %3934 = vpow2.f32 %v1776_v1  ;;  %v1778_v46 = vmul.f32 1.442695, %v1767_v22  ;;  %v1768_v49 = vsub.f32 %v4634_v21, %v1754_v44 }
 0x5cc   : > { %v1757_v50 = vpop.xlane.xlu1 %1756 }
 0x5cd   : > { %3936 = vpow2.f32 %v1778_v46  ;;  %v1780_v62 = vmul.f32 1.442695, %v1768_v49  ;;  %v1769_v26 = vsub.f32 %v4632_v20, %v1757_v50 }
 0x5ce   : > { %v1760_v28 = vpop.xlane.xlu0 %1759 }
 0x5cf   : > { %3938 = vpow2.f32 %v1780_v62  ;;  %v1782_v33 = vmul.f32 1.442695, %v1769_v26  ;;  %v1770_v34 = vsub.f32 %v4644_v47, %v1760_v28 }
 0x5d0   : > { %v1763_v7 = vpop.xlane.xlu1 %1762 }
 0x5d1   : > { %3940 = vpow2.f32 %v1782_v33  ;;  %v1784_v35 = vmul.f32 1.442695, %v1770_v34  ;;  %v1771_v5 = vsub.f32 %v4638_v23, %v1763_v7 }
 0x5d2   : > { %v1998_v36 = vpop.permute.xlu0 %1997 }
 0x5d3   : > { %3942 = vpow2.f32 %v1784_v35  ;;  %v1786_v37 = vmul.f32 1.442695, %v1771_v5  ;;  %3746 = vmatprep.subr.msk.mxu1 %vm765_vm1, %v1998_v36 }
 0x5d4   : > { %3747 = vmatpush3.xpose.msk.msra.mxu1 %vm765_vm1, %v1998_v36  ;;  %v1982_v21 = vpop.permute.xlu1 %1981 }
 0x5d5   : > { %3944 = vpow2.f32 %v1786_v37 }
 0x5d6   : > { %v1984_v20 = vpop.permute.xlu0 %1983 }
 0x5d8   : > { %v4712_v30 = vpop.eup %3934  ;;  %v1986_v38 = vpop.permute.xlu1 %1985 }
 0x5d9   : > { %3723 = vmatprep.mubr.msk.f32.mxu1 %vm919_vm2, %v4712_v30 }
 0x5da   : > { %v4716_v47 = vpop.eup %3936  ;;  %v1988_v39 = vpop.permute.xlu0 %1987 }
 0x5db   : > { %3724 = vmatmul.mubr.msk.f32.gmra.mxu1 %vm919_vm2, %v4716_v47 }
 0x5dc   : > { %v4720_v23 = vpop.eup %3938  ;;  %v1990_v29 = vpop.permute.xlu1 %1989 }
 0x5dd   : > { %3726 = vmatprep.mubr.msk.f32.mxu1 %vm919_vm2, %v4720_v23 }
 0x5de   : > { %v4724_v31 = vpop.eup %3940  ;;  %v1992_v52 = vpop.permute.xlu0 %1991 }
 0x5df   : > { %3727 = vmatmul.mubr.msk.f32.gmra.mxu1 %vm919_vm2, %v4724_v31 }
 0x5e0   : > { %v4728_v42 = vpop.eup %3942  ;;  %v1994_v0 = vpop.permute.xlu1 %1993 }
 0x5e1   : > { %3729 = vmatprep.mubr.msk.f32.mxu1 %vm919_vm2, %v4728_v42 }
 0x5e2   : > { %v4732_v1 = vpop.eup %3944  ;;  %v1996_v22 = vpop.permute.xlu0 %1995 }
 0x5e3   : > { %3730 = vmatmul.mubr.msk.f32.gmra.mxu1 %vm919_vm2, %v4732_v1 }
 0x5e4   : > { %3748 = vmatprep.mubr.msk.f32.mxu1 %vm765_vm1, %v1982_v21  ;;  %v2243_v44 = vpop.permute.xlu1 %2242 }
 0x5e6   : > { %v2245_v46 = vpop.permute.xlu0 %2244 }
 0x5e7   : > { %3749 = vmatmul.mubr.msk.f32.vlgmr.msra.gmra.mxu1 %vm765_vm1, %v1984_v20  ;;  %3760 = vmatprep.subr.mxu0 %v2245_v46 }
 0x5e8   : > { %3848 = vmatprep.subr.mxu1 %v2245_v46  ;;  %3751 = vmatprep.mubr.msk.f32.mxu1 %vm765_vm1, %v1986_v38  ;;  %v2241_v49 = vpop.permute.xlu1 %2240 }
 0x5e9   : > { %3761 = vmatpush3.msra.mxu0 %v2245_v46  ;;  %3856 = vmatpush3.msra.mxu1 %v2245_v46 }
 0x5ea   : > { %3762 = vmatprep.subr.mxu0 %v2243_v44  ;;  %3849 = vmatprep.subr.mxu1 %v2243_v44  ;;  %v2239_v50 = vpop.permute.xlu0 %2238 }
 0x5eb   : > { %3763 = vmatpush3.msra.mxu0 %v2243_v44  ;;  %3857 = vmatpush3.msra.mxu1 %v2243_v44 }
 0x5ec   : > { %3752 = vmatmul.mubr.msk.f32.gmra.mxu1 %vm765_vm1, %v1988_v39  ;;  %3764 = vmatprep.subr.mxu0 %v2241_v49  ;;  %v2237_v62 = vpop.permute.xlu1 %2236 }
 0x5ed   : > { %3850 = vmatprep.subr.mxu1 %v2241_v49  ;;  %3754 = vmatprep.mubr.msk.f32.mxu1 %vm765_vm1, %v1990_v29 }
 0x5ee   : > { %3765 = vmatpush3.msra.mxu0 %v2241_v49  ;;  %3858 = vmatpush3.msra.mxu1 %v2241_v49  ;;  %v2235_v26 = vpop.permute.xlu0 %2234 }
 0x5ef   : > { %3766 = vmatprep.subr.mxu0 %v2239_v50  ;;  %3851 = vmatprep.subr.mxu1 %v2239_v50 }
 0x5f0   : > { %3767 = vmatpush3.msra.mxu0 %v2239_v50  ;;  %3859 = vmatpush3.msra.mxu1 %v2239_v50 }
 0x5f1   : > { %3755 = vmatmul.mubr.msk.f32.gmra.mxu1 %vm765_vm1, %v1992_v52  ;;  %3768 = vmatprep.subr.mxu0 %v2237_v62 }
 0x5f2   : > { %3852 = vmatprep.subr.mxu1 %v2237_v62  ;;  %3757 = vmatprep.mubr.msk.f32.mxu1 %vm765_vm1, %v1994_v0 }
 0x5f3   : > { %3769 = vmatpush3.msra.mxu0 %v2237_v62  ;;  %3860 = vmatpush3.msra.mxu1 %v2237_v62 }
 0x5f4   : > { %3770 = vmatprep.subr.mxu0 %v2235_v26  ;;  %3853 = vmatprep.subr.mxu1 %v2235_v26 }
 0x5f5   : > { %3771 = vmatpush3.msra.mxu0 %v2235_v26  ;;  %3861 = vmatpush3.msra.mxu1 %v2235_v26 }
 0x5f6   : > { %3758 = vmatmul.mubr.msk.f32.gmra.mxu1 %vm765_vm1, %v1996_v22 }
 0x667   : > { %v4744_v28 = vpop.f32.mrf.mxu1 }
 0x669   : > { %v4746_v33 = vpop.f32.mrf.mxu1 }
 0x69b   : > { %v4748_v34 = vpop.f32.mrf.mxu1 }
 0x69d   : > { %v4750_v7 = vpop.f32.mrf.mxu1 }
 0x69f   : > { %v4752_v35 = vpop.f32.mrf.mxu1 }
 0x6a1   : > { %v4754_v5 = vpop.f32.mrf.mxu1 }
 0x6a3   : > { %v4756_v36 = vpop.f32.mrf.mxu1 }
 0x6a5   : > { %v4758_v37 = vpop.f32.mrf.mxu1 }
 0x6a7   : > { %v4760_v21 = vpop.f32.mrf.mxu1 }
 0x6a8   : > { %v2153_v20 = vsel %vm919_vm2, %v4760_v21, -inf }
 0x6a9   : > { %2154 = vmax.xlane.f32.xlu0 %v2153_v20  ;;  %v4764_v38 = vpop.f32.mrf.mxu1 }
 0x6aa   : > { %v2150_v39 = vsel %vm919_vm2, %v4764_v38, -inf }
 0x6ab   : > { %2151 = vmax.xlane.f32.xlu1 %v2150_v39 }
 0x6ac   : > { %v4768_v29 = vpop.f32.mrf.mxu1 }
 0x6ad   : > { %v2159_v0 = vsel %vm919_vm2, %v4768_v29, -inf }
 0x6ae   : > { %v4770_v52 = vpop.f32.mrf.mxu1 }
 0x6af   : > { %2160 = vmax.xlane.f32.xlu1 %v2159_v0  ;;  %v2156_v22 = vsel %vm919_vm2, %v4770_v52, -inf  ;;  %v1378_v0 = vsel %vm919_vm2, %v4540_v3, 0.0  ;;  %v1797_v3 = vsel %vm919_vm2, %v4716_v47, 0.0  ;;  %v1806_v47 = vsel %vm919_vm2, %v4728_v42, 0.0 }
 0x6b0   : > { %2157 = vmax.xlane.f32.xlu0 %v2156_v22  ;;  %v1381_v22 = vsel %vm919_vm2, %v4542_v4, 0.0  ;;  %v1794_v4 = vsel %vm919_vm2, %v4712_v30, 0.0  ;;  %v1399_v30 = vsel %vm919_vm2, %v4590_v8, 0.0  ;;  %v968_v8 = vsel %vm919_vm2, %v4394_v16, 0.0 }
 0x6b1   : > { %v4776_v44 = vpop.f32.mrf.mxu1 }
 0x6b2   : > { %v2165_v46 = vsel %vm919_vm2, %v4776_v44, -inf }
 0x6b3   : > { %v4780_v49 = vpop.f32.mrf.mxu1  ;;  %2166 = vmax.xlane.f32.xlu1 %v2165_v46  ;;  %v1791_v46 = vsel %vm919_vm2, %v4684_v27, 0.0  ;;  %v1800_v27 = vsel %vm919_vm2, %v4720_v23, 0.0  ;;  %v971_v23 = vsel %vm919_vm2, %v4396_v17, 0.0 }
 0x6b4   : > { %v2162_v50 = vsel %vm919_vm2, %v4780_v49, -inf }
 0x6b5   : > { %2163 = vmax.xlane.f32.xlu0 %v2162_v50  ;;  %v1788_v50 = vsel %vm919_vm2, %v4682_v32, 0.0  ;;  %v1393_v32 = vsel %vm919_vm2, %v4582_v2, 0.0  ;;  %v1396_v2 = vsel %vm919_vm2, %v4586_v6, 0.0 }
 0x6b6   : > { %v4784_v62 = vpop.f32.mrf.mxu1 }
 0x6b7   : > { %v2171_v26 = vsel %vm919_vm2, %v4784_v62, -inf }
 0x6b8   : > { %v4788_v20 = vpop.f32.mrf.mxu1  ;;  %2172 = vmax.xlane.f32.xlu1 %v2171_v26 }
 0x6b9   : > { %v2168_v39 = vsel %vm919_vm2, %v4788_v20, -inf }
 0x6ba   : > { %2169 = vmax.xlane.f32.xlu0 %v2168_v39 }
 0x6c9   : > { %2232 = vrot.lane.b32.xlu1 %v4224_v24, %s4072_s15  ;;  %v1387_v24 = vsel %vm919_vm2, %v4574_v48, 0.0  ;;  %v1390_v48 = vsel %vm919_vm2, %v4578_v45, 0.0  ;;  %v1809_v45 = vsel %vm919_vm2, %v4732_v1, 0.0 }
 0x6d0   : > { %2230 = vrot.lane.b32.xlu0 %v4228_v25, %s4072_s15  ;;  %v1384_v25 = vsel %vm919_vm2, %v4570_v61, 0.0  ;;  %v1803_v61 = vsel %vm919_vm2, %v4724_v31, 0.0 }
 0x6ed   : > { %1379 = vadd.xlane.f32.xlu1 %v1378_v0 }
 0x6ef   : > { %1382 = vadd.xlane.f32.xlu0 %v1381_v22 }
 0x6f1   : > { %1792 = vadd.xlane.f32.xlu1 %v1791_v46 }
 0x6f3   : > { %1789 = vadd.xlane.f32.xlu0 %v1788_v50 }
 0x6f5   : > { %1388 = vadd.xlane.f32.xlu1 %v1387_v24 }
 0x6f7   : > { %1385 = vadd.xlane.f32.xlu0 %v1384_v25 }
 0x6f9   : > { %1798 = vadd.xlane.f32.xlu1 %v1797_v3 }
 0x6fb   : > { %1795 = vadd.xlane.f32.xlu0 %v1794_v4 }
 0x6fd   : > { %1394 = vadd.xlane.f32.xlu1 %v1393_v32 }
 0x6ff   : > { %1391 = vadd.xlane.f32.xlu0 %v1390_v48 }
 0x701   : > { %1804 = vadd.xlane.f32.xlu1 %v1803_v61 }
 0x703   : > { %1801 = vadd.xlane.f32.xlu0 %v1800_v27 }
 0x705   : > { %1400 = vadd.xlane.f32.xlu1 %v1399_v30 }
 0x707   : > { %1397 = vadd.xlane.f32.xlu0 %v1396_v2 }
 0x709   : > { %1810 = vadd.xlane.f32.xlu1 %v1809_v45 }
 0x70b   : > { %1807 = vadd.xlane.f32.xlu0 %v1806_v47 }
 0x70d   : > { %972 = vadd.xlane.f32.xlu1 %v971_v23 }
 0x70f   : > { %969 = vadd.xlane.f32.xlu0 %v968_v8 }
 0x732   : > { %v2155_v31 = vpop.xlane.xlu0 %2154 }
 0x733   : > { %v2175_v6 = vsub.f32 %v4760_v21, %v2155_v31 }
 0x734   : > { %v2152_v26 = vpop.xlane.xlu1 %2151 }
 0x735   : > { %v2184_v39 = vmul.f32 1.442695, %v2175_v6  ;;  %v2174_v1 = vsub.f32 %v4764_v38, %v2152_v26 }
 0x737   : > { %3946 = vpow2.f32 %v2184_v39  ;;  %v2182_v0 = vmul.f32 1.442695, %v2174_v1 }
 0x738   : > { %v2161_v22 = vpop.xlane.xlu1 %2160 }
 0x739   : > { %3948 = vpow2.f32 %v2182_v0  ;;  %v2158_v42 = vpop.xlane.xlu0 %2157  ;;  %v2177_v46 = vsub.f32 %v4768_v29, %v2161_v22 }
 0x73a   : > { %v2176_v17 = vsub.f32 %v4770_v52, %v2158_v42 }
 0x73b   : > { %v2188_v50 = vmul.f32 1.442695, %v2177_v46  ;;  %v977_v46 = vsel %vm919_vm2, %v4426_v56, 0.0  ;;  %v986_v56 = vsel %vm919_vm2, %v4436_v60, 0.0 }
 0x73c   : > { %v2186_v24 = vmul.f32 1.442695, %v2176_v17  ;;  %v2167_v16 = vpop.xlane.xlu1 %2166  ;;  %v974_v17 = vsel %vm919_vm2, %v4400_v18, 0.0 }
 0x73d   : > { %3950 = vpow2.f32 %v2188_v50  ;;  %v2179_v25 = vsub.f32 %v4776_v44, %v2167_v16  ;;  %v983_v50 = vsel %vm919_vm2, %v4434_v59, 0.0  ;;  %v989_v16 = vsel %vm919_vm2, %v4442_v63, 0.0 }
 0x73e   : > { %3952 = vpow2.f32 %v2186_v24  ;;  %v2164_v21 = vpop.xlane.xlu0 %2163  ;;  %v980_v24 = vsel %vm919_vm2, %v4428_v57, 0.0 }
 0x73f   : > { %v2178_v3 = vsub.f32 %v4780_v49, %v2164_v21  ;;  %v2192_v38 = vmul.f32 1.442695, %v2179_v25 }
 0x741   : > { %v2190_v4 = vmul.f32 1.442695, %v2178_v3  ;;  %3954 = vpow2.f32 %v2192_v38  ;;  %v2173_v32 = vpop.xlane.xlu1 %2172 }
 0x742   : > { %v2181_v48 = vsub.f32 %v4784_v62, %v2173_v32 }
 0x743   : > { %3956 = vpow2.f32 %v2190_v4  ;;  %v2170_v29 = vpop.xlane.xlu0 %2169 }
 0x744   : > { %v3947_v61 = vpop.eup %3946  ;;  %v2180_v52 = vsub.f32 %v4788_v20, %v2170_v29  ;;  %v2196_v27 = vmul.f32 1.442695, %v2181_v48 }
 0x745   : > { %v2233_v30 = vpop.permute.xlu1 %2232  ;;  %v2201_v2 = vsel %vm919_vm2, %v3947_v61, 0.0 }
 0x746   : > { %v3949_v44 = vpop.eup %3948  ;;  %v2194_v45 = vmul.f32 1.442695, %v2180_v52  ;;  %3958 = vpow2.f32 %v2196_v27  ;;  %3772 = vmatprep.subr.mxu0 %v2233_v30  ;;  %3854 = vmatprep.subr.mxu1 %v2233_v30 }
 0x747   : > { %v2231_v49 = vpop.permute.xlu0 %2230  ;;  %2202 = vadd.xlane.f32.xlu1 %v2201_v2  ;;  %3773 = vmatpush3.msra.mxu0 %v2233_v30  ;;  %v2198_v47 = vsel %vm919_vm2, %v3949_v44, 0.0 }
 0x748   : > { %3960 = vpow2.f32 %v2194_v45  ;;  %3862 = vmatpush3.msra.mxu1 %v2233_v30  ;;  %3774 = vmatprep.subr.mxu0 %v2231_v49 }
 0x749   : > { %3855 = vmatprep.subr.mxu1 %v2231_v49  ;;  %3776 = vmatprep.mubr.msk.f32.mxu0 %vm919_vm2, %v3949_v44 }
 0x74a   : > { %v3951_v62 = vpop.eup %3950  ;;  %2199 = vadd.xlane.f32.xlu0 %v2198_v47  ;;  %3775 = vmatpush3.msra.mxu0 %v2231_v49 }
 0x74b   : > { %v3953_v20 = vpop.eup %3952  ;;  %3863 = vmatpush3.msra.mxu1 %v2231_v49  ;;  %3777 = vmatmul.mubr.msk.f32.vlgmr.msra.gmra.mxu0 %vm919_vm2, %v3947_v61  ;;  %v2207_v23 = vsel %vm919_vm2, %v3951_v62, 0.0 }
 0x74c   : > { %3779 = vmatprep.mubr.msk.f32.mxu0 %vm919_vm2, %v3953_v20  ;;  %v2204_v8 = vsel %vm919_vm2, %v3953_v20, 0.0  ;;  %2208 = vadd.xlane.f32.xlu1 %v2207_v23 }
 0x74e   : > { %v3955_v31 = vpop.eup %3954  ;;  %2205 = vadd.xlane.f32.xlu0 %v2204_v8 }
 0x74f   : > { %3780 = vmatmul.mubr.msk.f32.gmra.mxu0 %vm919_vm2, %v3951_v62  ;;  %v2213_v6 = vsel %vm919_vm2, %v3955_v31, 0.0 }
 0x750   : > { %v3957_v26 = vpop.eup %3956  ;;  %2214 = vadd.xlane.f32.xlu1 %v2213_v6 }
 0x751   : > { %3782 = vmatprep.mubr.msk.f32.mxu1 %vm919_vm2, %v3957_v26  ;;  %v2210_v39 = vsel %vm919_vm2, %v3957_v26, 0.0 }
 0x752   : > { %2211 = vadd.xlane.f32.xlu0 %v2210_v39  ;;  %3783 = vmatmul.mubr.msk.f32.vlgmr.msra.gmra.mxu1 %vm919_vm2, %v3955_v31 }
 0x753   : > { %v3959_v1 = vpop.eup %3958 }
 0x754   : > { %v2219_v0 = vsel %vm919_vm2, %v3959_v1, 0.0 }
 0x755   : > { %v3961_v22 = vpop.eup %3960  ;;  %2220 = vadd.xlane.f32.xlu1 %v2219_v0 }
 0x756   : > { %3785 = vmatprep.mubr.msk.f32.mxu1 %vm919_vm2, %v3961_v22  ;;  %v2216_v42 = vsel %vm919_vm2, %v3961_v22, 0.0 }
 0x757   : > { %2217 = vadd.xlane.f32.xlu0 %v2216_v42  ;;  %3786 = vmatmul.mubr.msk.f32.gmra.mxu1 %vm919_vm2, %v3959_v1 }
 0x759   : > { %978 = vadd.xlane.f32.xlu1 %v977_v46 }
 0x75b   : > { %975 = vadd.xlane.f32.xlu0 %v974_v17 }
 0x75d   : > { %984 = vadd.xlane.f32.xlu1 %v983_v50 }
 0x75f   : > { %981 = vadd.xlane.f32.xlu0 %v980_v24 }
 0x761   : > { %990 = vadd.xlane.f32.xlu1 %v989_v16 }
 0x763   : > { %987 = vadd.xlane.f32.xlu0 %v986_v56 }
 0x776   : > { %v1380_v25 = vpop.xlane.xlu1 %1379 }
 0x777   : > { %3962 = vrcp.f32 %v1380_v25 }
 0x778   : > { %v1383_v18 = vpop.xlane.xlu0 %1382 }
 0x779   : > { %3964 = vrcp.f32 %v1383_v18 }
 0x77a   : > { %v1793_v21 = vpop.xlane.xlu1 %1792 }
 0x77b   : > { %3966 = vrcp.f32 %v1793_v21 }
 0x77c   : > { %v1790_v59 = vpop.xlane.xlu0 %1789 }
 0x77d   : > { %3968 = vrcp.f32 %v1790_v59  ;;  %v2513_v59 = vld [vmem:[%s5141_s5] sm:$0xff] }
 0x77e   : > { %v1389_v3 = vpop.xlane.xlu1 %1388 }
 0x77f   : > { %3970 = vrcp.f32 %v1389_v3 }
 0x780   : > { %v1386_v57 = vpop.xlane.xlu0 %1385 }
 0x781   : > { %3972 = vrcp.f32 %v1386_v57 }
 0x782   : > { %v1799_v38 = vpop.xlane.xlu1 %1798 }
 0x783   : > { %3974 = vrcp.f32 %v1799_v38 }
 0x784   : > { %v3963_v63 = vpop.eup %3962  ;;  %v1796_v4 = vpop.xlane.xlu0 %1795 }
 0x785   : > { %3976 = vrcp.f32 %v1796_v4  ;;  %v1563_v60 = vmul.f32 %v3963_v63, %v4608_v51 }
 0x786   : > { %v3965_v32 = vpop.eup %3964  ;;  %v1395_v48 = vpop.xlane.xlu1 %1394 }
 0x787   : > { %3978 = vrcp.f32 %v1395_v48  ;;  %v1564_v29 = vmul.f32 %v3965_v32, %v4606_v53  ;;  %2399 = vrot.lane.b32.xlu0 %v1563_v60, %s4073_s21 }
 0x788   : > { %v3967_v61 = vpop.eup %3966  ;;  %v1392_v52 = vpop.xlane.xlu0 %1391 }
 0x789   : > { %3980 = vrcp.f32 %v1392_v52  ;;  %2401 = vrot.lane.b32.xlu1 %v1564_v29, %s4073_s21  ;;  %v1974_v27 = vmul.f32 %v3967_v61, %v4744_v28 }
 0x78a   : > { %v3969_v30 = vpop.eup %3968  ;;  %v1805_v2 = vpop.xlane.xlu1 %1804 }
 0x78b   : > { %3982 = vrcp.f32 %v1805_v2  ;;  %v1973_v51 = vmul.f32 %v3969_v30, %v4746_v33  ;;  %2433 = vrot.lane.b32.xlu0 %v1974_v27, %s4074_s22 }
 0x78c   : > { %v3971_v44 = vpop.eup %3970  ;;  %v1802_v53 = vpop.xlane.xlu0 %1801 }
 0x78d   : > { %3984 = vrcp.f32 %v1802_v53  ;;  %2431 = vrot.lane.b32.xlu1 %v1973_v51, %s4074_s22  ;;  %v1566_v45 = vmul.f32 %v3971_v44, %v4610_v41 }
 0x78e   : > { %v3973_v49 = vpop.eup %3972  ;;  %v1401_v47 = vpop.xlane.xlu1 %1400 }
 0x78f   : > { %3986 = vrcp.f32 %v1401_v47  ;;  %v1565_v28 = vmul.f32 %v3973_v49, %v4612_v54  ;;  %2405 = vrot.lane.b32.xlu0 %v1566_v45, %s4073_s21 }
 0x790   : > { %v3975_v62 = vpop.eup %3974  ;;  %v1398_v20 = vpop.xlane.xlu0 %1397 }
 0x791   : > { %3988 = vrcp.f32 %v1398_v20  ;;  %2403 = vrot.lane.b32.xlu1 %v1565_v28, %s4073_s21  ;;  %v1976_v33 = vmul.f32 %v3975_v62, %v4748_v34 }
 0x792   : > { %v3977_v23 = vpop.eup %3976  ;;  %v1811_v8 = vpop.xlane.xlu1 %1810 }
 0x793   : > { %3990 = vrcp.f32 %v1811_v8  ;;  %v1975_v31 = vmul.f32 %v3977_v23, %v4750_v7  ;;  %2437 = vrot.lane.b32.xlu0 %v1976_v33, %s4074_s22 }
 0x794   : > { %v3979_v41 = vpop.eup %3978  ;;  %v1808_v6 = vpop.xlane.xlu0 %1807 }
 0x795   : > { %3992 = vrcp.f32 %v1808_v6  ;;  %2435 = vrot.lane.b32.xlu1 %v1975_v31, %s4074_s22  ;;  %v1568_v54 = vmul.f32 %v3979_v41, %v4614_v40  ;;  %v2516_v40 = vld [vmem:[%s5141_s5 + $0x18] sm:$0xff] }
 0x796   : > { %v3981_v26 = vpop.eup %3980  ;;  %3788 = vmatprep.subr.mxu0 %v2516_v40  ;;  %v4908_v16 = vpop.xlane.xlu1 %972 }
 0x797   : > { %v1567_v39 = vmul.f32 %v3981_v26, %v4616_v55  ;;  %2409 = vrot.lane.b32.xlu0 %v1568_v54, %s4073_s21  ;;  %v2515_v55 = vld [vmem:[%s5141_s5 + $0x10] sm:$0xff]  ;;  %3789 = vmatpush3.msra.mxu0 %v2516_v40 }
 0x798   : > { %v3983_v34 = vpop.eup %3982  ;;  %3790 = vmatprep.subr.mxu0 %v2515_v55 }
 0x799   : > { %2407 = vrot.lane.b32.xlu1 %v1567_v39, %s4073_s21  ;;  %v1978_v1 = vmul.f32 %v3983_v34, %v4752_v35  ;;  %3791 = vmatpush3.msra.mxu0 %v2515_v55 }
 0x79a   : > { %v3985_v7 = vpop.eup %3984 }
 0x79b   : > { %v1977_v0 = vmul.f32 %v3985_v7, %v4754_v5  ;;  %2441 = vrot.lane.b32.xlu0 %v1978_v1, %s4074_s22 }
 0x79c   : > { %v3987_v22 = vpop.eup %3986 }
 0x79d   : > { %2439 = vrot.lane.b32.xlu1 %v1977_v0, %s4074_s22  ;;  %v1570_v42 = vmul.f32 %v3987_v22, %v4618_v58  ;;  %v4906_v58 = vpop.xlane.xlu0 %969 }
 0x79e   : > { %v3989_v35 = vpop.eup %3988 }
 0x79f   : > { %v1569_v5 = vmul.f32 %v3989_v35, %v4620_v43  ;;  %2413 = vrot.lane.b32.xlu0 %v1570_v42, %s4073_s21 }
 0x7a0   : > { %v3991_v46 = vpop.eup %3990 }
 0x7a1   : > { %2411 = vrot.lane.b32.xlu1 %v1569_v5, %s4073_s21  ;;  %v1980_v17 = vmul.f32 %v3991_v46, %v4756_v36  ;;  %v2514_v36 = vld [vmem:[%s5141_s5 + $0x8] sm:$0xff] }
 0x7a2   : > { %v3993_v50 = vpop.eup %3992  ;;  %3792 = vmatprep.subr.mxu0 %v2514_v36 }
 0x7a3   : > { %v1979_v24 = vmul.f32 %v3993_v50, %v4758_v37  ;;  %2445 = vrot.lane.b32.xlu0 %v1980_v17, %s4074_s22  ;;  %3793 = vmatpush3.msra.mxu0 %v2514_v36 }
 0x7a4   : > { %3794 = vmatprep.subr.mxu0 %v2513_v59 }
 0x7a5   : > { %2443 = vrot.lane.b32.xlu1 %v1979_v24, %s4074_s22  ;;  %3795 = vmatpush3.msra.mxu0 %v2513_v59 }
 0x7d0   : > { %v2203_v43 = vpop.xlane.xlu1 %2202 }
 0x7d1   : > { %3994 = vrcp.f32 %v2203_v43 }
 0x7d3   : > { %v2200_v56 = vpop.xlane.xlu0 %2199 }
 0x7d4   : > { %3996 = vrcp.f32 %v2200_v56 }
 0x7d5   : > { %v2209_v25 = vpop.xlane.xlu1 %2208 }
 0x7d6   : > { %3998 = vrcp.f32 %v2209_v25 }
 0x7d7   : > { %v2206_v18 = vpop.xlane.xlu0 %2205 }
 0x7d8   : > { %4000 = vrcp.f32 %v2206_v18 }
 0x7d9   : > { %v2215_v21 = vpop.xlane.xlu1 %2214 }
 0x7da   : > { %4002 = vrcp.f32 %v2215_v21 }
 0x7db   : > { %v2212_v37 = vpop.xlane.xlu0 %2211 }
 0x7dc   : > { %4004 = vrcp.f32 %v2212_v37 }
 0x7de   : > { %v2221_v3 = vpop.xlane.xlu1 %2220  ;;  %v3995_v38 = vpop.eup %3994 }
 0x7df   : > { %4006 = vrcp.f32 %v2221_v3 }
 0x7e0   : > { %v2218_v57 = vpop.xlane.xlu0 %2217 }
 0x7e1   : > { %4008 = vrcp.f32 %v2218_v57  ;;  %v3997_v60 = vpop.eup %3996 }
 0x7e2   : > { %v979_v41 = vpop.xlane.xlu1 %978  ;;  %4010 = vrcp.f32 %v4906_v58 }
 0x7e3   : > { %v3999_v29 = vpop.eup %3998  ;;  %4012 = vrcp.f32 %v4908_v16 }
 0x7e4   : > { %v976_v31 = vpop.xlane.xlu0 %975 }
 0x7e5   : > { %v4001_v27 = vpop.eup %4000  ;;  %4014 = vrcp.f32 %v976_v31 }
 0x7e6   : > { %v985_v54 = vpop.xlane.xlu1 %984  ;;  %4016 = vrcp.f32 %v979_v41 }
 0x7e7   : > { %v4003_v2 = vpop.eup %4002 }
 0x7e8   : > { %v982_v6 = vpop.xlane.xlu0 %981 }
 0x7e9   : > { %v4005_v45 = vpop.eup %4004  ;;  %4018 = vrcp.f32 %v982_v6 }
 0x7ea   : > { %v991_v39 = vpop.xlane.xlu1 %990  ;;  %4020 = vrcp.f32 %v985_v54 }
 0x7ec   : > { %v4007_v28 = vpop.eup %4006  ;;  %v988_v26 = vpop.xlane.xlu0 %987 }
 0x7ed   : > { %4022 = vrcp.f32 %v988_v26 }
 0x7ee   : > { %v4009_v33 = vpop.eup %4008  ;;  %4024 = vrcp.f32 %v991_v39 }
 0x7ef   : > { %v4011_v43 = vpop.eup %4010 }
 0x7f0   : > { %v4013_v25 = vpop.eup %4012  ;;  %v1153_v21 = vmul.f32 %v4011_v43, %v4460_v10 }
 0x7f1   : > { %v1154_v16 = vmul.f32 %v4013_v25, %v4458_v9 }
 0x7f2   : > { %v4015_v58 = vpop.eup %4014 }
 0x7f3   : > { %v4017_v37 = vpop.eup %4016 }
 0x7f9   : > { %v2400_v34 = vpop.permute.xlu0 %2399 }
 0x7fa   : > { %v2487_v59 = vsel %vm765_vm1, %v1153_v21, %v2400_v34  ;;  %v2728_v34 = vld [vmem:[%s5143_s7 + $0x18] sm:$0xff] }
 0x7fb   : > { %v2402_v1 = vpop.permute.xlu1 %2401  ;;  %3808 = vmatprep.subr.mxu1 %v2728_v34 }
 0x7fc   : > { %v2488_v3 = vsel %vm765_vm1, %v1154_v16, %v2402_v1  ;;  %v2727_v1 = vld [vmem:[%s5143_s7 + $0x10] sm:$0xff]  ;;  %3809 = vmatpush3.msra.mxu1 %v2728_v34 }
 0x7fd   : > { %v2434_v7 = vpop.permute.xlu0 %2433  ;;  %3810 = vmatprep.subr.mxu1 %v2727_v1 }
 0x7fe   : > { %3811 = vmatpush3.msra.mxu1 %v2727_v1 }
 0x7ff   : > { %v2432_v0 = vpop.permute.xlu1 %2431 }
 0x800   : > { %v2496_v57 = vsel %vm2495_vm3, %v2487_v59, %v2432_v0  ;;  %v2725_v0 = vld [vmem:[%s5143_s7] sm:$0xff] }
 0x801   : > { %v2406_v22 = vpop.permute.xlu0 %2405 }
 0x803   : > { %v2404_v40 = vpop.permute.xlu1 %2403 }
 0x805   : > { %v2438_v55 = vpop.permute.xlu0 %2437 }
 0x807   : > { %v2436_v42 = vpop.permute.xlu1 %2435 }
 0x809   : > { %v2410_v35 = vpop.permute.xlu0 %2409 }
 0x80b   : > { %v3778_v63 = vpop.f32.mrf.mxu0  ;;  %v2408_v5 = vpop.permute.xlu1 %2407 }
 0x80c   : > { %v2384_v4 = vmul.f32 %v3995_v38, %v3778_v63  ;;  %v2497_v63 = vsel %vm2495_vm3, %v2488_v3, %v2434_v7  ;;  %v2726_v7 = vld [vmem:[%s5143_s7 + $0x8] sm:$0xff] }
 0x80d   : > { %v2344_v32 = vpop.f32.mrf.mxu0  ;;  %v2442_v46 = vpop.permute.xlu0 %2441  ;;  %3812 = vmatprep.subr.mxu1 %v2726_v7 }
 0x80e   : > { %v2383_v48 = vmul.f32 %v3997_v60, %v2344_v32  ;;  %2465 = vrot.lane.b32.xlu0 %v2384_v4, %s4075_s12  ;;  %v1155_v4 = vmul.f32 %v4015_v58, %v4464_v12  ;;  %v4019_v60 = vpop.eup %4018  ;;  %v1156_v32 = vmul.f32 %v4017_v37, %v4462_v11  ;;  %3813 = vmatpush3.msra.mxu1 %v2726_v7 }
 0x80f   : > { %v3781_v61 = vpop.f32.mrf.mxu0  ;;  %v2440_v17 = vpop.permute.xlu1 %2439  ;;  %3814 = vmatprep.subr.mxu1 %v2725_v0 }
 0x810   : > { %v2386_v52 = vmul.f32 %v3999_v29, %v3781_v61  ;;  %2463 = vrot.lane.b32.xlu1 %v2383_v48, %s4075_s12  ;;  %v4021_v29 = vpop.eup %4020  ;;  %v2489_v61 = vsel %vm765_vm1, %v1155_v4, %v2404_v40  ;;  %3815 = vmatpush3.msra.mxu1 %v2725_v0  ;;  %v2867_v40 = vld [vmem:[%s5145_s9 + $0x10] sm:$0xff] }
 0x811   : > { %v2354_v30 = vpop.f32.mrf.mxu0  ;;  %v2414_v50 = vpop.permute.xlu0 %2413 }
 0x812   : > { %v2385_v51 = vmul.f32 %v4001_v27, %v2354_v30  ;;  %v3784_v44 = vpop.f32.mrf.mxu1  ;;  %2469 = vrot.lane.b32.xlu0 %v2386_v52, %s4075_s12  ;;  %v2490_v52 = vsel %vm765_vm1, %v1156_v32, %v2406_v22  ;;  %v2498_v27 = vsel %vm2495_vm3, %v2489_v61, %v2436_v42  ;;  %v2868_v22 = vld [vmem:[%s5145_s9 + $0x18] sm:$0xff]  ;;  %v2865_v42 = vld [vmem:[%s5145_s9] sm:$0xff] }
 0x813   : > { %v2388_v53 = vmul.f32 %v4003_v2, %v3784_v44  ;;  %v2412_v24 = vpop.permute.xlu1 %2411  ;;  %v2499_v30 = vsel %vm2495_vm3, %v2490_v52, %v2438_v55  ;;  %v1157_v2 = vmul.f32 %v4019_v60, %v4468_v14  ;;  %v1158_v44 = vmul.f32 %v4021_v29, %v4466_v13  ;;  %3828 = vmatprep.subr.mxu0 %v2868_v22  ;;  %v2866_v55 = vld [vmem:[%s5145_s9 + $0x8] sm:$0xff] }
 0x814   : > { %v2364_v49 = vpop.f32.mrf.mxu1  ;;  %2467 = vrot.lane.b32.xlu1 %v2385_v51, %s4075_s12  ;;  %v4023_v51 = vpop.eup %4022 }
 0x815   : > { %v2387_v47 = vmul.f32 %v4005_v45, %v2364_v49  ;;  %v2446_v56 = vpop.permute.xlu0 %2445  ;;  %v4025_v49 = vpop.eup %4024 }
 0x816   : > { %2473 = vrot.lane.b32.xlu0 %v2388_v53, %s4075_s12 }
 0x817   : > { %v3787_v62 = vpop.f32.mrf.mxu1  ;;  %v2444_v18 = vpop.permute.xlu1 %2443 }
 0x818   : > { %v2390_v20 = vmul.f32 %v4007_v28, %v3787_v62  ;;  %2471 = vrot.lane.b32.xlu1 %v2387_v47, %s4075_s12  ;;  %v2491_v47 = vsel %vm765_vm1, %v1157_v2, %v2408_v5  ;;  %v2492_v28 = vsel %vm765_vm1, %v1158_v44, %v2410_v35  ;;  %v3303_v35 = vld [vmem:[%s5142_s6] ss:$0 sm:$0xff] }
 0x819   : > { %v2374_v23 = vpop.f32.mrf.mxu1  ;;  %v2500_v62 = vsel %vm2495_vm3, %v2491_v47, %v2440_v17 }
 0x81a   : > { %v2389_v8 = vmul.f32 %v4009_v33, %v2374_v23  ;;  %2477 = vrot.lane.b32.xlu0 %v2390_v20, %s4075_s12  ;;  %v2501_v20 = vsel %vm2495_vm3, %v2492_v28, %v2442_v46  ;;  %v1159_v33 = vmul.f32 %v4023_v51, %v4472_v19  ;;  %v1160_v23 = vmul.f32 %v4025_v49, %v4470_v15 }
 0x81c   : > { %2475 = vrot.lane.b32.xlu1 %v2389_v8, %s4075_s12  ;;  %v2493_v31 = vsel %vm765_vm1, %v1159_v33, %v2412_v24  ;;  %v2494_v6 = vsel %vm765_vm1, %v1160_v23, %v2414_v50 }
 0x81d   : > { %v2502_v54 = vsel %vm2495_vm3, %v2493_v31, %v2444_v18  ;;  %v2503_v19 = vsel %vm2495_vm3, %v2494_v6, %v2446_v56 }
 0x880   : > { %v2466_v36 = vpop.permute.xlu0 %2465 }
 0x881   : > { %v2506_v9 = vsel %vm2504_vm4, %v2497_v63, %v2466_v36 }
 0x882   : > { %v2464_v38 = vpop.permute.xlu1 %2463 }
 0x883   : > { %v2505_v10 = vsel %vm2504_vm4, %v2496_v57, %v2464_v38 }
 0x884   : > { %v2470_v48 = vpop.permute.xlu0 %2469  ;;  %3796 = vmatprep.mubr.msk.f32.mxu0 %vm502_vm0, %v2505_v10 }
 0x885   : > { %3797 = vmatmul.mubr.msk.f32.vlgmr.msra.gmra.mxu0 %vm502_vm0, %v2506_v9  ;;  %v2508_v53 = vsel %vm2504_vm4, %v2499_v30, %v2470_v48 }
 0x886   : > { %v2468_v12 = vpop.permute.xlu1 %2467  ;;  %3829 = vmatpush3.msra.mxu0 %v2868_v22 }
 0x887   : > { %v2507_v11 = vsel %vm2504_vm4, %v2498_v27, %v2468_v12  ;;  %3830 = vmatprep.subr.mxu0 %v2867_v40 }
 0x888   : > { %v2474_v45 = vpop.permute.xlu0 %2473  ;;  %3799 = vmatprep.mubr.msk.f32.mxu0 %vm502_vm0, %v2507_v11  ;;  %3831 = vmatpush3.msra.mxu0 %v2867_v40 }
 0x889   : > { %3800 = vmatmul.mubr.msk.f32.gmra.mxu0 %vm502_vm0, %v2508_v53  ;;  %v2510_v8 = vsel %vm2504_vm4, %v2501_v20, %v2474_v45  ;;  %3832 = vmatprep.subr.mxu0 %v2866_v55 }
 0x88a   : > { %v2472_v14 = vpop.permute.xlu1 %2471  ;;  %3833 = vmatpush3.msra.mxu0 %v2866_v55 }
 0x88b   : > { %v2509_v13 = vsel %vm2504_vm4, %v2500_v62, %v2472_v14  ;;  %3834 = vmatprep.subr.mxu0 %v2865_v42 }
 0x88c   : > { %3802 = vmatprep.mubr.msk.f32.mxu0 %vm502_vm0, %v2509_v13  ;;  %v2478_v41 = vpop.permute.xlu0 %2477  ;;  %3835 = vmatpush3.msra.mxu0 %v2865_v42 }
 0x88d   : > { %3803 = vmatmul.mubr.msk.f32.gmra.mxu0 %vm502_vm0, %v2510_v8  ;;  %v2512_v15 = vsel %vm2504_vm4, %v2503_v19, %v2478_v41 }
 0x88e   : > { %v2476_v26 = vpop.permute.xlu1 %2475 }
 0x88f   : > { %v2511_v39 = vsel %vm2504_vm4, %v2502_v54, %v2476_v26 }
 0x890   : > { %3805 = vmatprep.mubr.msk.f32.mxu0 %vm502_vm0, %v2511_v39 }
 0x891   : > { %3806 = vmatmul.mubr.msk.f32.gmra.mxu0 %vm502_vm0, %v2512_v15 }
 0x945   : > { %v3798_v5 = vpop.f32.mrf.mxu0 }
 0x946   : > { %v4985_v46 = vadd.f32 %v3798_v5, %v3303_v35 }
 0x947   : > { %v2614_v17 = vpop.f32.mrf.mxu0 }
 0x948   : > { %v2654_v50 = vmul.f32 %v4985_v46, %v4985_v46  ;;  %v4989_v24 = vadd.f32 %v3303_v35, %v2614_v17 }
 0x949   : > { %v3801_v43 = vpop.f32.mrf.mxu0 }
 0x94a   : > { %v2662_v56 = vmul.f32 %v2654_v50, %v4985_v46  ;;  %v2653_v25 = vmul.f32 %v4989_v24, %v4989_v24  ;;  %v4994_v18 = vadd.f32 %v3801_v43, %v3303_v35 }
 0x94b   : > { %v2624_v21 = vpop.f32.mrf.mxu0 }
 0x94c   : > { %v2670_v58 = vmul.f32 0.044715, %v2662_v56  ;;  %v2661_v16 = vmul.f32 %v2653_v25, %v4989_v24  ;;  %v2656_v36 = vmul.f32 %v4994_v18, %v4994_v18  ;;  %v4999_v37 = vadd.f32 %v3303_v35, %v2624_v21 }
 0x94d   : > { %v3804_v59 = vpop.f32.mrf.mxu0 }
 0x94e   : > { %v2678_v3 = vadd.f32 %v2670_v58, %v4985_v46  ;;  %v2669_v57 = vmul.f32 0.044715, %v2661_v16  ;;  %v2664_v38 = vmul.f32 %v2656_v36, %v4994_v18  ;;  %v2655_v63 = vmul.f32 %v4999_v37, %v4999_v37 }
 0x94f   : > { %v5005_v4 = vadd.f32 %v3804_v59, %v3303_v35  ;;  %v2634_v10 = vpop.f32.mrf.mxu0 }
 0x950   : > { %v2686_v60 = vmul.f32 0.7978846, %v2678_v3  ;;  %v2677_v32 = vadd.f32 %v2669_v57, %v4989_v24  ;;  %v2672_v9 = vmul.f32 0.044715, %v2664_v38  ;;  %v2663_v48 = vmul.f32 %v2655_v63, %v4999_v37 }
 0x951   : > { %v2658_v29 = vmul.f32 %v5005_v4, %v5005_v4  ;;  %v5011_v61 = vadd.f32 %v3303_v35, %v2634_v10  ;;  %v3807_v52 = vpop.f32.mrf.mxu0 }
 0x952   : > { %4026 = vtanh.f32 %v2686_v60  ;;  %v2685_v27 = vmul.f32 0.7978846, %v2677_v32  ;;  %v2680_v12 = vadd.f32 %v2672_v9, %v4994_v18  ;;  %v2671_v30 = vmul.f32 0.044715, %v2663_v48 }
 0x953   : > { %v2666_v2 = vmul.f32 %v2658_v29, %v5005_v4  ;;  %v2657_v11 = vmul.f32 %v5011_v61, %v5011_v61  ;;  %v5017_v51 = vadd.f32 %v3807_v52, %v3303_v35  ;;  %v2644_v44 = vpop.f32.mrf.mxu0 }
 0x954   : > { %4028 = vtanh.f32 %v2685_v27  ;;  %v2688_v53 = vmul.f32 0.7978846, %v2680_v12  ;;  %v2679_v45 = vadd.f32 %v2671_v30, %v4999_v37  ;;  %v5020_v49 = vadd.f32 %v3303_v35, %v2644_v44 }
 0x955   : > { %v2674_v47 = vmul.f32 0.044715, %v2666_v2  ;;  %v2665_v28 = vmul.f32 %v2657_v11, %v5011_v61  ;;  %v2660_v62 = vmul.f32 %v5017_v51, %v5017_v51 }
 0x956   : > { %4030 = vtanh.f32 %v2688_v53  ;;  %v2687_v14 = vmul.f32 0.7978846, %v2679_v45  ;;  %v2659_v20 = vmul.f32 %v5020_v49, %v5020_v49  ;;  %v3014_v53 = vld [vmem:[%s5069_s23 + $0x8] sm:$0xff] }
 0x957   : > { %v2682_v33 = vadd.f32 %v2674_v47, %v5005_v4  ;;  %v2673_v13 = vmul.f32 0.044715, %v2665_v28  ;;  %v2668_v23 = vmul.f32 %v2660_v62, %v5017_v51  ;;  %v5080_v47 = vld [vmem:[%s5144_s8] ss:$0 sm:$0xff]  ;;  %vm3030_vm5 = vcmp.eq.s32.totalorder %v3014_v53, 1 }
 0x958   : > { %4032 = vtanh.f32 %v2687_v14  ;;  %v2667_v8 = vmul.f32 %v2659_v20, %v5020_v49  ;;  %v3013_v28 = vld [vmem:[%s5069_s23] sm:$0xff]  ;;  %vm3022_vm6 = vcmp.eq.s32.totalorder %v3014_v53, 0  ;;  %v3016_v20 = vld [vmem:[%s5069_s23 + $0x18] sm:$0xff] }
 0x959   : > { %v2690_v31 = vmul.f32 0.7978846, %v2682_v33  ;;  %v2681_v41 = vadd.f32 %v2673_v13, %v5011_v61  ;;  %v2676_v6 = vmul.f32 0.044715, %v2668_v23  ;;  %vm3029_vm7 = vcmp.eq.s32.totalorder %v3013_v28, 1 }
 0x95a   : > { %v2675_v54 = vmul.f32 0.044715, %v2667_v8  ;;  %vm3021_vm8 = vcmp.eq.s32.totalorder %v3013_v28, 0  ;;  %vm3032_vm9 = vcmp.eq.s32.totalorder %v3016_v20, 1  ;;  %vm3024_vm10 = vcmp.eq.s32.totalorder %v3016_v20, 0 }
 0x95b   : > { %4034 = vtanh.f32 %v2690_v31  ;;  %v2689_v26 = vmul.f32 0.7978846, %v2681_v41  ;;  %v2684_v19 = vadd.f32 %v2676_v6, %v5017_v51  ;;  %v3015_v41 = vld [vmem:[%s5069_s23 + $0x10] sm:$0xff] }
 0x95c   : > { %v2683_v39 = vadd.f32 %v2675_v54, %v5020_v49  ;;  %vm3031_vm11 = vcmp.eq.s32.totalorder %v3015_v41, 1  ;;  %vm3023_vm12 = vcmp.eq.s32.totalorder %v3015_v41, 0 }
 0x95d   : > { %4036 = vtanh.f32 %v2689_v26  ;;  %v2692_v15 = vmul.f32 0.7978846, %v2684_v19 }
 0x95e   : > { %v2691_v34 = vmul.f32 0.7978846, %v2683_v39 }
 0x95f   : > { %v4027_v1 = vpop.eup %4026  ;;  %4038 = vtanh.f32 %v2692_v15 }
 0x960   : > { %4040 = vtanh.f32 %v2691_v34  ;;  %v2702_v7 = vadd.f32 1.0, %v4027_v1 }
 0x961   : > { %v4029_v0 = vpop.eup %4028 }
 0x962   : > { %v2710_v22 = vmul.f32 0.5, %v2702_v7  ;;  %v2701_v40 = vadd.f32 1.0, %v4029_v0  ;;  %v3018_v0 = vld [vmem:[%s5069_s23 + $0x28] sm:$0xff] }
 0x963   : > { %v4031_v55 = vpop.eup %4030  ;;  %vm3034_vm13 = vcmp.eq.s32.totalorder %v3018_v0, 1  ;;  %vm3026_vm14 = vcmp.eq.s32.totalorder %v3018_v0, 0 }
 0x964   : > { %v2718_v42 = vmul.f32 %v2710_v22, %v4985_v46  ;;  %v2709_v35 = vmul.f32 0.5, %v2701_v40  ;;  %v2704_v5 = vadd.f32 1.0, %v4031_v55 }
 0x965   : > { %v4033_v17 = vpop.eup %4032 }
 0x966   : > { %2878 = vrot.lane.b32.xlu0 %v2718_v42, %s4066_s28  ;;  %v2717_v50 = vmul.f32 %v2709_v35, %v4989_v24  ;;  %v2712_v43 = vmul.f32 0.5, %v2704_v5  ;;  %v2703_v56 = vadd.f32 1.0, %v4033_v17  ;;  %v3017_v35 = vld [vmem:[%s5069_s23 + $0x20] sm:$0xff] }
 0x967   : > { %vm3033_vm15 = vcmp.eq.s32.totalorder %v3017_v35, 1  ;;  %vm3025_vm1 = vcmp.eq.s32.totalorder %v3017_v35, 0 }
 0x968   : > { %v4035_v25 = vpop.eup %4034  ;;  %2876 = vrot.lane.b32.xlu1 %v2717_v50, %s4066_s28  ;;  %3816 = vmatprep.mubr.msk.f32.mxu1 %vm502_vm0, %v2717_v50  ;;  %v2720_v21 = vmul.f32 %v2712_v43, %v4994_v18  ;;  %v2711_v58 = vmul.f32 0.5, %v2703_v56 }
 0x969   : > { %3817 = vmatmul.mubr.msk.f32.vlgmr.msra.gmra.mxu1 %vm502_vm0, %v2718_v42  ;;  %v2706_v46 = vadd.f32 1.0, %v4035_v25  ;;  %v3020_v25 = vld [vmem:[%s5069_s23 + $0x38] sm:$0xff] }
 0x96a   : > { %v4037_v16 = vpop.eup %4036  ;;  %2882 = vrot.lane.b32.xlu0 %v2720_v21, %s4066_s28  ;;  %v2719_v36 = vmul.f32 %v2711_v58, %v4999_v37  ;;  %vm3036_vm2 = vcmp.eq.s32.totalorder %v3020_v25, 1  ;;  %vm3028_vm3 = vcmp.eq.s32.totalorder %v3020_v25, 0 }
 0x96b   : > { %v2714_v59 = vmul.f32 0.5, %v2706_v46  ;;  %v2705_v24 = vadd.f32 1.0, %v4037_v16 }
 0x96c   : > { %v4039_v3 = vpop.eup %4038  ;;  %2880 = vrot.lane.b32.xlu1 %v2719_v36, %s4066_s28  ;;  %3819 = vmatprep.mubr.msk.f32.mxu1 %vm502_vm0, %v2719_v36  ;;  %v3019_v36 = vld [vmem:[%s5069_s23 + $0x30] sm:$0xff] }
 0x96d   : > { %v4041_v57 = vpop.eup %4040  ;;  %3820 = vmatmul.mubr.msk.f32.gmra.mxu1 %vm502_vm0, %v2720_v21  ;;  %v2722_v18 = vmul.f32 %v2714_v59, %v5005_v4  ;;  %v2713_v38 = vmul.f32 0.5, %v2705_v24  ;;  %v2708_v63 = vadd.f32 1.0, %v4039_v3  ;;  %vm3035_vm4 = vcmp.eq.s32.totalorder %v3019_v36, 1 }
 0x96e   : > { %v2707_v10 = vadd.f32 1.0, %v4041_v57 }
 0x96f   : > { %2886 = vrot.lane.b32.xlu0 %v2722_v18, %s4066_s28  ;;  %v2721_v60 = vmul.f32 %v2713_v38, %v5011_v61  ;;  %v2716_v37 = vmul.f32 0.5, %v2708_v63 }
 0x970   : > { %v2715_v32 = vmul.f32 0.5, %v2707_v10 }
 0x971   : > { %2884 = vrot.lane.b32.xlu1 %v2721_v60, %s4066_s28  ;;  %3822 = vmatprep.mubr.msk.f32.mxu1 %vm502_vm0, %v2721_v60  ;;  %v2724_v9 = vmul.f32 %v2716_v37, %v5017_v51 }
 0x972   : > { %3823 = vmatmul.mubr.msk.f32.gmra.mxu1 %vm502_vm0, %v2722_v18  ;;  %v2723_v48 = vmul.f32 %v2715_v32, %v5020_v49  ;;  %v5075_v49 = vld [vmem:[%s5146_s10] ss:$0 sm:$0xff] }
 0x973   : > { %2890 = vrot.lane.b32.xlu0 %v2724_v9, %s4066_s28 }
 0x974   : > { %3825 = vmatprep.mubr.msk.f32.mxu1 %vm502_vm0, %v2723_v48 }
 0x975   : > { %2888 = vrot.lane.b32.xlu1 %v2723_v48, %s4066_s28 }
 0x976   : > { %3826 = vmatmul.mubr.msk.f32.gmra.mxu1 %vm502_vm0, %v2724_v9 }
 0x9d8   : > { %v2879_v4 = vpop.permute.xlu0 %2878 }
 0x9da   : > { %v2877_v29 = vpop.permute.xlu1 %2876 }
 0x9db   : > { %3836 = vmatprep.mubr.msk.f32.mxu0 %vm502_vm0, %v2877_v29 }
 0x9dc   : > { %v2883_v61 = vpop.permute.xlu0 %2882  ;;  %3837 = vmatmul.mubr.msk.f32.vlgmr.msra.gmra.mxu0 %vm502_vm0, %v2879_v4 }
 0x9de   : > { %v2881_v52 = vpop.permute.xlu1 %2880 }
 0x9df   : > { %3839 = vmatprep.mubr.msk.f32.mxu0 %vm502_vm0, %v2881_v52 }
 0x9e0   : > { %3840 = vmatmul.mubr.msk.f32.gmra.mxu0 %vm502_vm0, %v2883_v61 }
 0x9e1   : > { %v2887_v27 = vpop.permute.xlu0 %2886 }
 0x9e3   : > { %v2885_v12 = vpop.permute.xlu1 %2884 }
 0x9e4   : > { %3842 = vmatprep.mubr.msk.f32.mxu0 %vm502_vm0, %v2885_v12 }
 0x9e5   : > { %3843 = vmatmul.mubr.msk.f32.gmra.mxu0 %vm502_vm0, %v2887_v27  ;;  %v2891_v2 = vpop.permute.xlu0 %2890 }
 0x9e7   : > { %v2889_v30 = vpop.permute.xlu1 %2888 }
 0x9e8   : > { %3845 = vmatprep.mubr.msk.f32.mxu0 %vm502_vm0, %v2889_v30 }
 0x9e9   : > { %3846 = vmatmul.mubr.msk.f32.gmra.mxu0 %vm502_vm0, %v2891_v2 }
 0xa29   : > { %v3818_v11 = vpop.f32.mrf.mxu1 }
 0xa2a   : > { %v2832_v33 = vadd.f32 %v3818_v11, %v5080_v47 }
 0xa2b   : > { %v2826_v51 = vpop.f32.mrf.mxu1 }
 0xa2c   : > { %v2827_v6 = vadd.f32 %v5080_v47, %v2826_v51 }
 0xa2d   : > { %v3821_v44 = vpop.f32.mrf.mxu1 }
 0xa2e   : > { %v2842_v15 = vadd.f32 %v3821_v44, %v5080_v47 }
 0xa2f   : > { %v2836_v45 = vpop.f32.mrf.mxu1 }
 0xa30   : > { %v2837_v55 = vadd.f32 %v5080_v47, %v2836_v45 }
 0xa32   : > { %v3824_v13 = vpop.f32.mrf.mxu1 }
 0xa33   : > { %v2852_v21 = vadd.f32 %v3824_v13, %v5080_v47 }
 0xa34   : > { %v2846_v34 = vpop.f32.mrf.mxu1 }
 0xa35   : > { %v2847_v59 = vadd.f32 %v5080_v47, %v2846_v34 }
 0xa36   : > { %v3827_v50 = vpop.f32.mrf.mxu1 }
 0xa37   : > { %v2862_v63 = vadd.f32 %v3827_v50, %v5080_v47 }
 0xa38   : > { %v2856_v57 = vpop.f32.mrf.mxu1 }
 0xa39   : > { %v2857_v9 = vadd.f32 %v5080_v47, %v2856_v57 }
 0xa9c   : > { %v3838_v62 = vpop.f32.mrf.mxu0 }
 0xa9d   : > { %v2980_v14 = vadd.f32 %v3838_v62, %v5075_v49 }
 0xa9e   : > { %v2974_v23 = vpop.f32.mrf.mxu0 }
 0xa9f   : > { %v3038_v8 = vsel %vm3030_vm5, %v2980_v14, 0.0  ;;  %v2975_v31 = vadd.f32 %v5075_v49, %v2974_v23  ;;  %vm3027_vm5 = vcmp.eq.s32.totalorder %v3019_v36, 0 }
 0xaa0   : > { %v3046_v54 = vsel %vm3022_vm6, %v2832_v33, %v3038_v8  ;;  %v3841_v26 = vpop.f32.mrf.mxu0 }
 0xaa1   : > { %3054 = vst.msk [vmem:[%s5090_s30 + $0x8] sm:$0xff] %vm502_vm0, %v3046_v54  ;;  %v3037_v19 = vsel %vm3029_vm7, %v2975_v31, 0.0  ;;  %v2990_v39 = vadd.f32 %v3841_v26, %v5075_v49 }
 0xaa2   : > { %v3045_v1 = vsel %vm3021_vm8, %v2827_v6, %v3037_v19  ;;  %v2984_v7 = vpop.f32.mrf.mxu0 }
 0xaa3   : > { %3053 = vst.msk [vmem:[%s5090_s30] sm:$0xff] %vm502_vm0, %v3045_v1  ;;  %v3040_v22 = vsel %vm3032_vm9, %v2990_v39, 0.0  ;;  %v2985_v40 = vadd.f32 %v5075_v49, %v2984_v7 }
 0xaa4   : > { %v3048_v42 = vsel %vm3024_vm10, %v2842_v15, %v3040_v22 }
 0xaa5   : > { %3056 = vst.msk [vmem:[%s5090_s30 + $0x18] sm:$0xff] %vm502_vm0, %v3048_v42  ;;  %v3039_v5 = vsel %vm3031_vm11, %v2985_v40, 0.0  ;;  %v3844_v17 = vpop.f32.mrf.mxu0 }
 0xaa6   : > { %v3047_v43 = vsel %vm3023_vm12, %v2837_v55, %v3039_v5  ;;  %v3000_v56 = vadd.f32 %v3844_v17, %v5075_v49 }
 0xaa7   : > { %3055 = vst.msk [vmem:[%s5090_s30 + $0x10] sm:$0xff] %vm502_vm0, %v3047_v43  ;;  %v2994_v58 = vpop.f32.mrf.mxu0 }
 0xaa8   : > { %v3042_v46 = vsel %vm3034_vm13, %v3000_v56, 0.0  ;;  %v2995_v16 = vadd.f32 %v5075_v49, %v2994_v58 }
 0xaa9   : > { %v3050_v24 = vsel %vm3026_vm14, %v2852_v21, %v3042_v46  ;;  %v3847_v3 = vpop.f32.mrf.mxu0 }
 0xaaa   : > { %3058 = vst.msk [vmem:[%s5090_s30 + $0x28] sm:$0xff] %vm502_vm0, %v3050_v24  ;;  %v3041_v18 = vsel %vm3033_vm15, %v2995_v16, 0.0  ;;  %v3010_v38 = vadd.f32 %v3847_v3, %v5075_v49 }
 0xaab   : > { %v3049_v10 = vsel %vm3025_vm1, %v2847_v59, %v3041_v18  ;;  %v3004_v60 = vpop.f32.mrf.mxu0 }
 0xaac   : > { %3057 = vst.msk [vmem:[%s5090_s30 + $0x20] sm:$0xff] %vm502_vm0, %v3049_v10  ;;  %v3044_v37 = vsel %vm3036_vm2, %v3010_v38, 0.0  ;;  %v3005_v32 = vadd.f32 %v5075_v49, %v3004_v60 }
 0xaad   : > { %v3052_v48 = vsel %vm3028_vm3, %v2862_v63, %v3044_v37 }
 0xaae   : > { %3060 = vst.msk [vmem:[%s5090_s30 + $0x38] sm:$0xff] %vm502_vm0, %v3052_v48  ;;  %v3043_v4 = vsel %vm3035_vm4, %v3005_v32, 0.0 }
 0xaaf   : > { %v3051_v29 = vsel %vm3027_vm5, %v2857_v9, %v3043_v4 }
 0xab0   : > { %3059 = vst.msk [vmem:[%s5090_s30 + $0x30] sm:$0xff] %vm502_vm0, %v3051_v29 }
 0xab1 PF: > { %s21_s19 = sadd.s32 1, %s4064_s19   ;;  %s5148_s17 = smov %s4060_s18 }
 0xab2   : > { %p18_p5 = scmp.ge.s32.totalorder %s21_s19, 4   ;;  %s5149_s18 = smov %s5151_s20 }
 0xab4   :  { %20 = sbr.rel (!%p18_p5) target bundleno = 2 (0x2), region = 100 }

</bundles_post_ra>
